<compile_context>
chip_gen: v5e
topology: v5e:2x2
jax: 0.10.0
libtpu: 0.0.40
codegen_flags: <defaults>
</compile_context>

<pallas_src>
import functools

import jax
import jax.numpy as jnp
from jax.experimental import pallas as pl
from jax.experimental.pallas import tpu as pltpu

EPS = 1e-5
C = 3                      # channel count throughout the model
NUM_CONV = 5               # stem, blk1.conv1, blk1.conv2, blk2.conv1, blk2.conv2
FC_OUT = 4

# flat SMEM parameter-table offsets
W_OFF = 0                                  # conv weights: layer*9 + cin*3 + cout
BN_G_OFF = W_OFF + NUM_CONV * C * C        # 45
BN_B_OFF = BN_G_OFF + NUM_CONV * C         # 60
FC_W_OFF = BN_B_OFF + NUM_CONV * C         # 75  (cin*4 + cout)
FC_B_OFF = FC_W_OFF + C * FC_OUT           # 87
N_PARAMS = FC_B_OFF + FC_OUT               # 91

VMEM_SPEC = pl.BlockSpec(memory_space=pltpu.MemorySpace.VMEM)
SMEM_SPEC = pl.BlockSpec(memory_space=pltpu.MemorySpace.SMEM)


def _relu(v):
    return jnp.maximum(v, 0.0)


def _relu6(v):
    return jnp.clip(v, 0.0, 6.0)


def _fused_kernel(p_ref, x_ref, o_ref, *, W):
    # p_ref: (N_PARAMS,) f32 SMEM   x_ref: (N, C, H*W) f32 VMEM   o_ref: (N, 4) f32 VMEM
    N, _, HW = x_ref.shape

    def full_sum(v):                       # (N, HW) -> (1, 1)
        return jnp.sum(jnp.sum(v, axis=1, keepdims=True), axis=0, keepdims=True)

    def conv_bn(feats, layer, inv_n, act, maskf):
        """1x1 conv (VPU scalar*vector FMAs) + training-mode BatchNorm2d.

        Conv bias omitted (cancelled exactly by BN mean subtraction).
        One-pass stats: sum and sum-of-squares are independent reductions.
        """
        wb = W_OFF + layer * C * C
        outs = []
        for c in range(C):
            h = (p_ref[wb + 0 * C + c] * feats[0]
                 + p_ref[wb + 1 * C + c] * feats[1]
                 + p_ref[wb + 2 * C + c] * feats[2])
            hm = h if maskf is None else h * maskf
            s1 = full_sum(hm)
            s2 = full_sum(hm * hm)
            mean = s1 * inv_n
            var = s2 * inv_n - mean * mean                    # biased variance
            scale = p_ref[BN_G_OFF + layer * C + c] * jax.lax.rsqrt(var + EPS)
            y = (h - mean) * scale + p_ref[BN_B_OFF + layer * C + c]
            outs.append(act(y) if act is not None else y)
        return outs

    def basic_block(feats, l1, l2, inv_n, maskf):
        h = conv_bn(feats, l1, inv_n, _relu6, maskf)          # conv1 -> BN -> ReLU6
        h = conv_bn(h, l2, inv_n, None, maskf)                # conv2 -> BN
        return [_relu6(h[c] + feats[c]) for c in range(C)]    # +identity -> ReLU6

    # ---- lane-position helpers (spatial flattened into the lane axis) ----
    lane = jax.lax.broadcasted_iota(jnp.int32, (N, HW), 1)
    if (W & (W - 1)) == 0:                                    # power-of-two width (16 here)
        shift = W.bit_length() - 1
        rowpos = lane >> shift
        colpos = lane & (W - 1)
    else:
        rowpos = lane // W
        colpos = lane % W
    col0 = colpos == 0
    # valid maxpool outputs live at (even row, even col) of the full-res grid
    maskf = jnp.logical_and((rowpos & 1) == 0, (colpos & 1) == 0).astype(jnp.float32)

    def maxpool_3x3_s2_p1(s):
        """3x3 / stride-2 / pad-1 max pool kept at full (N, H*W) resolution.

        Separable sliding-window max via clamped shift-copies.  Only the
        (even row, even col) entries equal the PyTorch pool output; everything
        else is excluded from later reductions via `maskf`.
        """
        prev_r = jnp.concatenate([s[:, :W], s[:, :HW - W]], axis=1)    # row r-1 (clamped)
        next_r = jnp.concatenate([s[:, W:], s[:, HW - W:]], axis=1)    # row r+1 (clamped)
        rm = jnp.maximum(jnp.maximum(s, prev_r), next_r)
        prev_c = jnp.concatenate([rm[:, :1], rm[:, :HW - 1]], axis=1)  # col c-1
        prev_c = jnp.where(col0, rm, prev_c)                           # left pad at col 0
        # col c+1; its cross-row wrap at col W-1 only touches odd (invalid) cols
        next_c = jnp.concatenate([rm[:, 1:], rm[:, HW - 1:]], axis=1)
        return jnp.maximum(jnp.maximum(rm, prev_c), next_c)

    # ---- stem: conv1x1 -> BN -> ReLU (stats over all N*H*W elements) ----
    xs = [x_ref[:, c, :] for c in range(C)]                   # each (N, H*W)
    stem = conv_bn(xs, 0, 1.0 / float(N * HW), _relu, None)

    # ---- maxpool 3x3 / s2 / p1 ----
    feats = [maxpool_3x3_s2_p1(stem[c]) for c in range(C)]
    inv_blk = 1.0 / float(N * (HW // 4))                      # N * (H/2) * (W/2) valid elems

    # ---- two BasicBlocks (layer ids 1/2 and 3/4 in the packed table) ----
    feats = basic_block(feats, 1, 2, inv_blk, maskf)
    feats = basic_block(feats, 3, 4, inv_blk, maskf)

    # ---- GAP(1,1) + flatten + Linear(3, 4), written straight to (N, 4) ----
    inv_hw = 1.0 / float(HW // 4)
    gaps = [jnp.sum(feats[c] * maskf, axis=1, keepdims=True) * inv_hw
            for c in range(C)]                                # each (N, 1)
    cols = []
    for j in range(FC_OUT):
        cols.append(p_ref[FC_B_OFF + j]
                    + p_ref[FC_W_OFF + 0 * FC_OUT + j] * gaps[0]
                    + p_ref[FC_W_OFF + 1 * FC_OUT + j] * gaps[1]
                    + p_ref[FC_W_OFF + 2 * FC_OUT + j] * gaps[2])
    o_ref[...] = jnp.concatenate(cols, axis=1)                # (N, 4)


def init_params(key):
    ks = jax.random.split(key, 12)

    def conv(k, cin, cout, scale=0.3):
        kw, kb = jax.random.split(k)
        return (scale * jax.random.normal(kw, (cin, cout), jnp.float32),
                0.1 * jax.random.normal(kb, (1, cout), jnp.float32))

    def bn(k, c):
        kg, kb = jax.random.split(k)
        return (1.0 + 0.1 * jax.random.normal(kg, (1, c), jnp.float32),
                0.1 * jax.random.normal(kb, (1, c), jnp.float32))

    p = {}
    p['stem_w'], p['stem_b'] = conv(ks[0], 3, 3)
    p['stem_g'], p['stem_be'] = bn(ks[1], 3)
    for bi, base in enumerate(['blk1', 'blk2']):
        p[f'{base}_w1'], p[f'{base}_b1'] = conv(ks[2 + 4 * bi], 3, 3)
        p[f'{base}_g1'], p[f'{base}_be1'] = bn(ks[3 + 4 * bi], 3)
        p[f'{base}_w2'], p[f'{base}_b2'] = conv(ks[4 + 4 * bi], 3, 3)
        p[f'{base}_g2'], p[f'{base}_be2'] = bn(ks[5 + 4 * bi], 3)
    p['fc_w'] = 0.3 * jax.random.normal(ks[10], (3, 4), jnp.float32)
    p['fc_b'] = 0.1 * jax.random.normal(ks[11], (1, 4), jnp.float32)
    return p


@jax.jit
def toy_model_forward(x_nchw, params):
    N, Cin, H, W = x_nchw.shape
    assert Cin == C and H % 2 == 0 and W % 2 == 0   # TODO(synk): odd H/W maxpool tail not handled

    # One flat f32 scalar table (lives in SMEM).  Conv biases (params['*_b*'])
    # are intentionally omitted: each conv feeds a training-mode BatchNorm whose
    # mean subtraction cancels them exactly.
    flat_params = jnp.concatenate([
        params['stem_w'].reshape(-1),
        params['blk1_w1'].reshape(-1), params['blk1_w2'].reshape(-1),
        params['blk2_w1'].reshape(-1), params['blk2_w2'].reshape(-1),
        params['stem_g'].reshape(-1),
        params['blk1_g1'].reshape(-1), params['blk1_g2'].reshape(-1),
        params['blk2_g1'].reshape(-1), params['blk2_g2'].reshape(-1),
        params['stem_be'].reshape(-1),
        params['blk1_be1'].reshape(-1), params['blk1_be2'].reshape(-1),
        params['blk2_be1'].reshape(-1), params['blk2_be2'].reshape(-1),
        params['fc_w'].reshape(-1),
        params['fc_b'].reshape(-1),
    ]).astype(jnp.float32)                                    # (N_PARAMS,)

    # Free (bitcast) reshape: NCHW -> (N, C, H*W); spatial flattened into lanes.
    x_flat = x_nchw.reshape(N, Cin, H * W)

    out = pl.pallas_call(
        functools.partial(_fused_kernel, W=W),
        out_shape=jax.ShapeDtypeStruct((N, FC_OUT), jnp.float32),
        in_specs=[SMEM_SPEC, VMEM_SPEC],
        out_specs=VMEM_SPEC,
    )(flat_params, x_flat)
    return out


if __name__ == "__main__":
    key = jax.random.PRNGKey(0)
    kx, kp = jax.random.split(key)
    x = jax.random.normal(kx, (2, 3, 16, 16), jnp.float32)    # NCHW like PyTorch
    params = init_params(kp)
    y = toy_model_forward(x, params)
    jax.block_until_ready(y)
    assert y.shape == (2, 4) and y.dtype == jnp.float32
    assert bool(jnp.all(jnp.isfinite(y)))
    print("KERNEL_OK")
</pallas_src>

<mosaic_0001>
module attributes {stable_mosaic.version = 11 : i64} {
  func.func @_fused_kernel(%arg0: memref<91xf32, #tpu.memory_space<smem>>, %arg1: memref<2x3x256xf32, #tpu.memory_space<vmem>>, %arg2: memref<2x4xf32, #tpu.memory_space<vmem>>) attributes {dimension_semantics = [], scalar_prefetch = 0 : i64, scratch_operands = 0 : i64, tpu.core_type = #tpu.core_type<tc>} {
    %0 = tpu.iota {dimensions = array<i32: 1>} : vector<2x256xi32>
    %c4_i32 = arith.constant 4 : i32
    %1 = vector.broadcast %c4_i32 : i32 to vector<2x256xi32>
    %2 = arith.shrsi %0, %1 : vector<2x256xi32>
    %c15_i32 = arith.constant 15 : i32
    %3 = vector.broadcast %c15_i32 : i32 to vector<2x256xi32>
    %4 = arith.andi %0, %3 : vector<2x256xi32>
    %c0_i32 = arith.constant 0 : i32
    %5 = vector.broadcast %c0_i32 : i32 to vector<2x256xi32>
    %6 = arith.cmpi eq, %4, %5 : vector<2x256xi32>
    %c1_i32 = arith.constant 1 : i32
    %7 = vector.broadcast %c1_i32 : i32 to vector<2x256xi32>
    %8 = arith.andi %2, %7 : vector<2x256xi32>
    %c0_i32_0 = arith.constant 0 : i32
    %9 = vector.broadcast %c0_i32_0 : i32 to vector<2x256xi32>
    %10 = arith.cmpi eq, %8, %9 : vector<2x256xi32>
    %c1_i32_1 = arith.constant 1 : i32
    %11 = vector.broadcast %c1_i32_1 : i32 to vector<2x256xi32>
    %12 = arith.andi %4, %11 : vector<2x256xi32>
    %c0_i32_2 = arith.constant 0 : i32
    %13 = vector.broadcast %c0_i32_2 : i32 to vector<2x256xi32>
    %14 = arith.cmpi eq, %12, %13 : vector<2x256xi32>
    %15 = arith.andi %10, %14 : vector<2x256xi1>
    %16 = arith.extui %15 : vector<2x256xi1> to vector<2x256xi32>
    %17 = arith.sitofp %16 : vector<2x256xi32> to vector<2x256xf32>
    %c0 = arith.constant 0 : index
    %c0_3 = arith.constant 0 : index
    %c0_4 = arith.constant 0 : index
    %18 = vector.load %arg1[%c0, %c0_3, %c0_4] : memref<2x3x256xf32, #tpu.memory_space<vmem>>, vector<2x1x256xf32>
    %19 = vector.shape_cast %18 : vector<2x1x256xf32> to vector<2x256xf32>
    %c0_5 = arith.constant 0 : index
    %c1 = arith.constant 1 : index
    %c0_6 = arith.constant 0 : index
    %20 = vector.load %arg1[%c0_5, %c1, %c0_6] : memref<2x3x256xf32, #tpu.memory_space<vmem>>, vector<2x1x256xf32>
    %21 = vector.shape_cast %20 : vector<2x1x256xf32> to vector<2x256xf32>
    %c0_7 = arith.constant 0 : index
    %c2 = arith.constant 2 : index
    %c0_8 = arith.constant 0 : index
    %22 = vector.load %arg1[%c0_7, %c2, %c0_8] : memref<2x3x256xf32, #tpu.memory_space<vmem>>, vector<2x1x256xf32>
    %23 = vector.shape_cast %22 : vector<2x1x256xf32> to vector<2x256xf32>
    %c0_9 = arith.constant 0 : index
    %24 = memref.load %arg0[%c0_9] : memref<91xf32, #tpu.memory_space<smem>>
    %25 = vector.broadcast %24 : f32 to vector<2x256xf32>
    %26 = arith.mulf %25, %19 : vector<2x256xf32>
    %c3 = arith.constant 3 : index
    %27 = memref.load %arg0[%c3] : memref<91xf32, #tpu.memory_space<smem>>
    %28 = vector.broadcast %27 : f32 to vector<2x256xf32>
    %29 = arith.mulf %28, %21 : vector<2x256xf32>
    %30 = arith.addf %26, %29 : vector<2x256xf32>
    %c6 = arith.constant 6 : index
    %31 = memref.load %arg0[%c6] : memref<91xf32, #tpu.memory_space<smem>>
    %32 = vector.broadcast %31 : f32 to vector<2x256xf32>
    %33 = arith.mulf %32, %23 : vector<2x256xf32>
    %34 = arith.addf %30, %33 : vector<2x256xf32>
    %cst = arith.constant dense<0.000000e+00> : vector<2xf32>
    %35 = vector.multi_reduction <add>, %34, %cst [1] : vector<2x256xf32> to vector<2xf32>
    %36 = vector.shape_cast %35 : vector<2xf32> to vector<2x1xf32>
    %cst_10 = arith.constant dense<0.000000e+00> : vector<1xf32>
    %37 = vector.multi_reduction <add>, %36, %cst_10 [0] : vector<2x1xf32> to vector<1xf32>
    %38 = vector.shape_cast %37 : vector<1xf32> to vector<1x1xf32>
    %39 = arith.mulf %34, %34 : vector<2x256xf32>
    %cst_11 = arith.constant dense<0.000000e+00> : vector<2xf32>
    %40 = vector.multi_reduction <add>, %39, %cst_11 [1] : vector<2x256xf32> to vector<2xf32>
    %41 = vector.shape_cast %40 : vector<2xf32> to vector<2x1xf32>
    %cst_12 = arith.constant dense<0.000000e+00> : vector<1xf32>
    %42 = vector.multi_reduction <add>, %41, %cst_12 [0] : vector<2x1xf32> to vector<1xf32>
    %43 = vector.shape_cast %42 : vector<1xf32> to vector<1x1xf32>
    %cst_13 = arith.constant 0.001953125 : f32
    %44 = vector.broadcast %cst_13 : f32 to vector<1x1xf32>
    %45 = arith.mulf %38, %44 : vector<1x1xf32>
    %cst_14 = arith.constant 0.001953125 : f32
    %46 = vector.broadcast %cst_14 : f32 to vector<1x1xf32>
    %47 = arith.mulf %43, %46 : vector<1x1xf32>
    %48 = arith.mulf %45, %45 : vector<1x1xf32>
    %49 = arith.subf %47, %48 : vector<1x1xf32>
    %c45 = arith.constant 45 : index
    %50 = memref.load %arg0[%c45] : memref<91xf32, #tpu.memory_space<smem>>
    %cst_15 = arith.constant 9.99999974E-6 : f32
    %51 = vector.broadcast %cst_15 : f32 to vector<1x1xf32>
    %52 = arith.addf %49, %51 : vector<1x1xf32>
    %53 = math.rsqrt %52 : vector<1x1xf32>
    %54 = vector.broadcast %50 : f32 to vector<1x1xf32>
    %55 = arith.mulf %54, %53 : vector<1x1xf32>
    %56 = vector.broadcast %45 : vector<1x1xf32> to vector<2x256xf32>
    %57 = arith.subf %34, %56 : vector<2x256xf32>
    %58 = vector.broadcast %55 : vector<1x1xf32> to vector<2x256xf32>
    %59 = arith.mulf %57, %58 : vector<2x256xf32>
    %c60 = arith.constant 60 : index
    %60 = memref.load %arg0[%c60] : memref<91xf32, #tpu.memory_space<smem>>
    %61 = vector.broadcast %60 : f32 to vector<2x256xf32>
    %62 = arith.addf %59, %61 : vector<2x256xf32>
    %cst_16 = arith.constant 0.000000e+00 : f32
    %63 = vector.broadcast %cst_16 : f32 to vector<2x256xf32>
    %64 = arith.maximumf %62, %63 : vector<2x256xf32>
    %c1_17 = arith.constant 1 : index
    %65 = memref.load %arg0[%c1_17] : memref<91xf32, #tpu.memory_space<smem>>
    %66 = vector.broadcast %65 : f32 to vector<2x256xf32>
    %67 = arith.mulf %66, %19 : vector<2x256xf32>
    %c4 = arith.constant 4 : index
    %68 = memref.load %arg0[%c4] : memref<91xf32, #tpu.memory_space<smem>>
    %69 = vector.broadcast %68 : f32 to vector<2x256xf32>
    %70 = arith.mulf %69, %21 : vector<2x256xf32>
    %71 = arith.addf %67, %70 : vector<2x256xf32>
    %c7 = arith.constant 7 : index
    %72 = memref.load %arg0[%c7] : memref<91xf32, #tpu.memory_space<smem>>
    %73 = vector.broadcast %72 : f32 to vector<2x256xf32>
    %74 = arith.mulf %73, %23 : vector<2x256xf32>
    %75 = arith.addf %71, %74 : vector<2x256xf32>
    %cst_18 = arith.constant dense<0.000000e+00> : vector<2xf32>
    %76 = vector.multi_reduction <add>, %75, %cst_18 [1] : vector<2x256xf32> to vector<2xf32>
    %77 = vector.shape_cast %76 : vector<2xf32> to vector<2x1xf32>
    %cst_19 = arith.constant dense<0.000000e+00> : vector<1xf32>
    %78 = vector.multi_reduction <add>, %77, %cst_19 [0] : vector<2x1xf32> to vector<1xf32>
    %79 = vector.shape_cast %78 : vector<1xf32> to vector<1x1xf32>
    %80 = arith.mulf %75, %75 : vector<2x256xf32>
    %cst_20 = arith.constant dense<0.000000e+00> : vector<2xf32>
    %81 = vector.multi_reduction <add>, %80, %cst_20 [1] : vector<2x256xf32> to vector<2xf32>
    %82 = vector.shape_cast %81 : vector<2xf32> to vector<2x1xf32>
    %cst_21 = arith.constant dense<0.000000e+00> : vector<1xf32>
    %83 = vector.multi_reduction <add>, %82, %cst_21 [0] : vector<2x1xf32> to vector<1xf32>
    %84 = vector.shape_cast %83 : vector<1xf32> to vector<1x1xf32>
    %cst_22 = arith.constant 0.001953125 : f32
    %85 = vector.broadcast %cst_22 : f32 to vector<1x1xf32>
    %86 = arith.mulf %79, %85 : vector<1x1xf32>
    %cst_23 = arith.constant 0.001953125 : f32
    %87 = vector.broadcast %cst_23 : f32 to vector<1x1xf32>
    %88 = arith.mulf %84, %87 : vector<1x1xf32>
    %89 = arith.mulf %86, %86 : vector<1x1xf32>
    %90 = arith.subf %88, %89 : vector<1x1xf32>
    %c46 = arith.constant 46 : index
    %91 = memref.load %arg0[%c46] : memref<91xf32, #tpu.memory_space<smem>>
    %cst_24 = arith.constant 9.99999974E-6 : f32
    %92 = vector.broadcast %cst_24 : f32 to vector<1x1xf32>
    %93 = arith.addf %90, %92 : vector<1x1xf32>
    %94 = math.rsqrt %93 : vector<1x1xf32>
    %95 = vector.broadcast %91 : f32 to vector<1x1xf32>
    %96 = arith.mulf %95, %94 : vector<1x1xf32>
    %97 = vector.broadcast %86 : vector<1x1xf32> to vector<2x256xf32>
    %98 = arith.subf %75, %97 : vector<2x256xf32>
    %99 = vector.broadcast %96 : vector<1x1xf32> to vector<2x256xf32>
    %100 = arith.mulf %98, %99 : vector<2x256xf32>
    %c61 = arith.constant 61 : index
    %101 = memref.load %arg0[%c61] : memref<91xf32, #tpu.memory_space<smem>>
    %102 = vector.broadcast %101 : f32 to vector<2x256xf32>
    %103 = arith.addf %100, %102 : vector<2x256xf32>
    %cst_25 = arith.constant 0.000000e+00 : f32
    %104 = vector.broadcast %cst_25 : f32 to vector<2x256xf32>
    %105 = arith.maximumf %103, %104 : vector<2x256xf32>
    %c2_26 = arith.constant 2 : index
    %106 = memref.load %arg0[%c2_26] : memref<91xf32, #tpu.memory_space<smem>>
    %107 = vector.broadcast %106 : f32 to vector<2x256xf32>
    %108 = arith.mulf %107, %19 : vector<2x256xf32>
    %c5 = arith.constant 5 : index
    %109 = memref.load %arg0[%c5] : memref<91xf32, #tpu.memory_space<smem>>
    %110 = vector.broadcast %109 : f32 to vector<2x256xf32>
    %111 = arith.mulf %110, %21 : vector<2x256xf32>
    %112 = arith.addf %108, %111 : vector<2x256xf32>
    %c8 = arith.constant 8 : index
    %113 = memref.load %arg0[%c8] : memref<91xf32, #tpu.memory_space<smem>>
    %114 = vector.broadcast %113 : f32 to vector<2x256xf32>
    %115 = arith.mulf %114, %23 : vector<2x256xf32>
    %116 = arith.addf %112, %115 : vector<2x256xf32>
    %cst_27 = arith.constant dense<0.000000e+00> : vector<2xf32>
    %117 = vector.multi_reduction <add>, %116, %cst_27 [1] : vector<2x256xf32> to vector<2xf32>
    %118 = vector.shape_cast %117 : vector<2xf32> to vector<2x1xf32>
    %cst_28 = arith.constant dense<0.000000e+00> : vector<1xf32>
    %119 = vector.multi_reduction <add>, %118, %cst_28 [0] : vector<2x1xf32> to vector<1xf32>
    %120 = vector.shape_cast %119 : vector<1xf32> to vector<1x1xf32>
    %121 = arith.mulf %116, %116 : vector<2x256xf32>
    %cst_29 = arith.constant dense<0.000000e+00> : vector<2xf32>
    %122 = vector.multi_reduction <add>, %121, %cst_29 [1] : vector<2x256xf32> to vector<2xf32>
    %123 = vector.shape_cast %122 : vector<2xf32> to vector<2x1xf32>
    %cst_30 = arith.constant dense<0.000000e+00> : vector<1xf32>
    %124 = vector.multi_reduction <add>, %123, %cst_30 [0] : vector<2x1xf32> to vector<1xf32>
    %125 = vector.shape_cast %124 : vector<1xf32> to vector<1x1xf32>
    %cst_31 = arith.constant 0.001953125 : f32
    %126 = vector.broadcast %cst_31 : f32 to vector<1x1xf32>
    %127 = arith.mulf %120, %126 : vector<1x1xf32>
    %cst_32 = arith.constant 0.001953125 : f32
    %128 = vector.broadcast %cst_32 : f32 to vector<1x1xf32>
    %129 = arith.mulf %125, %128 : vector<1x1xf32>
    %130 = arith.mulf %127, %127 : vector<1x1xf32>
    %131 = arith.subf %129, %130 : vector<1x1xf32>
    %c47 = arith.constant 47 : index
    %132 = memref.load %arg0[%c47] : memref<91xf32, #tpu.memory_space<smem>>
    %cst_33 = arith.constant 9.99999974E-6 : f32
    %133 = vector.broadcast %cst_33 : f32 to vector<1x1xf32>
    %134 = arith.addf %131, %133 : vector<1x1xf32>
    %135 = math.rsqrt %134 : vector<1x1xf32>
    %136 = vector.broadcast %132 : f32 to vector<1x1xf32>
    %137 = arith.mulf %136, %135 : vector<1x1xf32>
    %138 = vector.broadcast %127 : vector<1x1xf32> to vector<2x256xf32>
    %139 = arith.subf %116, %138 : vector<2x256xf32>
    %140 = vector.broadcast %137 : vector<1x1xf32> to vector<2x256xf32>
    %141 = arith.mulf %139, %140 : vector<2x256xf32>
    %c62 = arith.constant 62 : index
    %142 = memref.load %arg0[%c62] : memref<91xf32, #tpu.memory_space<smem>>
    %143 = vector.broadcast %142 : f32 to vector<2x256xf32>
    %144 = arith.addf %141, %143 : vector<2x256xf32>
    %cst_34 = arith.constant 0.000000e+00 : f32
    %145 = vector.broadcast %cst_34 : f32 to vector<2x256xf32>
    %146 = arith.maximumf %144, %145 : vector<2x256xf32>
    %147 = vector.extract_strided_slice %64 {offsets = [0, 0], sizes = [2, 16], strides = [1, 1]} : vector<2x256xf32> to vector<2x16xf32>
    %148 = vector.extract_strided_slice %64 {offsets = [0, 0], sizes = [2, 240], strides = [1, 1]} : vector<2x256xf32> to vector<2x240xf32>
    %149 = tpu.concatenate %147, %148 in 1 : vector<2x16xf32>, vector<2x240xf32> -> vector<2x256xf32>
    %150 = vector.extract_strided_slice %64 {offsets = [0, 16], sizes = [2, 240], strides = [1, 1]} : vector<2x256xf32> to vector<2x240xf32>
    %151 = vector.extract_strided_slice %64 {offsets = [0, 240], sizes = [2, 16], strides = [1, 1]} : vector<2x256xf32> to vector<2x16xf32>
    %152 = tpu.concatenate %150, %151 in 1 : vector<2x240xf32>, vector<2x16xf32> -> vector<2x256xf32>
    %153 = arith.maximumf %64, %149 : vector<2x256xf32>
    %154 = arith.maximumf %153, %152 : vector<2x256xf32>
    %155 = vector.extract_strided_slice %154 {offsets = [0, 0], sizes = [2, 1], strides = [1, 1]} : vector<2x256xf32> to vector<2x1xf32>
    %156 = vector.extract_strided_slice %154 {offsets = [0, 0], sizes = [2, 255], strides = [1, 1]} : vector<2x256xf32> to vector<2x255xf32>
    %157 = tpu.concatenate %155, %156 in 1 : vector<2x1xf32>, vector<2x255xf32> -> vector<2x256xf32>
    %158 = arith.select %6, %154, %157 : vector<2x256xi1>, vector<2x256xf32>
    %159 = vector.extract_strided_slice %154 {offsets = [0, 1], sizes = [2, 255], strides = [1, 1]} : vector<2x256xf32> to vector<2x255xf32>
    %160 = vector.extract_strided_slice %154 {offsets = [0, 255], sizes = [2, 1], strides = [1, 1]} : vector<2x256xf32> to vector<2x1xf32>
    %161 = tpu.concatenate %159, %160 in 1 : vector<2x255xf32>, vector<2x1xf32> -> vector<2x256xf32>
    %162 = arith.maximumf %154, %158 : vector<2x256xf32>
    %163 = arith.maximumf %162, %161 : vector<2x256xf32>
    %164 = vector.extract_strided_slice %105 {offsets = [0, 0], sizes = [2, 16], strides = [1, 1]} : vector<2x256xf32> to vector<2x16xf32>
    %165 = vector.extract_strided_slice %105 {offsets = [0, 0], sizes = [2, 240], strides = [1, 1]} : vector<2x256xf32> to vector<2x240xf32>
    %166 = tpu.concatenate %164, %165 in 1 : vector<2x16xf32>, vector<2x240xf32> -> vector<2x256xf32>
    %167 = vector.extract_strided_slice %105 {offsets = [0, 16], sizes = [2, 240], strides = [1, 1]} : vector<2x256xf32> to vector<2x240xf32>
    %168 = vector.extract_strided_slice %105 {offsets = [0, 240], sizes = [2, 16], strides = [1, 1]} : vector<2x256xf32> to vector<2x16xf32>
    %169 = tpu.concatenate %167, %168 in 1 : vector<2x240xf32>, vector<2x16xf32> -> vector<2x256xf32>
    %170 = arith.maximumf %105, %166 : vector<2x256xf32>
    %171 = arith.maximumf %170, %169 : vector<2x256xf32>
    %172 = vector.extract_strided_slice %171 {offsets = [0, 0], sizes = [2, 1], strides = [1, 1]} : vector<2x256xf32> to vector<2x1xf32>
    %173 = vector.extract_strided_slice %171 {offsets = [0, 0], sizes = [2, 255], strides = [1, 1]} : vector<2x256xf32> to vector<2x255xf32>
    %174 = tpu.concatenate %172, %173 in 1 : vector<2x1xf32>, vector<2x255xf32> -> vector<2x256xf32>
    %175 = arith.select %6, %171, %174 : vector<2x256xi1>, vector<2x256xf32>
    %176 = vector.extract_strided_slice %171 {offsets = [0, 1], sizes = [2, 255], strides = [1, 1]} : vector<2x256xf32> to vector<2x255xf32>
    %177 = vector.extract_strided_slice %171 {offsets = [0, 255], sizes = [2, 1], strides = [1, 1]} : vector<2x256xf32> to vector<2x1xf32>
    %178 = tpu.concatenate %176, %177 in 1 : vector<2x255xf32>, vector<2x1xf32> -> vector<2x256xf32>
    %179 = arith.maximumf %171, %175 : vector<2x256xf32>
    %180 = arith.maximumf %179, %178 : vector<2x256xf32>
    %181 = vector.extract_strided_slice %146 {offsets = [0, 0], sizes = [2, 16], strides = [1, 1]} : vector<2x256xf32> to vector<2x16xf32>
    %182 = vector.extract_strided_slice %146 {offsets = [0, 0], sizes = [2, 240], strides = [1, 1]} : vector<2x256xf32> to vector<2x240xf32>
    %183 = tpu.concatenate %181, %182 in 1 : vector<2x16xf32>, vector<2x240xf32> -> vector<2x256xf32>
    %184 = vector.extract_strided_slice %146 {offsets = [0, 16], sizes = [2, 240], strides = [1, 1]} : vector<2x256xf32> to vector<2x240xf32>
    %185 = vector.extract_strided_slice %146 {offsets = [0, 240], sizes = [2, 16], strides = [1, 1]} : vector<2x256xf32> to vector<2x16xf32>
    %186 = tpu.concatenate %184, %185 in 1 : vector<2x240xf32>, vector<2x16xf32> -> vector<2x256xf32>
    %187 = arith.maximumf %146, %183 : vector<2x256xf32>
    %188 = arith.maximumf %187, %186 : vector<2x256xf32>
    %189 = vector.extract_strided_slice %188 {offsets = [0, 0], sizes = [2, 1], strides = [1, 1]} : vector<2x256xf32> to vector<2x1xf32>
    %190 = vector.extract_strided_slice %188 {offsets = [0, 0], sizes = [2, 255], strides = [1, 1]} : vector<2x256xf32> to vector<2x255xf32>
    %191 = tpu.concatenate %189, %190 in 1 : vector<2x1xf32>, vector<2x255xf32> -> vector<2x256xf32>
    %192 = arith.select %6, %188, %191 : vector<2x256xi1>, vector<2x256xf32>
    %193 = vector.extract_strided_slice %188 {offsets = [0, 1], sizes = [2, 255], strides = [1, 1]} : vector<2x256xf32> to vector<2x255xf32>
    %194 = vector.extract_strided_slice %188 {offsets = [0, 255], sizes = [2, 1], strides = [1, 1]} : vector<2x256xf32> to vector<2x1xf32>
    %195 = tpu.concatenate %193, %194 in 1 : vector<2x255xf32>, vector<2x1xf32> -> vector<2x256xf32>
    %196 = arith.maximumf %188, %192 : vector<2x256xf32>
    %197 = arith.maximumf %196, %195 : vector<2x256xf32>
    %c9 = arith.constant 9 : index
    %198 = memref.load %arg0[%c9] : memref<91xf32, #tpu.memory_space<smem>>
    %199 = vector.broadcast %198 : f32 to vector<2x256xf32>
    %200 = arith.mulf %199, %163 : vector<2x256xf32>
    %c12 = arith.constant 12 : index
    %201 = memref.load %arg0[%c12] : memref<91xf32, #tpu.memory_space<smem>>
    %202 = vector.broadcast %201 : f32 to vector<2x256xf32>
    %203 = arith.mulf %202, %180 : vector<2x256xf32>
    %204 = arith.addf %200, %203 : vector<2x256xf32>
    %c15 = arith.constant 15 : index
    %205 = memref.load %arg0[%c15] : memref<91xf32, #tpu.memory_space<smem>>
    %206 = vector.broadcast %205 : f32 to vector<2x256xf32>
    %207 = arith.mulf %206, %197 : vector<2x256xf32>
    %208 = arith.addf %204, %207 : vector<2x256xf32>
    %209 = arith.mulf %208, %17 : vector<2x256xf32>
    %cst_35 = arith.constant dense<0.000000e+00> : vector<2xf32>
    %210 = vector.multi_reduction <add>, %209, %cst_35 [1] : vector<2x256xf32> to vector<2xf32>
    %211 = vector.shape_cast %210 : vector<2xf32> to vector<2x1xf32>
    %cst_36 = arith.constant dense<0.000000e+00> : vector<1xf32>
    %212 = vector.multi_reduction <add>, %211, %cst_36 [0] : vector<2x1xf32> to vector<1xf32>
    %213 = vector.shape_cast %212 : vector<1xf32> to vector<1x1xf32>
    %214 = arith.mulf %209, %209 : vector<2x256xf32>
    %cst_37 = arith.constant dense<0.000000e+00> : vector<2xf32>
    %215 = vector.multi_reduction <add>, %214, %cst_37 [1] : vector<2x256xf32> to vector<2xf32>
    %216 = vector.shape_cast %215 : vector<2xf32> to vector<2x1xf32>
    %cst_38 = arith.constant dense<0.000000e+00> : vector<1xf32>
    %217 = vector.multi_reduction <add>, %216, %cst_38 [0] : vector<2x1xf32> to vector<1xf32>
    %218 = vector.shape_cast %217 : vector<1xf32> to vector<1x1xf32>
    %cst_39 = arith.constant 7.812500e-03 : f32
    %219 = vector.broadcast %cst_39 : f32 to vector<1x1xf32>
    %220 = arith.mulf %213, %219 : vector<1x1xf32>
    %cst_40 = arith.constant 7.812500e-03 : f32
    %221 = vector.broadcast %cst_40 : f32 to vector<1x1xf32>
    %222 = arith.mulf %218, %221 : vector<1x1xf32>
    %223 = arith.mulf %220, %220 : vector<1x1xf32>
    %224 = arith.subf %222, %223 : vector<1x1xf32>
    %c48 = arith.constant 48 : index
    %225 = memref.load %arg0[%c48] : memref<91xf32, #tpu.memory_space<smem>>
    %cst_41 = arith.constant 9.99999974E-6 : f32
    %226 = vector.broadcast %cst_41 : f32 to vector<1x1xf32>
    %227 = arith.addf %224, %226 : vector<1x1xf32>
    %228 = math.rsqrt %227 : vector<1x1xf32>
    %229 = vector.broadcast %225 : f32 to vector<1x1xf32>
    %230 = arith.mulf %229, %228 : vector<1x1xf32>
    %231 = vector.broadcast %220 : vector<1x1xf32> to vector<2x256xf32>
    %232 = arith.subf %208, %231 : vector<2x256xf32>
    %233 = vector.broadcast %230 : vector<1x1xf32> to vector<2x256xf32>
    %234 = arith.mulf %232, %233 : vector<2x256xf32>
    %c63 = arith.constant 63 : index
    %235 = memref.load %arg0[%c63] : memref<91xf32, #tpu.memory_space<smem>>
    %236 = vector.broadcast %235 : f32 to vector<2x256xf32>
    %237 = arith.addf %234, %236 : vector<2x256xf32>
    %cst_42 = arith.constant 0.000000e+00 : f32
    %cst_43 = arith.constant 6.000000e+00 : f32
    %238 = vector.broadcast %cst_42 : f32 to vector<2x256xf32>
    %239 = arith.maximumf %238, %237 : vector<2x256xf32>
    %240 = vector.broadcast %cst_43 : f32 to vector<2x256xf32>
    %241 = arith.minimumf %240, %239 : vector<2x256xf32>
    %c10 = arith.constant 10 : index
    %242 = memref.load %arg0[%c10] : memref<91xf32, #tpu.memory_space<smem>>
    %243 = vector.broadcast %242 : f32 to vector<2x256xf32>
    %244 = arith.mulf %243, %163 : vector<2x256xf32>
    %c13 = arith.constant 13 : index
    %245 = memref.load %arg0[%c13] : memref<91xf32, #tpu.memory_space<smem>>
    %246 = vector.broadcast %245 : f32 to vector<2x256xf32>
    %247 = arith.mulf %246, %180 : vector<2x256xf32>
    %248 = arith.addf %244, %247 : vector<2x256xf32>
    %c16 = arith.constant 16 : index
    %249 = memref.load %arg0[%c16] : memref<91xf32, #tpu.memory_space<smem>>
    %250 = vector.broadcast %249 : f32 to vector<2x256xf32>
    %251 = arith.mulf %250, %197 : vector<2x256xf32>
    %252 = arith.addf %248, %251 : vector<2x256xf32>
    %253 = arith.mulf %252, %17 : vector<2x256xf32>
    %cst_44 = arith.constant dense<0.000000e+00> : vector<2xf32>
    %254 = vector.multi_reduction <add>, %253, %cst_44 [1] : vector<2x256xf32> to vector<2xf32>
    %255 = vector.shape_cast %254 : vector<2xf32> to vector<2x1xf32>
    %cst_45 = arith.constant dense<0.000000e+00> : vector<1xf32>
    %256 = vector.multi_reduction <add>, %255, %cst_45 [0] : vector<2x1xf32> to vector<1xf32>
    %257 = vector.shape_cast %256 : vector<1xf32> to vector<1x1xf32>
    %258 = arith.mulf %253, %253 : vector<2x256xf32>
    %cst_46 = arith.constant dense<0.000000e+00> : vector<2xf32>
    %259 = vector.multi_reduction <add>, %258, %cst_46 [1] : vector<2x256xf32> to vector<2xf32>
    %260 = vector.shape_cast %259 : vector<2xf32> to vector<2x1xf32>
    %cst_47 = arith.constant dense<0.000000e+00> : vector<1xf32>
    %261 = vector.multi_reduction <add>, %260, %cst_47 [0] : vector<2x1xf32> to vector<1xf32>
    %262 = vector.shape_cast %261 : vector<1xf32> to vector<1x1xf32>
    %cst_48 = arith.constant 7.812500e-03 : f32
    %263 = vector.broadcast %cst_48 : f32 to vector<1x1xf32>
    %264 = arith.mulf %257, %263 : vector<1x1xf32>
    %cst_49 = arith.constant 7.812500e-03 : f32
    %265 = vector.broadcast %cst_49 : f32 to vector<1x1xf32>
    %266 = arith.mulf %262, %265 : vector<1x1xf32>
    %267 = arith.mulf %264, %264 : vector<1x1xf32>
    %268 = arith.subf %266, %267 : vector<1x1xf32>
    %c49 = arith.constant 49 : index
    %269 = memref.load %arg0[%c49] : memref<91xf32, #tpu.memory_space<smem>>
    %cst_50 = arith.constant 9.99999974E-6 : f32
    %270 = vector.broadcast %cst_50 : f32 to vector<1x1xf32>
    %271 = arith.addf %268, %270 : vector<1x1xf32>
    %272 = math.rsqrt %271 : vector<1x1xf32>
    %273 = vector.broadcast %269 : f32 to vector<1x1xf32>
    %274 = arith.mulf %273, %272 : vector<1x1xf32>
    %275 = vector.broadcast %264 : vector<1x1xf32> to vector<2x256xf32>
    %276 = arith.subf %252, %275 : vector<2x256xf32>
    %277 = vector.broadcast %274 : vector<1x1xf32> to vector<2x256xf32>
    %278 = arith.mulf %276, %277 : vector<2x256xf32>
    %c64 = arith.constant 64 : index
    %279 = memref.load %arg0[%c64] : memref<91xf32, #tpu.memory_space<smem>>
    %280 = vector.broadcast %279 : f32 to vector<2x256xf32>
    %281 = arith.addf %278, %280 : vector<2x256xf32>
    %cst_51 = arith.constant 0.000000e+00 : f32
    %cst_52 = arith.constant 6.000000e+00 : f32
    %282 = vector.broadcast %cst_51 : f32 to vector<2x256xf32>
    %283 = arith.maximumf %282, %281 : vector<2x256xf32>
    %284 = vector.broadcast %cst_52 : f32 to vector<2x256xf32>
    %285 = arith.minimumf %284, %283 : vector<2x256xf32>
    %c11 = arith.constant 11 : index
    %286 = memref.load %arg0[%c11] : memref<91xf32, #tpu.memory_space<smem>>
    %287 = vector.broadcast %286 : f32 to vector<2x256xf32>
    %288 = arith.mulf %287, %163 : vector<2x256xf32>
    %c14 = arith.constant 14 : index
    %289 = memref.load %arg0[%c14] : memref<91xf32, #tpu.memory_space<smem>>
    %290 = vector.broadcast %289 : f32 to vector<2x256xf32>
    %291 = arith.mulf %290, %180 : vector<2x256xf32>
    %292 = arith.addf %288, %291 : vector<2x256xf32>
    %c17 = arith.constant 17 : index
    %293 = memref.load %arg0[%c17] : memref<91xf32, #tpu.memory_space<smem>>
    %294 = vector.broadcast %293 : f32 to vector<2x256xf32>
    %295 = arith.mulf %294, %197 : vector<2x256xf32>
    %296 = arith.addf %292, %295 : vector<2x256xf32>
    %297 = arith.mulf %296, %17 : vector<2x256xf32>
    %cst_53 = arith.constant dense<0.000000e+00> : vector<2xf32>
    %298 = vector.multi_reduction <add>, %297, %cst_53 [1] : vector<2x256xf32> to vector<2xf32>
    %299 = vector.shape_cast %298 : vector<2xf32> to vector<2x1xf32>
    %cst_54 = arith.constant dense<0.000000e+00> : vector<1xf32>
    %300 = vector.multi_reduction <add>, %299, %cst_54 [0] : vector<2x1xf32> to vector<1xf32>
    %301 = vector.shape_cast %300 : vector<1xf32> to vector<1x1xf32>
    %302 = arith.mulf %297, %297 : vector<2x256xf32>
    %cst_55 = arith.constant dense<0.000000e+00> : vector<2xf32>
    %303 = vector.multi_reduction <add>, %302, %cst_55 [1] : vector<2x256xf32> to vector<2xf32>
    %304 = vector.shape_cast %303 : vector<2xf32> to vector<2x1xf32>
    %cst_56 = arith.constant dense<0.000000e+00> : vector<1xf32>
    %305 = vector.multi_reduction <add>, %304, %cst_56 [0] : vector<2x1xf32> to vector<1xf32>
    %306 = vector.shape_cast %305 : vector<1xf32> to vector<1x1xf32>
    %cst_57 = arith.constant 7.812500e-03 : f32
    %307 = vector.broadcast %cst_57 : f32 to vector<1x1xf32>
    %308 = arith.mulf %301, %307 : vector<1x1xf32>
    %cst_58 = arith.constant 7.812500e-03 : f32
    %309 = vector.broadcast %cst_58 : f32 to vector<1x1xf32>
    %310 = arith.mulf %306, %309 : vector<1x1xf32>
    %311 = arith.mulf %308, %308 : vector<1x1xf32>
    %312 = arith.subf %310, %311 : vector<1x1xf32>
    %c50 = arith.constant 50 : index
    %313 = memref.load %arg0[%c50] : memref<91xf32, #tpu.memory_space<smem>>
    %cst_59 = arith.constant 9.99999974E-6 : f32
    %314 = vector.broadcast %cst_59 : f32 to vector<1x1xf32>
    %315 = arith.addf %312, %314 : vector<1x1xf32>
    %316 = math.rsqrt %315 : vector<1x1xf32>
    %317 = vector.broadcast %313 : f32 to vector<1x1xf32>
    %318 = arith.mulf %317, %316 : vector<1x1xf32>
    %319 = vector.broadcast %308 : vector<1x1xf32> to vector<2x256xf32>
    %320 = arith.subf %296, %319 : vector<2x256xf32>
    %321 = vector.broadcast %318 : vector<1x1xf32> to vector<2x256xf32>
    %322 = arith.mulf %320, %321 : vector<2x256xf32>
    %c65 = arith.constant 65 : index
    %323 = memref.load %arg0[%c65] : memref<91xf32, #tpu.memory_space<smem>>
    %324 = vector.broadcast %323 : f32 to vector<2x256xf32>
    %325 = arith.addf %322, %324 : vector<2x256xf32>
    %cst_60 = arith.constant 0.000000e+00 : f32
    %cst_61 = arith.constant 6.000000e+00 : f32
    %326 = vector.broadcast %cst_60 : f32 to vector<2x256xf32>
    %327 = arith.maximumf %326, %325 : vector<2x256xf32>
    %328 = vector.broadcast %cst_61 : f32 to vector<2x256xf32>
    %329 = arith.minimumf %328, %327 : vector<2x256xf32>
    %c18 = arith.constant 18 : index
    %330 = memref.load %arg0[%c18] : memref<91xf32, #tpu.memory_space<smem>>
    %331 = vector.broadcast %330 : f32 to vector<2x256xf32>
    %332 = arith.mulf %331, %241 : vector<2x256xf32>
    %c21 = arith.constant 21 : index
    %333 = memref.load %arg0[%c21] : memref<91xf32, #tpu.memory_space<smem>>
    %334 = vector.broadcast %333 : f32 to vector<2x256xf32>
    %335 = arith.mulf %334, %285 : vector<2x256xf32>
    %336 = arith.addf %332, %335 : vector<2x256xf32>
    %c24 = arith.constant 24 : index
    %337 = memref.load %arg0[%c24] : memref<91xf32, #tpu.memory_space<smem>>
    %338 = vector.broadcast %337 : f32 to vector<2x256xf32>
    %339 = arith.mulf %338, %329 : vector<2x256xf32>
    %340 = arith.addf %336, %339 : vector<2x256xf32>
    %341 = arith.mulf %340, %17 : vector<2x256xf32>
    %cst_62 = arith.constant dense<0.000000e+00> : vector<2xf32>
    %342 = vector.multi_reduction <add>, %341, %cst_62 [1] : vector<2x256xf32> to vector<2xf32>
    %343 = vector.shape_cast %342 : vector<2xf32> to vector<2x1xf32>
    %cst_63 = arith.constant dense<0.000000e+00> : vector<1xf32>
    %344 = vector.multi_reduction <add>, %343, %cst_63 [0] : vector<2x1xf32> to vector<1xf32>
    %345 = vector.shape_cast %344 : vector<1xf32> to vector<1x1xf32>
    %346 = arith.mulf %341, %341 : vector<2x256xf32>
    %cst_64 = arith.constant dense<0.000000e+00> : vector<2xf32>
    %347 = vector.multi_reduction <add>, %346, %cst_64 [1] : vector<2x256xf32> to vector<2xf32>
    %348 = vector.shape_cast %347 : vector<2xf32> to vector<2x1xf32>
    %cst_65 = arith.constant dense<0.000000e+00> : vector<1xf32>
    %349 = vector.multi_reduction <add>, %348, %cst_65 [0] : vector<2x1xf32> to vector<1xf32>
    %350 = vector.shape_cast %349 : vector<1xf32> to vector<1x1xf32>
    %cst_66 = arith.constant 7.812500e-03 : f32
    %351 = vector.broadcast %cst_66 : f32 to vector<1x1xf32>
    %352 = arith.mulf %345, %351 : vector<1x1xf32>
    %cst_67 = arith.constant 7.812500e-03 : f32
    %353 = vector.broadcast %cst_67 : f32 to vector<1x1xf32>
    %354 = arith.mulf %350, %353 : vector<1x1xf32>
    %355 = arith.mulf %352, %352 : vector<1x1xf32>
    %356 = arith.subf %354, %355 : vector<1x1xf32>
    %c51 = arith.constant 51 : index
    %357 = memref.load %arg0[%c51] : memref<91xf32, #tpu.memory_space<smem>>
    %cst_68 = arith.constant 9.99999974E-6 : f32
    %358 = vector.broadcast %cst_68 : f32 to vector<1x1xf32>
    %359 = arith.addf %356, %358 : vector<1x1xf32>
    %360 = math.rsqrt %359 : vector<1x1xf32>
    %361 = vector.broadcast %357 : f32 to vector<1x1xf32>
    %362 = arith.mulf %361, %360 : vector<1x1xf32>
    %363 = vector.broadcast %352 : vector<1x1xf32> to vector<2x256xf32>
    %364 = arith.subf %340, %363 : vector<2x256xf32>
    %365 = vector.broadcast %362 : vector<1x1xf32> to vector<2x256xf32>
    %366 = arith.mulf %364, %365 : vector<2x256xf32>
    %c66 = arith.constant 66 : index
    %367 = memref.load %arg0[%c66] : memref<91xf32, #tpu.memory_space<smem>>
    %368 = vector.broadcast %367 : f32 to vector<2x256xf32>
    %369 = arith.addf %366, %368 : vector<2x256xf32>
    %c19 = arith.constant 19 : index
    %370 = memref.load %arg0[%c19] : memref<91xf32, #tpu.memory_space<smem>>
    %371 = vector.broadcast %370 : f32 to vector<2x256xf32>
    %372 = arith.mulf %371, %241 : vector<2x256xf32>
    %c22 = arith.constant 22 : index
    %373 = memref.load %arg0[%c22] : memref<91xf32, #tpu.memory_space<smem>>
    %374 = vector.broadcast %373 : f32 to vector<2x256xf32>
    %375 = arith.mulf %374, %285 : vector<2x256xf32>
    %376 = arith.addf %372, %375 : vector<2x256xf32>
    %c25 = arith.constant 25 : index
    %377 = memref.load %arg0[%c25] : memref<91xf32, #tpu.memory_space<smem>>
    %378 = vector.broadcast %377 : f32 to vector<2x256xf32>
    %379 = arith.mulf %378, %329 : vector<2x256xf32>
    %380 = arith.addf %376, %379 : vector<2x256xf32>
    %381 = arith.mulf %380, %17 : vector<2x256xf32>
    %cst_69 = arith.constant dense<0.000000e+00> : vector<2xf32>
    %382 = vector.multi_reduction <add>, %381, %cst_69 [1] : vector<2x256xf32> to vector<2xf32>
    %383 = vector.shape_cast %382 : vector<2xf32> to vector<2x1xf32>
    %cst_70 = arith.constant dense<0.000000e+00> : vector<1xf32>
    %384 = vector.multi_reduction <add>, %383, %cst_70 [0] : vector<2x1xf32> to vector<1xf32>
    %385 = vector.shape_cast %384 : vector<1xf32> to vector<1x1xf32>
    %386 = arith.mulf %381, %381 : vector<2x256xf32>
    %cst_71 = arith.constant dense<0.000000e+00> : vector<2xf32>
    %387 = vector.multi_reduction <add>, %386, %cst_71 [1] : vector<2x256xf32> to vector<2xf32>
    %388 = vector.shape_cast %387 : vector<2xf32> to vector<2x1xf32>
    %cst_72 = arith.constant dense<0.000000e+00> : vector<1xf32>
    %389 = vector.multi_reduction <add>, %388, %cst_72 [0] : vector<2x1xf32> to vector<1xf32>
    %390 = vector.shape_cast %389 : vector<1xf32> to vector<1x1xf32>
    %cst_73 = arith.constant 7.812500e-03 : f32
    %391 = vector.broadcast %cst_73 : f32 to vector<1x1xf32>
    %392 = arith.mulf %385, %391 : vector<1x1xf32>
    %cst_74 = arith.constant 7.812500e-03 : f32
    %393 = vector.broadcast %cst_74 : f32 to vector<1x1xf32>
    %394 = arith.mulf %390, %393 : vector<1x1xf32>
    %395 = arith.mulf %392, %392 : vector<1x1xf32>
    %396 = arith.subf %394, %395 : vector<1x1xf32>
    %c52 = arith.constant 52 : index
    %397 = memref.load %arg0[%c52] : memref<91xf32, #tpu.memory_space<smem>>
    %cst_75 = arith.constant 9.99999974E-6 : f32
    %398 = vector.broadcast %cst_75 : f32 to vector<1x1xf32>
    %399 = arith.addf %396, %398 : vector<1x1xf32>
    %400 = math.rsqrt %399 : vector<1x1xf32>
    %401 = vector.broadcast %397 : f32 to vector<1x1xf32>
    %402 = arith.mulf %401, %400 : vector<1x1xf32>
    %403 = vector.broadcast %392 : vector<1x1xf32> to vector<2x256xf32>
    %404 = arith.subf %380, %403 : vector<2x256xf32>
    %405 = vector.broadcast %402 : vector<1x1xf32> to vector<2x256xf32>
    %406 = arith.mulf %404, %405 : vector<2x256xf32>
    %c67 = arith.constant 67 : index
    %407 = memref.load %arg0[%c67] : memref<91xf32, #tpu.memory_space<smem>>
    %408 = vector.broadcast %407 : f32 to vector<2x256xf32>
    %409 = arith.addf %406, %408 : vector<2x256xf32>
    %c20 = arith.constant 20 : index
    %410 = memref.load %arg0[%c20] : memref<91xf32, #tpu.memory_space<smem>>
    %411 = vector.broadcast %410 : f32 to vector<2x256xf32>
    %412 = arith.mulf %411, %241 : vector<2x256xf32>
    %c23 = arith.constant 23 : index
    %413 = memref.load %arg0[%c23] : memref<91xf32, #tpu.memory_space<smem>>
    %414 = vector.broadcast %413 : f32 to vector<2x256xf32>
    %415 = arith.mulf %414, %285 : vector<2x256xf32>
    %416 = arith.addf %412, %415 : vector<2x256xf32>
    %c26 = arith.constant 26 : index
    %417 = memref.load %arg0[%c26] : memref<91xf32, #tpu.memory_space<smem>>
    %418 = vector.broadcast %417 : f32 to vector<2x256xf32>
    %419 = arith.mulf %418, %329 : vector<2x256xf32>
    %420 = arith.addf %416, %419 : vector<2x256xf32>
    %421 = arith.mulf %420, %17 : vector<2x256xf32>
    %cst_76 = arith.constant dense<0.000000e+00> : vector<2xf32>
    %422 = vector.multi_reduction <add>, %421, %cst_76 [1] : vector<2x256xf32> to vector<2xf32>
    %423 = vector.shape_cast %422 : vector<2xf32> to vector<2x1xf32>
    %cst_77 = arith.constant dense<0.000000e+00> : vector<1xf32>
    %424 = vector.multi_reduction <add>, %423, %cst_77 [0] : vector<2x1xf32> to vector<1xf32>
    %425 = vector.shape_cast %424 : vector<1xf32> to vector<1x1xf32>
    %426 = arith.mulf %421, %421 : vector<2x256xf32>
    %cst_78 = arith.constant dense<0.000000e+00> : vector<2xf32>
    %427 = vector.multi_reduction <add>, %426, %cst_78 [1] : vector<2x256xf32> to vector<2xf32>
    %428 = vector.shape_cast %427 : vector<2xf32> to vector<2x1xf32>
    %cst_79 = arith.constant dense<0.000000e+00> : vector<1xf32>
    %429 = vector.multi_reduction <add>, %428, %cst_79 [0] : vector<2x1xf32> to vector<1xf32>
    %430 = vector.shape_cast %429 : vector<1xf32> to vector<1x1xf32>
    %cst_80 = arith.constant 7.812500e-03 : f32
    %431 = vector.broadcast %cst_80 : f32 to vector<1x1xf32>
    %432 = arith.mulf %425, %431 : vector<1x1xf32>
    %cst_81 = arith.constant 7.812500e-03 : f32
    %433 = vector.broadcast %cst_81 : f32 to vector<1x1xf32>
    %434 = arith.mulf %430, %433 : vector<1x1xf32>
    %435 = arith.mulf %432, %432 : vector<1x1xf32>
    %436 = arith.subf %434, %435 : vector<1x1xf32>
    %c53 = arith.constant 53 : index
    %437 = memref.load %arg0[%c53] : memref<91xf32, #tpu.memory_space<smem>>
    %cst_82 = arith.constant 9.99999974E-6 : f32
    %438 = vector.broadcast %cst_82 : f32 to vector<1x1xf32>
    %439 = arith.addf %436, %438 : vector<1x1xf32>
    %440 = math.rsqrt %439 : vector<1x1xf32>
    %441 = vector.broadcast %437 : f32 to vector<1x1xf32>
    %442 = arith.mulf %441, %440 : vector<1x1xf32>
    %443 = vector.broadcast %432 : vector<1x1xf32> to vector<2x256xf32>
    %444 = arith.subf %420, %443 : vector<2x256xf32>
    %445 = vector.broadcast %442 : vector<1x1xf32> to vector<2x256xf32>
    %446 = arith.mulf %444, %445 : vector<2x256xf32>
    %c68 = arith.constant 68 : index
    %447 = memref.load %arg0[%c68] : memref<91xf32, #tpu.memory_space<smem>>
    %448 = vector.broadcast %447 : f32 to vector<2x256xf32>
    %449 = arith.addf %446, %448 : vector<2x256xf32>
    %450 = arith.addf %369, %163 : vector<2x256xf32>
    %cst_83 = arith.constant 0.000000e+00 : f32
    %cst_84 = arith.constant 6.000000e+00 : f32
    %451 = vector.broadcast %cst_83 : f32 to vector<2x256xf32>
    %452 = arith.maximumf %451, %450 : vector<2x256xf32>
    %453 = vector.broadcast %cst_84 : f32 to vector<2x256xf32>
    %454 = arith.minimumf %453, %452 : vector<2x256xf32>
    %455 = arith.addf %409, %180 : vector<2x256xf32>
    %cst_85 = arith.constant 0.000000e+00 : f32
    %cst_86 = arith.constant 6.000000e+00 : f32
    %456 = vector.broadcast %cst_85 : f32 to vector<2x256xf32>
    %457 = arith.maximumf %456, %455 : vector<2x256xf32>
    %458 = vector.broadcast %cst_86 : f32 to vector<2x256xf32>
    %459 = arith.minimumf %458, %457 : vector<2x256xf32>
    %460 = arith.addf %449, %197 : vector<2x256xf32>
    %cst_87 = arith.constant 0.000000e+00 : f32
    %cst_88 = arith.constant 6.000000e+00 : f32
    %461 = vector.broadcast %cst_87 : f32 to vector<2x256xf32>
    %462 = arith.maximumf %461, %460 : vector<2x256xf32>
    %463 = vector.broadcast %cst_88 : f32 to vector<2x256xf32>
    %464 = arith.minimumf %463, %462 : vector<2x256xf32>
    %c27 = arith.constant 27 : index
    %465 = memref.load %arg0[%c27] : memref<91xf32, #tpu.memory_space<smem>>
    %466 = vector.broadcast %465 : f32 to vector<2x256xf32>
    %467 = arith.mulf %466, %454 : vector<2x256xf32>
    %c30 = arith.constant 30 : index
    %468 = memref.load %arg0[%c30] : memref<91xf32, #tpu.memory_space<smem>>
    %469 = vector.broadcast %468 : f32 to vector<2x256xf32>
    %470 = arith.mulf %469, %459 : vector<2x256xf32>
    %471 = arith.addf %467, %470 : vector<2x256xf32>
    %c33 = arith.constant 33 : index
    %472 = memref.load %arg0[%c33] : memref<91xf32, #tpu.memory_space<smem>>
    %473 = vector.broadcast %472 : f32 to vector<2x256xf32>
    %474 = arith.mulf %473, %464 : vector<2x256xf32>
    %475 = arith.addf %471, %474 : vector<2x256xf32>
    %476 = arith.mulf %475, %17 : vector<2x256xf32>
    %cst_89 = arith.constant dense<0.000000e+00> : vector<2xf32>
    %477 = vector.multi_reduction <add>, %476, %cst_89 [1] : vector<2x256xf32> to vector<2xf32>
    %478 = vector.shape_cast %477 : vector<2xf32> to vector<2x1xf32>
    %cst_90 = arith.constant dense<0.000000e+00> : vector<1xf32>
    %479 = vector.multi_reduction <add>, %478, %cst_90 [0] : vector<2x1xf32> to vector<1xf32>
    %480 = vector.shape_cast %479 : vector<1xf32> to vector<1x1xf32>
    %481 = arith.mulf %476, %476 : vector<2x256xf32>
    %cst_91 = arith.constant dense<0.000000e+00> : vector<2xf32>
    %482 = vector.multi_reduction <add>, %481, %cst_91 [1] : vector<2x256xf32> to vector<2xf32>
    %483 = vector.shape_cast %482 : vector<2xf32> to vector<2x1xf32>
    %cst_92 = arith.constant dense<0.000000e+00> : vector<1xf32>
    %484 = vector.multi_reduction <add>, %483, %cst_92 [0] : vector<2x1xf32> to vector<1xf32>
    %485 = vector.shape_cast %484 : vector<1xf32> to vector<1x1xf32>
    %cst_93 = arith.constant 7.812500e-03 : f32
    %486 = vector.broadcast %cst_93 : f32 to vector<1x1xf32>
    %487 = arith.mulf %480, %486 : vector<1x1xf32>
    %cst_94 = arith.constant 7.812500e-03 : f32
    %488 = vector.broadcast %cst_94 : f32 to vector<1x1xf32>
    %489 = arith.mulf %485, %488 : vector<1x1xf32>
    %490 = arith.mulf %487, %487 : vector<1x1xf32>
    %491 = arith.subf %489, %490 : vector<1x1xf32>
    %c54 = arith.constant 54 : index
    %492 = memref.load %arg0[%c54] : memref<91xf32, #tpu.memory_space<smem>>
    %cst_95 = arith.constant 9.99999974E-6 : f32
    %493 = vector.broadcast %cst_95 : f32 to vector<1x1xf32>
    %494 = arith.addf %491, %493 : vector<1x1xf32>
    %495 = math.rsqrt %494 : vector<1x1xf32>
    %496 = vector.broadcast %492 : f32 to vector<1x1xf32>
    %497 = arith.mulf %496, %495 : vector<1x1xf32>
    %498 = vector.broadcast %487 : vector<1x1xf32> to vector<2x256xf32>
    %499 = arith.subf %475, %498 : vector<2x256xf32>
    %500 = vector.broadcast %497 : vector<1x1xf32> to vector<2x256xf32>
    %501 = arith.mulf %499, %500 : vector<2x256xf32>
    %c69 = arith.constant 69 : index
    %502 = memref.load %arg0[%c69] : memref<91xf32, #tpu.memory_space<smem>>
    %503 = vector.broadcast %502 : f32 to vector<2x256xf32>
    %504 = arith.addf %501, %503 : vector<2x256xf32>
    %cst_96 = arith.constant 0.000000e+00 : f32
    %cst_97 = arith.constant 6.000000e+00 : f32
    %505 = vector.broadcast %cst_96 : f32 to vector<2x256xf32>
    %506 = arith.maximumf %505, %504 : vector<2x256xf32>
    %507 = vector.broadcast %cst_97 : f32 to vector<2x256xf32>
    %508 = arith.minimumf %507, %506 : vector<2x256xf32>
    %c28 = arith.constant 28 : index
    %509 = memref.load %arg0[%c28] : memref<91xf32, #tpu.memory_space<smem>>
    %510 = vector.broadcast %509 : f32 to vector<2x256xf32>
    %511 = arith.mulf %510, %454 : vector<2x256xf32>
    %c31 = arith.constant 31 : index
    %512 = memref.load %arg0[%c31] : memref<91xf32, #tpu.memory_space<smem>>
    %513 = vector.broadcast %512 : f32 to vector<2x256xf32>
    %514 = arith.mulf %513, %459 : vector<2x256xf32>
    %515 = arith.addf %511, %514 : vector<2x256xf32>
    %c34 = arith.constant 34 : index
    %516 = memref.load %arg0[%c34] : memref<91xf32, #tpu.memory_space<smem>>
    %517 = vector.broadcast %516 : f32 to vector<2x256xf32>
    %518 = arith.mulf %517, %464 : vector<2x256xf32>
    %519 = arith.addf %515, %518 : vector<2x256xf32>
    %520 = arith.mulf %519, %17 : vector<2x256xf32>
    %cst_98 = arith.constant dense<0.000000e+00> : vector<2xf32>
    %521 = vector.multi_reduction <add>, %520, %cst_98 [1] : vector<2x256xf32> to vector<2xf32>
    %522 = vector.shape_cast %521 : vector<2xf32> to vector<2x1xf32>
    %cst_99 = arith.constant dense<0.000000e+00> : vector<1xf32>
    %523 = vector.multi_reduction <add>, %522, %cst_99 [0] : vector<2x1xf32> to vector<1xf32>
    %524 = vector.shape_cast %523 : vector<1xf32> to vector<1x1xf32>
    %525 = arith.mulf %520, %520 : vector<2x256xf32>
    %cst_100 = arith.constant dense<0.000000e+00> : vector<2xf32>
    %526 = vector.multi_reduction <add>, %525, %cst_100 [1] : vector<2x256xf32> to vector<2xf32>
    %527 = vector.shape_cast %526 : vector<2xf32> to vector<2x1xf32>
    %cst_101 = arith.constant dense<0.000000e+00> : vector<1xf32>
    %528 = vector.multi_reduction <add>, %527, %cst_101 [0] : vector<2x1xf32> to vector<1xf32>
    %529 = vector.shape_cast %528 : vector<1xf32> to vector<1x1xf32>
    %cst_102 = arith.constant 7.812500e-03 : f32
    %530 = vector.broadcast %cst_102 : f32 to vector<1x1xf32>
    %531 = arith.mulf %524, %530 : vector<1x1xf32>
    %cst_103 = arith.constant 7.812500e-03 : f32
    %532 = vector.broadcast %cst_103 : f32 to vector<1x1xf32>
    %533 = arith.mulf %529, %532 : vector<1x1xf32>
    %534 = arith.mulf %531, %531 : vector<1x1xf32>
    %535 = arith.subf %533, %534 : vector<1x1xf32>
    %c55 = arith.constant 55 : index
    %536 = memref.load %arg0[%c55] : memref<91xf32, #tpu.memory_space<smem>>
    %cst_104 = arith.constant 9.99999974E-6 : f32
    %537 = vector.broadcast %cst_104 : f32 to vector<1x1xf32>
    %538 = arith.addf %535, %537 : vector<1x1xf32>
    %539 = math.rsqrt %538 : vector<1x1xf32>
    %540 = vector.broadcast %536 : f32 to vector<1x1xf32>
    %541 = arith.mulf %540, %539 : vector<1x1xf32>
    %542 = vector.broadcast %531 : vector<1x1xf32> to vector<2x256xf32>
    %543 = arith.subf %519, %542 : vector<2x256xf32>
    %544 = vector.broadcast %541 : vector<1x1xf32> to vector<2x256xf32>
    %545 = arith.mulf %543, %544 : vector<2x256xf32>
    %c70 = arith.constant 70 : index
    %546 = memref.load %arg0[%c70] : memref<91xf32, #tpu.memory_space<smem>>
    %547 = vector.broadcast %546 : f32 to vector<2x256xf32>
    %548 = arith.addf %545, %547 : vector<2x256xf32>
    %cst_105 = arith.constant 0.000000e+00 : f32
    %cst_106 = arith.constant 6.000000e+00 : f32
    %549 = vector.broadcast %cst_105 : f32 to vector<2x256xf32>
    %550 = arith.maximumf %549, %548 : vector<2x256xf32>
    %551 = vector.broadcast %cst_106 : f32 to vector<2x256xf32>
    %552 = arith.minimumf %551, %550 : vector<2x256xf32>
    %c29 = arith.constant 29 : index
    %553 = memref.load %arg0[%c29] : memref<91xf32, #tpu.memory_space<smem>>
    %554 = vector.broadcast %553 : f32 to vector<2x256xf32>
    %555 = arith.mulf %554, %454 : vector<2x256xf32>
    %c32 = arith.constant 32 : index
    %556 = memref.load %arg0[%c32] : memref<91xf32, #tpu.memory_space<smem>>
    %557 = vector.broadcast %556 : f32 to vector<2x256xf32>
    %558 = arith.mulf %557, %459 : vector<2x256xf32>
    %559 = arith.addf %555, %558 : vector<2x256xf32>
    %c35 = arith.constant 35 : index
    %560 = memref.load %arg0[%c35] : memref<91xf32, #tpu.memory_space<smem>>
    %561 = vector.broadcast %560 : f32 to vector<2x256xf32>
    %562 = arith.mulf %561, %464 : vector<2x256xf32>
    %563 = arith.addf %559, %562 : vector<2x256xf32>
    %564 = arith.mulf %563, %17 : vector<2x256xf32>
    %cst_107 = arith.constant dense<0.000000e+00> : vector<2xf32>
    %565 = vector.multi_reduction <add>, %564, %cst_107 [1] : vector<2x256xf32> to vector<2xf32>
    %566 = vector.shape_cast %565 : vector<2xf32> to vector<2x1xf32>
    %cst_108 = arith.constant dense<0.000000e+00> : vector<1xf32>
    %567 = vector.multi_reduction <add>, %566, %cst_108 [0] : vector<2x1xf32> to vector<1xf32>
    %568 = vector.shape_cast %567 : vector<1xf32> to vector<1x1xf32>
    %569 = arith.mulf %564, %564 : vector<2x256xf32>
    %cst_109 = arith.constant dense<0.000000e+00> : vector<2xf32>
    %570 = vector.multi_reduction <add>, %569, %cst_109 [1] : vector<2x256xf32> to vector<2xf32>
    %571 = vector.shape_cast %570 : vector<2xf32> to vector<2x1xf32>
    %cst_110 = arith.constant dense<0.000000e+00> : vector<1xf32>
    %572 = vector.multi_reduction <add>, %571, %cst_110 [0] : vector<2x1xf32> to vector<1xf32>
    %573 = vector.shape_cast %572 : vector<1xf32> to vector<1x1xf32>
    %cst_111 = arith.constant 7.812500e-03 : f32
    %574 = vector.broadcast %cst_111 : f32 to vector<1x1xf32>
    %575 = arith.mulf %568, %574 : vector<1x1xf32>
    %cst_112 = arith.constant 7.812500e-03 : f32
    %576 = vector.broadcast %cst_112 : f32 to vector<1x1xf32>
    %577 = arith.mulf %573, %576 : vector<1x1xf32>
    %578 = arith.mulf %575, %575 : vector<1x1xf32>
    %579 = arith.subf %577, %578 : vector<1x1xf32>
    %c56 = arith.constant 56 : index
    %580 = memref.load %arg0[%c56] : memref<91xf32, #tpu.memory_space<smem>>
    %cst_113 = arith.constant 9.99999974E-6 : f32
    %581 = vector.broadcast %cst_113 : f32 to vector<1x1xf32>
    %582 = arith.addf %579, %581 : vector<1x1xf32>
    %583 = math.rsqrt %582 : vector<1x1xf32>
    %584 = vector.broadcast %580 : f32 to vector<1x1xf32>
    %585 = arith.mulf %584, %583 : vector<1x1xf32>
    %586 = vector.broadcast %575 : vector<1x1xf32> to vector<2x256xf32>
    %587 = arith.subf %563, %586 : vector<2x256xf32>
    %588 = vector.broadcast %585 : vector<1x1xf32> to vector<2x256xf32>
    %589 = arith.mulf %587, %588 : vector<2x256xf32>
    %c71 = arith.constant 71 : index
    %590 = memref.load %arg0[%c71] : memref<91xf32, #tpu.memory_space<smem>>
    %591 = vector.broadcast %590 : f32 to vector<2x256xf32>
    %592 = arith.addf %589, %591 : vector<2x256xf32>
    %cst_114 = arith.constant 0.000000e+00 : f32
    %cst_115 = arith.constant 6.000000e+00 : f32
    %593 = vector.broadcast %cst_114 : f32 to vector<2x256xf32>
    %594 = arith.maximumf %593, %592 : vector<2x256xf32>
    %595 = vector.broadcast %cst_115 : f32 to vector<2x256xf32>
    %596 = arith.minimumf %595, %594 : vector<2x256xf32>
    %c36 = arith.constant 36 : index
    %597 = memref.load %arg0[%c36] : memref<91xf32, #tpu.memory_space<smem>>
    %598 = vector.broadcast %597 : f32 to vector<2x256xf32>
    %599 = arith.mulf %598, %508 : vector<2x256xf32>
    %c39 = arith.constant 39 : index
    %600 = memref.load %arg0[%c39] : memref<91xf32, #tpu.memory_space<smem>>
    %601 = vector.broadcast %600 : f32 to vector<2x256xf32>
    %602 = arith.mulf %601, %552 : vector<2x256xf32>
    %603 = arith.addf %599, %602 : vector<2x256xf32>
    %c42 = arith.constant 42 : index
    %604 = memref.load %arg0[%c42] : memref<91xf32, #tpu.memory_space<smem>>
    %605 = vector.broadcast %604 : f32 to vector<2x256xf32>
    %606 = arith.mulf %605, %596 : vector<2x256xf32>
    %607 = arith.addf %603, %606 : vector<2x256xf32>
    %608 = arith.mulf %607, %17 : vector<2x256xf32>
    %cst_116 = arith.constant dense<0.000000e+00> : vector<2xf32>
    %609 = vector.multi_reduction <add>, %608, %cst_116 [1] : vector<2x256xf32> to vector<2xf32>
    %610 = vector.shape_cast %609 : vector<2xf32> to vector<2x1xf32>
    %cst_117 = arith.constant dense<0.000000e+00> : vector<1xf32>
    %611 = vector.multi_reduction <add>, %610, %cst_117 [0] : vector<2x1xf32> to vector<1xf32>
    %612 = vector.shape_cast %611 : vector<1xf32> to vector<1x1xf32>
    %613 = arith.mulf %608, %608 : vector<2x256xf32>
    %cst_118 = arith.constant dense<0.000000e+00> : vector<2xf32>
    %614 = vector.multi_reduction <add>, %613, %cst_118 [1] : vector<2x256xf32> to vector<2xf32>
    %615 = vector.shape_cast %614 : vector<2xf32> to vector<2x1xf32>
    %cst_119 = arith.constant dense<0.000000e+00> : vector<1xf32>
    %616 = vector.multi_reduction <add>, %615, %cst_119 [0] : vector<2x1xf32> to vector<1xf32>
    %617 = vector.shape_cast %616 : vector<1xf32> to vector<1x1xf32>
    %cst_120 = arith.constant 7.812500e-03 : f32
    %618 = vector.broadcast %cst_120 : f32 to vector<1x1xf32>
    %619 = arith.mulf %612, %618 : vector<1x1xf32>
    %cst_121 = arith.constant 7.812500e-03 : f32
    %620 = vector.broadcast %cst_121 : f32 to vector<1x1xf32>
    %621 = arith.mulf %617, %620 : vector<1x1xf32>
    %622 = arith.mulf %619, %619 : vector<1x1xf32>
    %623 = arith.subf %621, %622 : vector<1x1xf32>
    %c57 = arith.constant 57 : index
    %624 = memref.load %arg0[%c57] : memref<91xf32, #tpu.memory_space<smem>>
    %cst_122 = arith.constant 9.99999974E-6 : f32
    %625 = vector.broadcast %cst_122 : f32 to vector<1x1xf32>
    %626 = arith.addf %623, %625 : vector<1x1xf32>
    %627 = math.rsqrt %626 : vector<1x1xf32>
    %628 = vector.broadcast %624 : f32 to vector<1x1xf32>
    %629 = arith.mulf %628, %627 : vector<1x1xf32>
    %630 = vector.broadcast %619 : vector<1x1xf32> to vector<2x256xf32>
    %631 = arith.subf %607, %630 : vector<2x256xf32>
    %632 = vector.broadcast %629 : vector<1x1xf32> to vector<2x256xf32>
    %633 = arith.mulf %631, %632 : vector<2x256xf32>
    %c72 = arith.constant 72 : index
    %634 = memref.load %arg0[%c72] : memref<91xf32, #tpu.memory_space<smem>>
    %635 = vector.broadcast %634 : f32 to vector<2x256xf32>
    %636 = arith.addf %633, %635 : vector<2x256xf32>
    %c37 = arith.constant 37 : index
    %637 = memref.load %arg0[%c37] : memref<91xf32, #tpu.memory_space<smem>>
    %638 = vector.broadcast %637 : f32 to vector<2x256xf32>
    %639 = arith.mulf %638, %508 : vector<2x256xf32>
    %c40 = arith.constant 40 : index
    %640 = memref.load %arg0[%c40] : memref<91xf32, #tpu.memory_space<smem>>
    %641 = vector.broadcast %640 : f32 to vector<2x256xf32>
    %642 = arith.mulf %641, %552 : vector<2x256xf32>
    %643 = arith.addf %639, %642 : vector<2x256xf32>
    %c43 = arith.constant 43 : index
    %644 = memref.load %arg0[%c43] : memref<91xf32, #tpu.memory_space<smem>>
    %645 = vector.broadcast %644 : f32 to vector<2x256xf32>
    %646 = arith.mulf %645, %596 : vector<2x256xf32>
    %647 = arith.addf %643, %646 : vector<2x256xf32>
    %648 = arith.mulf %647, %17 : vector<2x256xf32>
    %cst_123 = arith.constant dense<0.000000e+00> : vector<2xf32>
    %649 = vector.multi_reduction <add>, %648, %cst_123 [1] : vector<2x256xf32> to vector<2xf32>
    %650 = vector.shape_cast %649 : vector<2xf32> to vector<2x1xf32>
    %cst_124 = arith.constant dense<0.000000e+00> : vector<1xf32>
    %651 = vector.multi_reduction <add>, %650, %cst_124 [0] : vector<2x1xf32> to vector<1xf32>
    %652 = vector.shape_cast %651 : vector<1xf32> to vector<1x1xf32>
    %653 = arith.mulf %648, %648 : vector<2x256xf32>
    %cst_125 = arith.constant dense<0.000000e+00> : vector<2xf32>
    %654 = vector.multi_reduction <add>, %653, %cst_125 [1] : vector<2x256xf32> to vector<2xf32>
    %655 = vector.shape_cast %654 : vector<2xf32> to vector<2x1xf32>
    %cst_126 = arith.constant dense<0.000000e+00> : vector<1xf32>
    %656 = vector.multi_reduction <add>, %655, %cst_126 [0] : vector<2x1xf32> to vector<1xf32>
    %657 = vector.shape_cast %656 : vector<1xf32> to vector<1x1xf32>
    %cst_127 = arith.constant 7.812500e-03 : f32
    %658 = vector.broadcast %cst_127 : f32 to vector<1x1xf32>
    %659 = arith.mulf %652, %658 : vector<1x1xf32>
    %cst_128 = arith.constant 7.812500e-03 : f32
    %660 = vector.broadcast %cst_128 : f32 to vector<1x1xf32>
    %661 = arith.mulf %657, %660 : vector<1x1xf32>
    %662 = arith.mulf %659, %659 : vector<1x1xf32>
    %663 = arith.subf %661, %662 : vector<1x1xf32>
    %c58 = arith.constant 58 : index
    %664 = memref.load %arg0[%c58] : memref<91xf32, #tpu.memory_space<smem>>
    %cst_129 = arith.constant 9.99999974E-6 : f32
    %665 = vector.broadcast %cst_129 : f32 to vector<1x1xf32>
    %666 = arith.addf %663, %665 : vector<1x1xf32>
    %667 = math.rsqrt %666 : vector<1x1xf32>
    %668 = vector.broadcast %664 : f32 to vector<1x1xf32>
    %669 = arith.mulf %668, %667 : vector<1x1xf32>
    %670 = vector.broadcast %659 : vector<1x1xf32> to vector<2x256xf32>
    %671 = arith.subf %647, %670 : vector<2x256xf32>
    %672 = vector.broadcast %669 : vector<1x1xf32> to vector<2x256xf32>
    %673 = arith.mulf %671, %672 : vector<2x256xf32>
    %c73 = arith.constant 73 : index
    %674 = memref.load %arg0[%c73] : memref<91xf32, #tpu.memory_space<smem>>
    %675 = vector.broadcast %674 : f32 to vector<2x256xf32>
    %676 = arith.addf %673, %675 : vector<2x256xf32>
    %c38 = arith.constant 38 : index
    %677 = memref.load %arg0[%c38] : memref<91xf32, #tpu.memory_space<smem>>
    %678 = vector.broadcast %677 : f32 to vector<2x256xf32>
    %679 = arith.mulf %678, %508 : vector<2x256xf32>
    %c41 = arith.constant 41 : index
    %680 = memref.load %arg0[%c41] : memref<91xf32, #tpu.memory_space<smem>>
    %681 = vector.broadcast %680 : f32 to vector<2x256xf32>
    %682 = arith.mulf %681, %552 : vector<2x256xf32>
    %683 = arith.addf %679, %682 : vector<2x256xf32>
    %c44 = arith.constant 44 : index
    %684 = memref.load %arg0[%c44] : memref<91xf32, #tpu.memory_space<smem>>
    %685 = vector.broadcast %684 : f32 to vector<2x256xf32>
    %686 = arith.mulf %685, %596 : vector<2x256xf32>
    %687 = arith.addf %683, %686 : vector<2x256xf32>
    %688 = arith.mulf %687, %17 : vector<2x256xf32>
    %cst_130 = arith.constant dense<0.000000e+00> : vector<2xf32>
    %689 = vector.multi_reduction <add>, %688, %cst_130 [1] : vector<2x256xf32> to vector<2xf32>
    %690 = vector.shape_cast %689 : vector<2xf32> to vector<2x1xf32>
    %cst_131 = arith.constant dense<0.000000e+00> : vector<1xf32>
    %691 = vector.multi_reduction <add>, %690, %cst_131 [0] : vector<2x1xf32> to vector<1xf32>
    %692 = vector.shape_cast %691 : vector<1xf32> to vector<1x1xf32>
    %693 = arith.mulf %688, %688 : vector<2x256xf32>
    %cst_132 = arith.constant dense<0.000000e+00> : vector<2xf32>
    %694 = vector.multi_reduction <add>, %693, %cst_132 [1] : vector<2x256xf32> to vector<2xf32>
    %695 = vector.shape_cast %694 : vector<2xf32> to vector<2x1xf32>
    %cst_133 = arith.constant dense<0.000000e+00> : vector<1xf32>
    %696 = vector.multi_reduction <add>, %695, %cst_133 [0] : vector<2x1xf32> to vector<1xf32>
    %697 = vector.shape_cast %696 : vector<1xf32> to vector<1x1xf32>
    %cst_134 = arith.constant 7.812500e-03 : f32
    %698 = vector.broadcast %cst_134 : f32 to vector<1x1xf32>
    %699 = arith.mulf %692, %698 : vector<1x1xf32>
    %cst_135 = arith.constant 7.812500e-03 : f32
    %700 = vector.broadcast %cst_135 : f32 to vector<1x1xf32>
    %701 = arith.mulf %697, %700 : vector<1x1xf32>
    %702 = arith.mulf %699, %699 : vector<1x1xf32>
    %703 = arith.subf %701, %702 : vector<1x1xf32>
    %c59 = arith.constant 59 : index
    %704 = memref.load %arg0[%c59] : memref<91xf32, #tpu.memory_space<smem>>
    %cst_136 = arith.constant 9.99999974E-6 : f32
    %705 = vector.broadcast %cst_136 : f32 to vector<1x1xf32>
    %706 = arith.addf %703, %705 : vector<1x1xf32>
    %707 = math.rsqrt %706 : vector<1x1xf32>
    %708 = vector.broadcast %704 : f32 to vector<1x1xf32>
    %709 = arith.mulf %708, %707 : vector<1x1xf32>
    %710 = vector.broadcast %699 : vector<1x1xf32> to vector<2x256xf32>
    %711 = arith.subf %687, %710 : vector<2x256xf32>
    %712 = vector.broadcast %709 : vector<1x1xf32> to vector<2x256xf32>
    %713 = arith.mulf %711, %712 : vector<2x256xf32>
    %c74 = arith.constant 74 : index
    %714 = memref.load %arg0[%c74] : memref<91xf32, #tpu.memory_space<smem>>
    %715 = vector.broadcast %714 : f32 to vector<2x256xf32>
    %716 = arith.addf %713, %715 : vector<2x256xf32>
    %717 = arith.addf %636, %454 : vector<2x256xf32>
    %cst_137 = arith.constant 0.000000e+00 : f32
    %cst_138 = arith.constant 6.000000e+00 : f32
    %718 = vector.broadcast %cst_137 : f32 to vector<2x256xf32>
    %719 = arith.maximumf %718, %717 : vector<2x256xf32>
    %720 = vector.broadcast %cst_138 : f32 to vector<2x256xf32>
    %721 = arith.minimumf %720, %719 : vector<2x256xf32>
    %722 = arith.addf %676, %459 : vector<2x256xf32>
    %cst_139 = arith.constant 0.000000e+00 : f32
    %cst_140 = arith.constant 6.000000e+00 : f32
    %723 = vector.broadcast %cst_139 : f32 to vector<2x256xf32>
    %724 = arith.maximumf %723, %722 : vector<2x256xf32>
    %725 = vector.broadcast %cst_140 : f32 to vector<2x256xf32>
    %726 = arith.minimumf %725, %724 : vector<2x256xf32>
    %727 = arith.addf %716, %464 : vector<2x256xf32>
    %cst_141 = arith.constant 0.000000e+00 : f32
    %cst_142 = arith.constant 6.000000e+00 : f32
    %728 = vector.broadcast %cst_141 : f32 to vector<2x256xf32>
    %729 = arith.maximumf %728, %727 : vector<2x256xf32>
    %730 = vector.broadcast %cst_142 : f32 to vector<2x256xf32>
    %731 = arith.minimumf %730, %729 : vector<2x256xf32>
    %732 = arith.mulf %721, %17 : vector<2x256xf32>
    %cst_143 = arith.constant dense<0.000000e+00> : vector<2xf32>
    %733 = vector.multi_reduction <add>, %732, %cst_143 [1] : vector<2x256xf32> to vector<2xf32>
    %734 = vector.shape_cast %733 : vector<2xf32> to vector<2x1xf32>
    %cst_144 = arith.constant 1.562500e-02 : f32
    %735 = vector.broadcast %cst_144 : f32 to vector<2x1xf32>
    %736 = arith.mulf %734, %735 : vector<2x1xf32>
    %737 = arith.mulf %726, %17 : vector<2x256xf32>
    %cst_145 = arith.constant dense<0.000000e+00> : vector<2xf32>
    %738 = vector.multi_reduction <add>, %737, %cst_145 [1] : vector<2x256xf32> to vector<2xf32>
    %739 = vector.shape_cast %738 : vector<2xf32> to vector<2x1xf32>
    %cst_146 = arith.constant 1.562500e-02 : f32
    %740 = vector.broadcast %cst_146 : f32 to vector<2x1xf32>
    %741 = arith.mulf %739, %740 : vector<2x1xf32>
    %742 = arith.mulf %731, %17 : vector<2x256xf32>
    %cst_147 = arith.constant dense<0.000000e+00> : vector<2xf32>
    %743 = vector.multi_reduction <add>, %742, %cst_147 [1] : vector<2x256xf32> to vector<2xf32>
    %744 = vector.shape_cast %743 : vector<2xf32> to vector<2x1xf32>
    %cst_148 = arith.constant 1.562500e-02 : f32
    %745 = vector.broadcast %cst_148 : f32 to vector<2x1xf32>
    %746 = arith.mulf %744, %745 : vector<2x1xf32>
    %c87 = arith.constant 87 : index
    %747 = memref.load %arg0[%c87] : memref<91xf32, #tpu.memory_space<smem>>
    %c75 = arith.constant 75 : index
    %748 = memref.load %arg0[%c75] : memref<91xf32, #tpu.memory_space<smem>>
    %749 = vector.broadcast %748 : f32 to vector<2x1xf32>
    %750 = arith.mulf %749, %736 : vector<2x1xf32>
    %751 = vector.broadcast %747 : f32 to vector<2x1xf32>
    %752 = arith.addf %751, %750 : vector<2x1xf32>
    %c79 = arith.constant 79 : index
    %753 = memref.load %arg0[%c79] : memref<91xf32, #tpu.memory_space<smem>>
    %754 = vector.broadcast %753 : f32 to vector<2x1xf32>
    %755 = arith.mulf %754, %741 : vector<2x1xf32>
    %756 = arith.addf %752, %755 : vector<2x1xf32>
    %c83 = arith.constant 83 : index
    %757 = memref.load %arg0[%c83] : memref<91xf32, #tpu.memory_space<smem>>
    %758 = vector.broadcast %757 : f32 to vector<2x1xf32>
    %759 = arith.mulf %758, %746 : vector<2x1xf32>
    %760 = arith.addf %756, %759 : vector<2x1xf32>
    %c88 = arith.constant 88 : index
    %761 = memref.load %arg0[%c88] : memref<91xf32, #tpu.memory_space<smem>>
    %c76 = arith.constant 76 : index
    %762 = memref.load %arg0[%c76] : memref<91xf32, #tpu.memory_space<smem>>
    %763 = vector.broadcast %762 : f32 to vector<2x1xf32>
    %764 = arith.mulf %763, %736 : vector<2x1xf32>
    %765 = vector.broadcast %761 : f32 to vector<2x1xf32>
    %766 = arith.addf %765, %764 : vector<2x1xf32>
    %c80 = arith.constant 80 : index
    %767 = memref.load %arg0[%c80] : memref<91xf32, #tpu.memory_space<smem>>
    %768 = vector.broadcast %767 : f32 to vector<2x1xf32>
    %769 = arith.mulf %768, %741 : vector<2x1xf32>
    %770 = arith.addf %766, %769 : vector<2x1xf32>
    %c84 = arith.constant 84 : index
    %771 = memref.load %arg0[%c84] : memref<91xf32, #tpu.memory_space<smem>>
    %772 = vector.broadcast %771 : f32 to vector<2x1xf32>
    %773 = arith.mulf %772, %746 : vector<2x1xf32>
    %774 = arith.addf %770, %773 : vector<2x1xf32>
    %c89 = arith.constant 89 : index
    %775 = memref.load %arg0[%c89] : memref<91xf32, #tpu.memory_space<smem>>
    %c77 = arith.constant 77 : index
    %776 = memref.load %arg0[%c77] : memref<91xf32, #tpu.memory_space<smem>>
    %777 = vector.broadcast %776 : f32 to vector<2x1xf32>
    %778 = arith.mulf %777, %736 : vector<2x1xf32>
    %779 = vector.broadcast %775 : f32 to vector<2x1xf32>
    %780 = arith.addf %779, %778 : vector<2x1xf32>
    %c81 = arith.constant 81 : index
    %781 = memref.load %arg0[%c81] : memref<91xf32, #tpu.memory_space<smem>>
    %782 = vector.broadcast %781 : f32 to vector<2x1xf32>
    %783 = arith.mulf %782, %741 : vector<2x1xf32>
    %784 = arith.addf %780, %783 : vector<2x1xf32>
    %c85 = arith.constant 85 : index
    %785 = memref.load %arg0[%c85] : memref<91xf32, #tpu.memory_space<smem>>
    %786 = vector.broadcast %785 : f32 to vector<2x1xf32>
    %787 = arith.mulf %786, %746 : vector<2x1xf32>
    %788 = arith.addf %784, %787 : vector<2x1xf32>
    %c90 = arith.constant 90 : index
    %789 = memref.load %arg0[%c90] : memref<91xf32, #tpu.memory_space<smem>>
    %c78 = arith.constant 78 : index
    %790 = memref.load %arg0[%c78] : memref<91xf32, #tpu.memory_space<smem>>
    %791 = vector.broadcast %790 : f32 to vector<2x1xf32>
    %792 = arith.mulf %791, %736 : vector<2x1xf32>
    %793 = vector.broadcast %789 : f32 to vector<2x1xf32>
    %794 = arith.addf %793, %792 : vector<2x1xf32>
    %c82 = arith.constant 82 : index
    %795 = memref.load %arg0[%c82] : memref<91xf32, #tpu.memory_space<smem>>
    %796 = vector.broadcast %795 : f32 to vector<2x1xf32>
    %797 = arith.mulf %796, %741 : vector<2x1xf32>
    %798 = arith.addf %794, %797 : vector<2x1xf32>
    %c86 = arith.constant 86 : index
    %799 = memref.load %arg0[%c86] : memref<91xf32, #tpu.memory_space<smem>>
    %800 = vector.broadcast %799 : f32 to vector<2x1xf32>
    %801 = arith.mulf %800, %746 : vector<2x1xf32>
    %802 = arith.addf %798, %801 : vector<2x1xf32>
    %803 = tpu.concatenate %760, %774, %788, %802 in 1 : vector<2x1xf32>, vector<2x1xf32>, vector<2x1xf32>, vector<2x1xf32> -> vector<2x4xf32>
    %c0_149 = arith.constant 0 : index
    %c0_150 = arith.constant 0 : index
    %804 = vector.load %arg2[%c0_149, %c0_150] : memref<2x4xf32, #tpu.memory_space<vmem>>, vector<2x4xf32>
    tpu.vector_store %arg2[%c0_149, %c0_150], %803 {strides = array<i32>} : memref<2x4xf32, #tpu.memory_space<vmem>>, vector<2x4xf32>,
    return
  }
}

</mosaic_0001>

<bundles_post_ra>
// kernel: toy_model_forward.1
= control target key start
LH: loop header
LB: loop body
LE: loop exit
PB: predicated region body
PF: predicated region fallthrough
CT: control target
= control target key end

     0   :  { %7 = vsyncpa [#allocation4], 0  ;;  %s2910_s0 = inlined_call_operand.vmem [shape: f32[91], index: 0, kind: input, shape index: {}]   ;;  %s2911_s1 = inlined_call_operand.vmem [shape: f32[2,3,256], index: 1, kind: input, shape index: {}]   ;;  %s2912_s2 = inlined_call_operand.hbm [shape: f32[2,4], index: 2, kind: output, shape index: {}]  }
   0x1   :  { %8 = vsyncpa [#allocation3], 0  ;;  %s14_s11 = sshll.u32 %s2910_s0, 4  ;;  %s2116_s12 = smov [#allocation2]   ;;  %s15_s11 = int_to_ptr.vmem [resolvable:$true] %s14_s11 }
   0x2   :  { %17 = dma.vmem_to_smem %s15_s11, 16, %s2116_s12, [#allocation4]  }
   0x3   :  { %2112 = dma.done.wait [#allocation4], 16  }
   0x4   :  { %2113 = vsyncadd [#allocation4], 4294967280 }
   0x5   :  { %24 = sfence }
   0x6   :  { %s59_s13 = sld [smem:[#allocation2]]  ;;  %v2144_v0 = vld [vmem:[%s2911_s1] ss:$4 sm:$0x3]  ;;  %vm84_vm0 = vcmask 1041408   ;;  %s2117_s6 = smov 16  }
   0x7   :  { %s1949_s14 = sld [smem:[#allocation2 + $0x3]]  ;;  %v2149_v1 = vld [vmem:[%s2911_s1 + $0x8] ss:$4 sm:$0x3]  ;;  %s2118_s7 = smov 112   ;;  %vm340_vm4 = vcmask 130048  }
   0x8   :  { %s1950_s15 = sld [smem:[#allocation2 + $0x6]]  ;;  %v1945_v2 = vld [vmem:[%s2911_s1 + $0x1] ss:$4 sm:$0x3]  ;;  %vm366_vm5 = vcmask 1041409   ;;  %vm353_vm6 = vcmask 916480  }
   0x9   :  { %v2157_v3 = vld [vmem:[%s2911_s1 + $0x9] ss:$4 sm:$0x3]  ;;  %v2162_v4 = vld [vmem:[%s2911_s1 + $0x2] ss:$4 sm:$0x3] }
   0xa   :  { %v2167_v5 = vld [vmem:[%s2911_s1 + $0xa] ss:$4 sm:$0x3]  ;;  %s1953_s1 = sld [smem:[#allocation2 + $0x1]]  ;;  %vm364_vm7 = vcmask 1040384   ;;  %s2119_s10 = smov 1  }
   0xb   :  { %s1954_s27 = sld [smem:[#allocation2 + $0x4]]  ;;  %s2120_s11 = smov 127   ;;  %vm398_vm14 = vcmask 7168  }
   0xc   :  { %v60_v6 = vstv %s59_s13  ;;  %s1955_s28 = sld [smem:[#allocation2 + $0x7]] }
   0xd   :  { %v61_v7 = vmul.f32 %v60_v6, %v2144_v0  ;;  %v62_v8 = vmul.f32 %v2149_v1, %v60_v6  ;;  %v64_v9 = vstv %s1949_s14  ;;  %s1958_s29 = sld [smem:[#allocation2 + $0x2]] }
   0xe   :  { %v65_v10 = vmul.f32 %v1945_v2, %v64_v9  ;;  %v66_v11 = vmul.f32 %v2157_v3, %v64_v9  ;;  %v70_v12 = vstv %s1950_s15  ;;  %s1959_s30 = sld [smem:[#allocation2 + $0x5]] }
   0xf   :  { %v71_v13 = vmul.f32 %v2162_v4, %v70_v12  ;;  %v72_v14 = vmul.f32 %v2167_v5, %v70_v12  ;;  %s1960_s3 = sld [smem:[#allocation2 + $0x8]] }
  0x10   :  { %v67_v15 = vadd.f32 %v65_v10, %v61_v7  ;;  %v68_v16 = vadd.f32 %v66_v11, %v62_v8  ;;  %v149_v31 = vstv %s1953_s1  ;;  %s1951_s4 = sld [smem:[#allocation2 + $0x2d]] }
  0x11   :  { %v153_v32 = vstv %s1954_s27  ;;  %v150_v33 = vmul.f32 %v149_v31, %v2144_v0  ;;  %v151_v34 = vmul.f32 %v2149_v1, %v149_v31  ;;  %s1952_s5 = sld [smem:[#allocation2 + $0x3c]] }
  0x12   :  { %v2174_v17 = vadd.f32 %v71_v13, %v67_v15  ;;  %v2176_v18 = vadd.f32 %v72_v14, %v68_v16  ;;  %v154_v35 = vmul.f32 %v1945_v2, %v153_v32  ;;  %v155_v36 = vmul.f32 %v2157_v3, %v153_v32  ;;  %s1956_s8 = sld [smem:[#allocation2 + $0x2e]] }
  0x13   :  { %v159_v37 = vstv %s1955_s28  ;;  %v237_v44 = vstv %s1958_s29  ;;  %s1957_s9 = sld [smem:[#allocation2 + $0x3d]] }
  0x14   :  { %77 = vst [vmem:[#allocation1] ss:$9 sm:$0xff] %v2174_v17  ;;  %v97_v19 = vmul.f32 %v2174_v17, %v2174_v17  ;;  %v98_v20 = vmul.f32 %v2176_v18, %v2176_v18  ;;  %v156_v38 = vadd.f32 %v154_v35, %v150_v33  ;;  %v157_v39 = vadd.f32 %v155_v36, %v151_v34  ;;  %s1961_s12 = sld [smem:[#allocation2 + $0x2f]] }
  0x15   :  { %79 = vst [vmem:[#allocation1 + $0x1] ss:$9 sm:$0xff] %v2176_v18  ;;  %v160_v40 = vmul.f32 %v2162_v4, %v159_v37  ;;  %v161_v41 = vmul.f32 %v2167_v5, %v159_v37  ;;  %v241_v45 = vstv %s1959_s30  ;;  %v238_v48 = vmul.f32 %v237_v44, %v2144_v0  ;;  %s1962_s13 = sld [smem:[#allocation2 + $0x3e]] }
  0x16   :  { %v242_v49 = vmul.f32 %v1945_v2, %v241_v45  ;;  %v239_v50 = vmul.f32 %v2149_v1, %v237_v44  ;;  %v243_v51 = vmul.f32 %v2157_v3, %v241_v45  ;;  %v247_v52 = vstv %s1960_s3  ;;  %s2423_s14 = sld [smem:[#allocation2 + $0xc]] }
  0x17   :  { %v2193_v42 = vadd.f32 %v160_v40, %v156_v38  ;;  %v2195_v43 = vadd.f32 %v161_v41, %v157_v39  ;;  %v248_v58 = vmul.f32 %v2162_v4, %v247_v52  ;;  %v249_v61 = vmul.f32 %v2167_v5, %v247_v52  ;;  %s2430_s15 = sld [smem:[#allocation2 + $0x9]] }
  0x18   :  { %v244_v57 = vadd.f32 %v242_v49, %v238_v48  ;;  %v245_v60 = vadd.f32 %v243_v51, %v239_v50  ;;  %v136_v37 = vstv %s1951_s4  ;;  %v143_v45 = vstv %s1952_s5  ;;  %s2439_s16 = sld [smem:[#allocation2 + $0xf]] }
  0x19   :  { %v185_v46 = vmul.f32 %v2193_v42, %v2193_v42  ;;  %v186_v47 = vmul.f32 %v2195_v43, %v2195_v43  ;;  %s1968_s17 = sld [smem:[#allocation2 + $0xa]] }
  0x1a   :  { %v2209_v63 = vadd.f32 %v248_v58, %v244_v57  ;;  %v2211_v1 = vadd.f32 %v249_v61, %v245_v60  ;;  %s1969_s18 = sld [smem:[#allocation2 + $0xd]] }
  0x1b   :  { %s1970_s19 = sld [smem:[#allocation2 + $0x10]] }
  0x1c   :  { %v80_v21 = vld [vmem:[#allocation1] sm:$0xff]  ;;  %v81_v22 = vld [vmem:[#allocation1 + $0x9] sm:$0xff]  ;;  %v273_v5 = vmul.f32 %v2209_v63, %v2209_v63  ;;  %v274_v11 = vmul.f32 %v2211_v1, %v2211_v1  ;;  %s1973_s0 = sld [smem:[#allocation2 + $0xb]] }
  0x1d   :  { %v85_v23 = vsel %vm84_vm0, %v80_v21, 0.0  ;;  %v86_v24 = vsel %vm84_vm0, %v81_v22, 0.0  ;;  %101 = vst [vmem:[#allocation1] ss:$9 sm:$0xff] %v97_v19  ;;  %s1974_s20 = sld [smem:[#allocation2 + $0xe]] }
  0x1e   :  { %v87_v25 = vadd.f32 %v86_v24, %v85_v23  ;;  %103 = vst [vmem:[#allocation1 + $0x1] ss:$9 sm:$0xff] %v98_v20  ;;  %s1975_s21 = sld [smem:[#allocation2 + $0x11]] }
  0x1f   :  { %s1971_s22 = sld [smem:[#allocation2 + $0x31]] }
  0x20   :  { %88 = vadd.xlane.f32.xlu0 %v87_v25  ;;  %s1966_s23 = sld [smem:[#allocation2 + $0x30]] }
  0x21   :  { %s1972_s24 = sld [smem:[#allocation2 + $0x40]] }
  0x22   :  { %s1967_s25 = sld [smem:[#allocation2 + $0x3f]] }
  0x23   :  { %s2555_s26 = sld [smem:[#allocation2 + $0x32]] }
  0x24   :  { %s2561_s1 = sld [smem:[#allocation2 + $0x41]] }
  0x25   :  { %v104_v26 = vld [vmem:[#allocation1] sm:$0xff]  ;;  %v105_v27 = vld [vmem:[#allocation1 + $0x9] sm:$0xff]  ;;  %s2563_s27 = sld [smem:[#allocation2 + $0x15]] }
  0x26   :  { %v108_v28 = vsel %vm84_vm0, %v104_v26, 0.0  ;;  %v109_v29 = vsel %vm84_vm0, %v105_v27, 0.0  ;;  %166 = vst [vmem:[#allocation1] ss:$9 sm:$0xff] %v2193_v42  ;;  %s2565_s28 = sld [smem:[#allocation2 + $0x12]] }
  0x27   :  { %v110_v30 = vadd.f32 %v109_v29, %v108_v28  ;;  %168 = vst [vmem:[#allocation1 + $0x1] ss:$9 sm:$0xff] %v2195_v43  ;;  %s1980_s29 = sld [smem:[#allocation2 + $0x18]] }
  0x28   :  { %s1984_s30 = sld [smem:[#allocation2 + $0x16]] }
  0x29   :  { %111 = vadd.xlane.f32.xlu0 %v110_v30  ;;  %s1983_s3 = sld [smem:[#allocation2 + $0x13]] }
  0x2a   :  { %s1985_s4 = sld [smem:[#allocation2 + $0x19]] }
  0x2b   :  { %s1989_s5 = sld [smem:[#allocation2 + $0x17]] }
  0x2e   :  { %v169_v53 = vld [vmem:[#allocation1] sm:$0xff]  ;;  %v170_v54 = vld [vmem:[#allocation1 + $0x9] sm:$0xff] }
  0x2f   :  { %189 = vst [vmem:[#allocation1] ss:$9 sm:$0xff] %v185_v46  ;;  %v173_v14 = vsel %vm84_vm0, %v169_v53, 0.0  ;;  %v174_v15 = vsel %vm84_vm0, %v170_v54, 0.0 }
  0x30   :  { %191 = vst [vmem:[#allocation1 + $0x1] ss:$9 sm:$0xff] %v186_v47  ;;  %v175_v16 = vadd.f32 %v174_v15, %v173_v14 }
  0x32   :  { %176 = vadd.xlane.f32.xlu2 %v175_v16 }
  0x37   :  { %v192_v3 = vld [vmem:[#allocation1] sm:$0xff]  ;;  %v193_v6 = vld [vmem:[#allocation1 + $0x9] sm:$0xff] }
  0x38   :  { %254 = vst [vmem:[#allocation1] ss:$9 sm:$0xff] %v2209_v63  ;;  %v196_v22 = vsel %vm84_vm0, %v192_v3, 0.0  ;;  %v197_v23 = vsel %vm84_vm0, %v193_v6, 0.0 }
  0x39   :  { %256 = vst [vmem:[#allocation1 + $0x1] ss:$9 sm:$0xff] %v2211_v1  ;;  %v198_v24 = vadd.f32 %v197_v23, %v196_v22 }
  0x3b   :  { %199 = vadd.xlane.f32.xlu0 %v198_v24 }
  0x40   :  { %v2222_v19 = vld [vmem:[#allocation1] sm:$0xff]  ;;  %v2224_v20 = vld [vmem:[#allocation1 + $0x9] sm:$0xff] }
  0x41   :  { %277 = vst [vmem:[#allocation1] ss:$9 sm:$0xff] %v273_v5 }
  0x42   :  { %279 = vst [vmem:[#allocation1 + $0x1] ss:$9 sm:$0xff] %v274_v11 }
  0x49   :  { %v2230_v50 = vld [vmem:[#allocation1] sm:$0xff]  ;;  %v2232_v51 = vld [vmem:[#allocation1 + $0x9] sm:$0xff] }
  0x93   :  { %v89_v55 = vpop.xlane.xlu0 %88 }
  0x94   :  { %v90_v56 = vsel %vm84_vm0, %v89_v55, 0.0 }
  0x95   :  { %v91_v59 = vrot.slane %v90_v56, 4 }
  0x97   :  { %v92_v62 = vadd.f32 %v91_v59, %v90_v56 }
  0x99   :  { %v93_v0 = vrot.slane %v92_v62, 2 }
  0x9b   :  { %v94_v2 = vadd.f32 %v93_v0, %v92_v62 }
  0x9c   :  { %v112_v7 = vpop.xlane.xlu0 %111 }
  0x9d   :  { %v113_v4 = vsel %vm84_vm0, %v112_v7, 0.0  ;;  %v95_v8 = vrot.slane %v94_v2, 1 }
  0x9e   :  { %v114_v9 = vrot.slane %v113_v4, 4 }
  0x9f   :  { %v96_v12 = vadd.f32 %v95_v8, %v94_v2 }
  0xa0   :  { %v115_v10 = vadd.f32 %v114_v9, %v113_v4 }
  0xa1   :  { %v120_v25 = vmul.f32 0.001953125, %v96_v12 }
  0xa2   :  { %v116_v13 = vrot.slane %v115_v10, 2 }
  0xa3   :  { %v122_v28 = vmul.f32 %v120_v25, %v120_v25  ;;  %v138_v40 = vsub.f32 %v2174_v17, %v120_v25  ;;  %v139_v41 = vsub.f32 %v2176_v18, %v120_v25 }
  0xa4   :  { %v117_v21 = vadd.f32 %v116_v13, %v115_v10 }
  0xa5   :  { %v177_v57 = vpop.xlane.xlu2 %176 }
  0xa6   :  { %v118_v26 = vrot.slane %v117_v21, 1  ;;  %v178_v58 = vsel %vm84_vm0, %v177_v57, 0.0 }
  0xa7   :  { %v179_v60 = vrot.slane %v178_v58, 4 }
  0xa8   :  { %v119_v27 = vadd.f32 %v118_v26, %v117_v21 }
  0xa9   :  { %v180_v62 = vadd.f32 %v179_v60, %v178_v58 }
  0xaa   :  { %v121_v29 = vmul.f32 0.001953125, %v119_v27 }
  0xab   :  { %v181_v2 = vrot.slane %v180_v62, 2 }
  0xac   :  { %v123_v30 = vsub.f32 %v121_v29, %v122_v28 }
  0xad   :  { %v182_v6 = vadd.f32 %v181_v2, %v180_v62  ;;  %v231_v62 = vstv %s1957_s9  ;;  %s1981_s9 = sld [smem:[#allocation2 + $0x33]] }
  0xae   :  { %v125_v31 = vadd.f32 1e-05, %v123_v30  ;;  %v200_v59 = vpop.xlane.xlu0 %199 }
  0xaf   :  { %v201_v61 = vsel %vm84_vm0, %v200_v59, 0.0  ;;  %v183_v4 = vrot.slane %v182_v6, 1 }
  0xb0   :  { %2046 = vrsqrt.f32 %v125_v31  ;;  %vm132_vm2 = vweird.f32 %v125_v31  ;;  %v202_v0 = vrot.slane %v201_v61, 4 }
  0xb1   :  { %v184_v10 = vadd.f32 %v183_v4, %v182_v6 }
  0xb2   :  { %v203_v3 = vadd.f32 %v202_v0, %v201_v61 }
  0xb3   :  { %v2252_v11 = vmul.f32 0.001953125, %v184_v10 }
  0xb4   :  { %v204_v7 = vrot.slane %v203_v3, 2 }
  0xb5   :  { %v210_v14 = vmul.f32 %v2252_v11, %v2252_v11  ;;  %v227_v58 = vsub.f32 %v2195_v43, %v2252_v11 }
  0xb6   :  { %v2047_v32 = vpop.eup %2046  ;;  %v205_v8 = vadd.f32 %v204_v7, %v203_v3 }
  0xb7   :  { %v127_v33 = vmul.f32 %v2047_v32, %v125_v31  ;;  %vm133_vm1 = vweird.f32 %v2047_v32 }
  0xb8   :  { %vm134_vm3 = vmor %vm132_vm2, %vm133_vm1  ;;  %v206_v5 = vrot.slane %v205_v8, 1  ;;  %vm421_vm1 = vcmask 1039360  }
  0xb9   :  { %v128_v34 = vmul.f32 %v2047_v32, %v127_v33 }
  0xba   :  { %v207_v12 = vadd.f32 %v206_v5, %v205_v8  ;;  %v261_v5 = vsel %vm84_vm0, %v2222_v19, 0.0 }
  0xbb   :  { %v129_v35 = vmul.f32 0.5, %v128_v34 }
  0xbc   :  { %v209_v15 = vmul.f32 0.001953125, %v207_v12 }
  0xbd   :  { %v130_v36 = vsub.f32 1.5, %v129_v35 }
  0xbe   :  { %v211_v26 = vsub.f32 %v209_v15, %v210_v14  ;;  %v285_v14 = vsel %vm84_vm0, %v2232_v51, 0.0 }
  0xbf   :  { %v131_v38 = vmul.f32 %v2047_v32, %v130_v36 }
  0xc1   :  { %v135_v39 = vsel %vm134_vm3, %v2047_v32, %v131_v38  ;;  %v213_v32 = vadd.f32 1e-05, %v211_v26 }
  0xc2   :  { %v137_v44 = vmul.f32 %v136_v37, %v135_v39 }
  0xc3   :  { %2048 = vrsqrt.f32 %v213_v32  ;;  %vm220_vm8 = vweird.f32 %v213_v32 }
  0xc4   :  { %v140_v46 = vmul.f32 %v138_v40, %v137_v44  ;;  %v141_v47 = vmul.f32 %v139_v41, %v137_v44 }
  0xc6   :  { %v144_v48 = vadd.f32 %v143_v45, %v140_v46  ;;  %v145_v49 = vadd.f32 %v143_v45, %v141_v47 }
  0xc8   :  { %v2234_v52 = vmax.f32 %v144_v48, 0.0  ;;  %v2236_v53 = vmax.f32 %v145_v49, 0.0 }
  0xc9   :  { %v2049_v41 = vpop.eup %2048 }
  0xca   :  { %326 = vst [vmem:[#allocation1] ss:$9 sm:$0xff] %v2234_v52  ;;  %v215_v44 = vmul.f32 %v2049_v41, %v213_v32  ;;  %vm221_vm9 = vweird.f32 %v2049_v41 }
  0xcb   :  { %328 = vst [vmem:[#allocation1 + $0x1] ss:$9 sm:$0xff] %v2236_v53  ;;  %vm222_vm10 = vmor %vm220_vm8, %vm221_vm9 }
  0xcc   :  { %v216_v46 = vmul.f32 %v2049_v41, %v215_v44 }
  0xce   :  { %v217_v47 = vmul.f32 0.5, %v216_v46 }
  0xd2   :  { %v329_v17 = vld [vmem:[#allocation1] sm:$0xff] }
  0xd3   :  { %331 = vst [vmem:[#allocation1] ss:$9 sm:$0xff] %v2234_v52 }
  0xd4   :  { %333 = vst [vmem:[#allocation1 + $0x1] ss:$9 sm:$0xff] %v2236_v53 }
  0xdb   :  { %v334_v18 = vld [vmem:[#allocation1] sm:$0xff]  ;;  %v335_v54 = vld [vmem:[#allocation1 + $0x9] sm:$0xff] }
  0xdc   :  { %344 = vst [vmem:[#allocation1] ss:$9 sm:$0xff] %v2234_v52  ;;  %336 = vrot.lane.b32.xlu1 %v334_v18, %s2117_s6 }
  0xdd   :  { %346 = vst [vmem:[#allocation1 + $0x1] ss:$9 sm:$0xff] %v2236_v53 }
  0xe4   :  { %v347_v55 = vld [vmem:[#allocation1] sm:$0xff]  ;;  %v348_v56 = vld [vmem:[#allocation1 + $0x9] sm:$0xff]  ;;  %338 = vrot.lane.b32.xlu1 %v335_v54, %s2117_s6  ;;  %v224_v54 = vstv %s1956_s8  ;;  %s1986_s8 = sld [smem:[#allocation2 + $0x34]] }
  0xe5   :  { %356 = vst [vmem:[#allocation1] ss:$9 sm:$0xff] %v2234_v52  ;;  %351 = vrot.lane.b32.xlu2 %v348_v56, %s2118_s7  ;;  %v226_v56 = vsub.f32 %v2193_v42, %v2252_v11  ;;  %v262_v11 = vsel %vm84_vm0, %v2224_v20, 0.0 }
  0xe6   :  { %358 = vst [vmem:[#allocation1 + $0x1] ss:$9 sm:$0xff] %v2236_v53  ;;  %v263_v12 = vadd.f32 %v262_v11, %v261_v5 }
  0xec   :  { %349 = vrot.lane.b32.xlu1 %v347_v55, %s2118_s7 }
  0xed   :  { %v359_v24 = vld [vmem:[#allocation1 + $0x9] sm:$0xff] }
 0x13f   :  { %v352_v21 = vpop.permute.xlu2 %351 }
 0x140   :  { %v361_v27 = vsel %vm353_vm6, %v352_v21, %v359_v24 }
 0x141   :  { %v374_v30 = vrot.slane %v361_v27, 7 }
 0x14e   :  { %v337_v9 = vpop.permute.xlu1 %336 }
 0x14f   :  { %v343_v23 = vsel %vm340_vm4, %v329_v17, %v337_v9 }
 0x156   :  { %v339_v13 = vpop.permute.xlu1 %338 }
 0x157   :  { %v341_v16 = vsel %vm340_vm4, %v337_v9, %v339_v13  ;;  %v284_v13 = vsel %vm84_vm0, %v2230_v50, 0.0 }
 0x158   :  { %v363_v22 = vrot.slane %v341_v16, 7  ;;  %v286_v15 = vadd.f32 %v285_v14, %v284_v13 }
 0x15a   :  { %v367_v25 = vsel %vm366_vm5, %v343_v23, %v363_v22  ;;  %v365_v28 = vsel %vm364_vm7, %v343_v23, %v363_v22 }
 0x15b   :  { %v368_v29 = vrot.slane %v367_v25, 1  ;;  %v371_v33 = vmax.f32 %v2234_v52, %v365_v28  ;;  %v218_v52 = vsub.f32 1.5, %v217_v47 }
 0x15d   :  { %v372_v37 = vmax.f32 %v2236_v53, %v368_v29  ;;  %v219_v53 = vmul.f32 %v2049_v41, %v218_v52 }
 0x15e   :  { %v350_v31 = vpop.permute.xlu1 %349 }
 0x15f   :  { %v354_v34 = vsel %vm353_vm6, %v350_v31, %v352_v21  ;;  %v223_v55 = vsel %vm222_vm10, %v2049_v41, %v219_v53 }
 0x160   :  { %v375_v35 = vsel %vm364_vm7, %v354_v34, %v374_v30  ;;  %v376_v36 = vsel %vm366_vm5, %v354_v34, %v374_v30  ;;  %v225_v57 = vmul.f32 %v224_v54, %v223_v55 }
 0x161   :  { %v377_v38 = vrot.slane %v376_v36, 1  ;;  %v2266_v39 = vmax.f32 %v371_v33, %v375_v35 }
 0x162   :  { %v228_v59 = vmul.f32 %v226_v56, %v225_v57  ;;  %v229_v0 = vmul.f32 %v227_v58, %v225_v57 }
 0x163   :  { %v2268_v40 = vmax.f32 %v372_v37, %v377_v38  ;;  %384 = vst [vmem:[#allocation1] ss:$9 sm:$0xff] %v2266_v39 }
 0x164   :  { %v232_v2 = vadd.f32 %v231_v62, %v228_v59  ;;  %v233_v3 = vadd.f32 %v231_v62, %v229_v0 }
 0x165   :  { %386 = vst [vmem:[#allocation1 + $0x1] ss:$9 sm:$0xff] %v2268_v40 }
 0x166   :  { %v234_v6 = vmax.f32 %v232_v2, 0.0  ;;  %v235_v7 = vmax.f32 %v233_v3, 0.0 }
 0x16c   :  { %v2272_v45 = vld [vmem:[#allocation1] sm:$0xff] }
 0x16d   :  { %389 = vst [vmem:[#allocation1] ss:$9 sm:$0xff] %v2266_v39 }
 0x16e   :  { %391 = vst [vmem:[#allocation1 + $0x1] ss:$9 sm:$0xff] %v2268_v40 }
 0x175   :  { %v2276_v48 = vld [vmem:[#allocation1] sm:$0xff]  ;;  %v393_v49 = vld [vmem:[#allocation1 + $0x9] sm:$0xff] }
 0x176   :  { %403 = vst [vmem:[#allocation1] ss:$9 sm:$0xff] %v2266_v39 }
 0x177   :  { %405 = vst [vmem:[#allocation1 + $0x1] ss:$9 sm:$0xff] %v2268_v40 }
 0x17e   :  { %v2280_v17 = vld [vmem:[#allocation1] sm:$0xff]  ;;  %v2282_v18 = vld [vmem:[#allocation1 + $0x9] sm:$0xff] }
 0x17f   :  { %412 = vst [vmem:[#allocation1] ss:$9 sm:$0xff] %v2266_v39 }
 0x180   :  { %414 = vst [vmem:[#allocation1 + $0x1] ss:$9 sm:$0xff] %v2268_v40 }
 0x187   :  { %v2290_v60 = vld [vmem:[#allocation1] sm:$0xff]  ;;  %v416_v61 = vld [vmem:[#allocation1 + $0x9] sm:$0xff] }
 0x188   :  { %424 = vst [vmem:[#allocation1] ss:$9 sm:$0xff] %v2266_v39 }
 0x189   :  { %426 = vst [vmem:[#allocation1 + $0x1] ss:$9 sm:$0xff] %v2268_v40 }
 0x190   :  { %v2294_v4 = vld [vmem:[#allocation1 + $0x9] sm:$0xff] }
 0x191   :  { %451 = vst [vmem:[#allocation1] ss:$9 sm:$0xff] %v234_v6 }
 0x192   :  { %453 = vst [vmem:[#allocation1 + $0x1] ss:$9 sm:$0xff] %v235_v7 }
 0x199   :  { %v454_v42 = vld [vmem:[#allocation1] sm:$0xff] }
 0x19a   :  { %456 = vst [vmem:[#allocation1] ss:$9 sm:$0xff] %v234_v6 }
 0x19b   :  { %458 = vst [vmem:[#allocation1 + $0x1] ss:$9 sm:$0xff] %v235_v7 }
 0x1a2   :  { %v459_v43 = vld [vmem:[#allocation1] sm:$0xff]  ;;  %v460_v8 = vld [vmem:[#allocation1 + $0x9] sm:$0xff] }
 0x1a3   :  { %468 = vst [vmem:[#allocation1] ss:$9 sm:$0xff] %v234_v6  ;;  %463 = vrot.lane.b32.xlu1 %v460_v8, %s2117_s6  ;;  %461 = vrot.lane.b32.xlu0 %v459_v43, %s2117_s6 }
 0x1a4   :  { %470 = vst [vmem:[#allocation1 + $0x1] ss:$9 sm:$0xff] %v235_v7 }
 0x1ab   :  { %v471_v9 = vld [vmem:[#allocation1] sm:$0xff]  ;;  %v472_v10 = vld [vmem:[#allocation1 + $0x9] sm:$0xff] }
 0x1ac   :  { %479 = vst [vmem:[#allocation1] ss:$9 sm:$0xff] %v234_v6  ;;  %475 = vrot.lane.b32.xlu2 %v472_v10, %s2118_s7  ;;  %473 = vrot.lane.b32.xlu0 %v471_v9, %s2118_s7 }
 0x1ad   :  { %481 = vst [vmem:[#allocation1 + $0x1] ss:$9 sm:$0xff] %v235_v7 }
 0x1b4   :  { %v482_v50 = vld [vmem:[#allocation1 + $0x9] sm:$0xff] }
 0x1cd   :  { %264 = vadd.xlane.f32.xlu1 %v263_v12 }
 0x1d5   :  { %287 = vadd.xlane.f32.xlu2 %v286_v15 }
 0x1ed   :  { %396 = vrot.lane.b32.xlu2 %v393_v49, %s2119_s10 }
 0x1f5   :  { %419 = vrot.lane.b32.xlu2 %v416_v61, %s2120_s11 }
 0x206   :  { %v476_v22 = vpop.permute.xlu2 %475 }
 0x207   :  { %v484_v51 = vsel %vm353_vm6, %v476_v22, %v482_v50  ;;  %v319_v50 = vstv %s1962_s13  ;;  %s2657_s13 = sld [smem:[#allocation2 + $0x44]] }
 0x208   :  { %v495_v27 = vrot.slane %v484_v51, 7 }
 0x215   :  { %v464_v19 = vpop.permute.xlu1 %463  ;;  %v462_v16 = vpop.permute.xlu0 %461 }
 0x216   :  { %v465_v20 = vsel %vm340_vm4, %v462_v16, %v464_v19  ;;  %v467_v23 = vsel %vm340_vm4, %v454_v42, %v462_v16  ;;  %v312_v19 = vstv %s1961_s12  ;;  %s1991_s12 = sld [smem:[#allocation2 + $0x35]] }
 0x217   :  { %v486_v21 = vrot.slane %v465_v20, 7 }
 0x219   :  { %v488_v24 = vsel %vm366_vm5, %v467_v23, %v486_v21  ;;  %v487_v25 = vsel %vm364_vm7, %v467_v23, %v486_v21 }
 0x21a   :  { %v489_v26 = vrot.slane %v488_v24, 1  ;;  %v492_v29 = vmax.f32 %v234_v6, %v487_v25 }
 0x21c   :  { %v493_v33 = vmax.f32 %v235_v7, %v489_v26 }
 0x21e   :  { %v474_v28 = vpop.permute.xlu0 %473 }
 0x21f   :  { %v477_v30 = vsel %vm353_vm6, %v474_v28, %v476_v22 }
 0x220   :  { %v496_v31 = vsel %vm364_vm7, %v477_v30, %v495_v27  ;;  %v497_v32 = vsel %vm366_vm5, %v477_v30, %v495_v27 }
 0x221   :  { %v498_v34 = vrot.slane %v497_v32, 1  ;;  %v2318_v35 = vmax.f32 %v492_v29, %v496_v31 }
 0x223   :  { %v2320_v36 = vmax.f32 %v493_v33, %v498_v34  ;;  %505 = vst [vmem:[#allocation1] ss:$9 sm:$0xff] %v2318_v35 }
 0x225   :  { %507 = vst [vmem:[#allocation1 + $0x1] ss:$9 sm:$0xff] %v2320_v36 }
 0x22c   :  { %v2324_v37 = vld [vmem:[#allocation1] sm:$0xff] }
 0x22d   :  { %510 = vst [vmem:[#allocation1] ss:$9 sm:$0xff] %v2318_v35 }
 0x22e   :  { %512 = vst [vmem:[#allocation1 + $0x1] ss:$9 sm:$0xff] %v2320_v36 }
 0x235   :  { %v2328_v38 = vld [vmem:[#allocation1] sm:$0xff]  ;;  %v2330_v41 = vld [vmem:[#allocation1 + $0x9] sm:$0xff] }
 0x236   :  { %523 = vst [vmem:[#allocation1] ss:$9 sm:$0xff] %v2318_v35 }
 0x237   :  { %525 = vst [vmem:[#allocation1 + $0x1] ss:$9 sm:$0xff] %v2320_v36 }
 0x23e   :  { %v2334_v44 = vld [vmem:[#allocation1] sm:$0xff]  ;;  %v2336_v46 = vld [vmem:[#allocation1 + $0x9] sm:$0xff] }
 0x23f   :  { %532 = vst [vmem:[#allocation1] ss:$9 sm:$0xff] %v2318_v35 }
 0x240   :  { %534 = vst [vmem:[#allocation1 + $0x1] ss:$9 sm:$0xff] %v2320_v36  ;;  %v265_v47 = vpop.xlane.xlu1 %264 }
 0x241   :  { %v266_v49 = vsel %vm84_vm0, %v265_v47, 0.0 }
 0x242   :  { %v267_v52 = vrot.slane %v266_v49, 4 }
 0x244   :  { %v268_v53 = vadd.f32 %v267_v52, %v266_v49 }
 0x246   :  { %v269_v54 = vrot.slane %v268_v53, 2 }
 0x247   :  { %v535_v55 = vld [vmem:[#allocation1] sm:$0xff]  ;;  %v536_v56 = vld [vmem:[#allocation1 + $0x9] sm:$0xff] }
 0x248   :  { %543 = vst [vmem:[#allocation1] ss:$9 sm:$0xff] %v2318_v35  ;;  %v270_v57 = vadd.f32 %v269_v54, %v268_v53  ;;  %537 = vrot.lane.b32.xlu2 %v535_v55, %s2120_s11  ;;  %v288_v58 = vpop.xlane.xlu2 %287 }
 0x249   :  { %545 = vst [vmem:[#allocation1 + $0x1] ss:$9 sm:$0xff] %v2320_v36  ;;  %v289_v59 = vsel %vm84_vm0, %v288_v58, 0.0 }
 0x24a   :  { %v271_v61 = vrot.slane %v270_v57, 1  ;;  %v290_v62 = vrot.slane %v289_v59, 4 }
 0x24c   :  { %v291_v0 = vadd.f32 %v290_v62, %v289_v59  ;;  %v272_v2 = vadd.f32 %v271_v61, %v270_v57 }
 0x24e   :  { %v292_v3 = vrot.slane %v291_v0, 2  ;;  %v296_v7 = vmul.f32 0.001953125, %v272_v2 }
 0x250   :  { %v293_v6 = vadd.f32 %v292_v3, %v291_v0  ;;  %v298_v8 = vmul.f32 %v296_v7, %v296_v7  ;;  %v314_v21 = vsub.f32 %v2209_v63, %v296_v7  ;;  %v315_v22 = vsub.f32 %v2211_v1, %v296_v7  ;;  %v2347_v29 = vld [vmem:[#allocation1 + $0x9] sm:$0xff] }
 0x252   :  { %v294_v42 = vrot.slane %v293_v6, 1 }
 0x254   :  { %v295_v43 = vadd.f32 %v294_v42, %v293_v6 }
 0x256   :  { %v297_v9 = vmul.f32 0.001953125, %v295_v43 }
 0x258   :  { %v299_v10 = vsub.f32 %v297_v9, %v298_v8 }
 0x25a   :  { %v301_v5 = vadd.f32 1e-05, %v299_v10 }
 0x25c   :  { %2050 = vrsqrt.f32 %v301_v5  ;;  %vm308_vm12 = vweird.f32 %v301_v5 }
 0x262   :  { %v2051_v11 = vpop.eup %2050 }
 0x263   :  { %v303_v12 = vmul.f32 %v2051_v11, %v301_v5  ;;  %vm309_vm11 = vweird.f32 %v2051_v11 }
 0x264   :  { %vm310_vm13 = vmor %vm308_vm12, %vm309_vm11 }
 0x265   :  { %v304_v13 = vmul.f32 %v2051_v11, %v303_v12  ;;  %v25_v12 = vlaneseq }
 0x267   :  { %v305_v14 = vmul.f32 0.5, %v304_v13 }
 0x269   :  { %v306_v15 = vsub.f32 1.5, %v305_v14  ;;  %v26_v14 = vand.u32 127, %v25_v12 }
 0x26b   :  { %v307_v16 = vmul.f32 %v2051_v11, %v306_v15  ;;  %v397_v15 = vpop.permute.xlu2 %396 }
 0x26d   :  { %v311_v20 = vsel %vm310_vm13, %v2051_v11, %v307_v16 }
 0x26e   :  { %v313_v23 = vmul.f32 %v312_v19, %v311_v20  ;;  %v27_v19 = vadd.s32 128, %v26_v14 }
 0x270   :  { %v316_v24 = vmul.f32 %v314_v21, %v313_v23  ;;  %v317_v51 = vmul.f32 %v315_v22, %v313_v23  ;;  %v31_v21 = vand.u32 15, %v27_v19 }
 0x272   :  { %v320_v25 = vadd.f32 %v319_v50, %v316_v24  ;;  %v321_v26 = vadd.f32 %v319_v50, %v317_v51  ;;  %vm2392_vm15 = vcmp.eq.s32.totalorder %v31_v21, 0  ;;  %v29_v51 = vshra.s32 %v27_v19, 4 }
 0x273   :  { %v420_v24 = vpop.permute.xlu2 %419  ;;  %v692_v19 = vstv %s2423_s14  ;;  %s2661_s14 = sld [smem:[#allocation2 + $0x1e]] }
 0x274   :  { %v322_v27 = vmax.f32 %v320_v25, 0.0  ;;  %v323_v28 = vmax.f32 %v321_v26, 0.0  ;;  %v30_v25 = vand.u32 15, %v26_v14 }
 0x276   :  { %570 = vst [vmem:[#allocation1] ss:$9 sm:$0xff] %v322_v27  ;;  %vm2406_vm2 = vcmp.eq.s32.totalorder %v30_v25, 0 }
 0x277   :  { %572 = vst [vmem:[#allocation1 + $0x1] ss:$9 sm:$0xff] %v323_v28 }
 0x27e   :  { %v573_v30 = vld [vmem:[#allocation1] sm:$0xff] }
 0x27f   :  { %575 = vst [vmem:[#allocation1] ss:$9 sm:$0xff] %v322_v27 }
 0x280   :  { %577 = vst [vmem:[#allocation1 + $0x1] ss:$9 sm:$0xff] %v323_v28 }
 0x287   :  { %v578_v31 = vld [vmem:[#allocation1] sm:$0xff]  ;;  %v579_v32 = vld [vmem:[#allocation1 + $0x9] sm:$0xff] }
 0x288   :  { %587 = vst [vmem:[#allocation1] ss:$9 sm:$0xff] %v322_v27  ;;  %580 = vrot.lane.b32.xlu0 %v578_v31, %s2117_s6  ;;  %v429_v31 = vsel %vm421_vm1, %v420_v24, %v2294_v4 }
 0x289   :  { %589 = vst [vmem:[#allocation1 + $0x1] ss:$9 sm:$0xff] %v323_v28 }
 0x290   :  { %v590_v63 = vld [vmem:[#allocation1] sm:$0xff]  ;;  %v591_v1 = vld [vmem:[#allocation1 + $0x9] sm:$0xff]  ;;  %582 = vrot.lane.b32.xlu0 %v579_v32, %s2117_s6  ;;  %v28_v32 = vshra.s32 %v26_v14, 4  ;;  %s1988_s6 = sld [smem:[#allocation2 + $0x14]] }
 0x291   :  { %598 = vst [vmem:[#allocation1] ss:$9 sm:$0xff] %v322_v27  ;;  %592 = vrot.lane.b32.xlu1 %v590_v63, %s2118_s7 }
 0x292   :  { %600 = vst [vmem:[#allocation1 + $0x1] ss:$9 sm:$0xff] %v323_v28 }
 0x298   :  { %594 = vrot.lane.b32.xlu0 %v591_v1, %s2118_s7  ;;  %v35_v1 = vand.u32 1, %v29_v51  ;;  %s1990_s7 = sld [smem:[#allocation2 + $0x1a]] }
 0x299   :  { %539 = vrot.lane.b32.xlu1 %v536_v56, %s2120_s11  ;;  %v601_v55 = vld [vmem:[#allocation1 + $0x9] sm:$0xff] }
 0x29a   :  { %vm37_vm3 = vcmp.eq.s32.totalorder %v35_v1, 0 }
 0x2a0   :  { %394 = vrot.lane.b32.xlu0 %v2276_v48, %s2119_s10 }
 0x2a8   :  { %515 = vrot.lane.b32.xlu0 %v2328_v38, %s2119_s10 }
 0x2b0   :  { %517 = vrot.lane.b32.xlu0 %v2330_v41, %s2119_s10 }
 0x2b8   :  { %417 = vrot.lane.b32.xlu0 %v2290_v60, %s2120_s11 }
 0x2fa   :  { %v581_v33 = vpop.permute.xlu0 %580 }
 0x2fb   :  { %v586_v52 = vsel %vm340_vm4, %v573_v30, %v581_v33 }
 0x302   :  { %v583_v34 = vpop.permute.xlu0 %582 }
 0x303   :  { %v584_v47 = vsel %vm340_vm4, %v581_v33, %v583_v34  ;;  %v593_v41 = vpop.permute.xlu1 %592  ;;  %v39_v33 = vand.u32 1, %v31_v21 }
 0x304   :  { %v605_v49 = vrot.slane %v584_v47, 7 }
 0x305   :  { %vm41_vm4 = vcmp.eq.s32.totalorder %v39_v33, 0 }
 0x306   :  { %v607_v53 = vsel %vm366_vm5, %v586_v52, %v605_v49  ;;  %v606_v48 = vsel %vm364_vm7, %v586_v52, %v605_v49  ;;  %v441_v52 = vrot.slane %v429_v31, 7  ;;  %v698_v31 = vstv %s2439_s16  ;;  %s1995_s16 = sld [smem:[#allocation2 + $0x21]] }
 0x307   :  { %v608_v38 = vrot.slane %v607_v53, 1  ;;  %v611_v58 = vmax.f32 %v322_v27, %v606_v48  ;;  %v34_v53 = vand.u32 1, %v28_v32  ;;  %v38_v48 = vand.u32 1, %v30_v25 }
 0x309   :  { %v612_v62 = vmax.f32 %v323_v28, %v608_v38  ;;  %vm36_vm8 = vcmp.eq.s32.totalorder %v34_v53, 0  ;;  %vm40_vm9 = vcmp.eq.s32.totalorder %v38_v48, 0 }
 0x30a   :  { %v595_v54 = vpop.permute.xlu0 %594  ;;  %vm42_vm10 = vmand %vm36_vm8, %vm40_vm9 }
 0x30b   :  { %v603_v56 = vsel %vm353_vm6, %v595_v54, %v601_v55  ;;  %v596_v60 = vsel %vm353_vm6, %v593_v41, %v595_v54  ;;  %v540_v16 = vpop.permute.xlu1 %539  ;;  %vm43_vm6 = vmand %vm37_vm3, %vm41_vm4 }
 0x30c   :  { %v614_v57 = vrot.slane %v603_v56, 7  ;;  %v548_v4 = vsel %vm421_vm1, %v540_v16, %v2347_v29 }
 0x30e   :  { %v615_v59 = vsel %vm364_vm7, %v596_v60, %v614_v57  ;;  %v616_v61 = vsel %vm366_vm5, %v596_v60, %v614_v57 }
 0x30f   :  { %v617_v0 = vrot.slane %v616_v61, 1  ;;  %v2370_v2 = vmax.f32 %v611_v58, %v615_v59  ;;  %v538_v61 = vpop.permute.xlu2 %537 }
 0x311   :  { %v2372_v3 = vmax.f32 %v612_v62, %v617_v0  ;;  %624 = vst [vmem:[#allocation1] ss:$9 sm:$0xff] %v2370_v2 }
 0x312   :  { %v395_v5 = vpop.permute.xlu0 %394 }
 0x313   :  { %626 = vst [vmem:[#allocation1 + $0x1] ss:$9 sm:$0xff] %v2372_v3  ;;  %v399_v23 = vsel %vm398_vm14, %v395_v5, %v397_v15  ;;  %v402_v34 = vsel %vm398_vm14, %v2272_v45, %v395_v5  ;;  %v688_v15 = vstv %s2430_s15  ;;  %s1993_s15 = sld [smem:[#allocation2 + $0x1b]] }
 0x314   :  { %v411_v26 = vsel %vm2392_vm15, %v2282_v18, %v399_v23  ;;  %v410_v54 = vsel %vm2406_vm2, %v2280_v17, %v402_v34  ;;  %v560_v17 = vrot.slane %v548_v4, 7 }
 0x315   :  { %v432_v18 = vrot.slane %v411_v26, 7 }
 0x317   :  { %v434_v29 = vsel %vm366_vm5, %v410_v54, %v432_v18 }
 0x318   :  { %v435_v60 = vrot.slane %v434_v29, 1  ;;  %v788_v29 = vstv %s1968_s17  ;;  %s1999_s17 = sld [smem:[#allocation2 + $0x1f]] }
 0x31a   :  { %v2376_v6 = vld [vmem:[#allocation1] sm:$0xff]  ;;  %v516_v11 = vpop.permute.xlu0 %515 }
 0x31b   :  { %629 = vst [vmem:[#allocation1] ss:$9 sm:$0xff] %v2370_v2  ;;  %v522_v47 = vsel %vm398_vm14, %v2324_v37, %v516_v11 }
 0x31c   :  { %631 = vst [vmem:[#allocation1 + $0x1] ss:$9 sm:$0xff] %v2372_v3  ;;  %v530_v45 = vsel %vm2406_vm2, %v2334_v44, %v522_v47  ;;  %v433_v44 = vsel %vm364_vm7, %v410_v54, %v432_v18 }
 0x322   :  { %v518_v13 = vpop.permute.xlu0 %517 }
 0x323   :  { %v633_v7 = vld [vmem:[#allocation1 + $0x9] sm:$0xff]  ;;  %v632_v42 = vld [vmem:[#allocation1] sm:$0xff]  ;;  %v519_v50 = vsel %vm398_vm14, %v516_v11, %v518_v13  ;;  %v439_v13 = vmax.f32 %v2268_v40, %v435_v60 }
 0x324   :  { %636 = vrot.lane.b32.xlu0 %v633_v7, %s2119_s10  ;;  %634 = vrot.lane.b32.xlu1 %v632_v42, %s2119_s10  ;;  %642 = vst [vmem:[#allocation1] ss:$9 sm:$0xff] %v2370_v2  ;;  %v531_v27 = vsel %vm2392_vm15, %v2336_v46, %v519_v50  ;;  %v541_v7 = vsel %vm421_vm1, %v538_v61, %v540_v16  ;;  %s1987_s10 = sld [smem:[#allocation2 + $0x43]] }
 0x325   :  { %644 = vst [vmem:[#allocation1 + $0x1] ss:$9 sm:$0xff] %v2372_v3  ;;  %v551_v46 = vrot.slane %v531_v27, 7  ;;  %v438_v42 = vmax.f32 %v2266_v39, %v433_v44  ;;  %v561_v11 = vsel %vm364_vm7, %v541_v7, %v560_v17 }
 0x327   :  { %v553_v38 = vsel %vm366_vm5, %v530_v45, %v551_v46  ;;  %v552_v56 = vsel %vm364_vm7, %v530_v45, %v551_v46 }
 0x328   :  { %v554_v59 = vrot.slane %v553_v38, 1  ;;  %v557_v62 = vmax.f32 %v2318_v35, %v552_v56  ;;  %v792_v38 = vstv %s1969_s18  ;;  %s1998_s18 = sld [smem:[#allocation2 + $0x1c]] }
 0x32a   :  { %v418_v20 = vpop.permute.xlu0 %417  ;;  %v558_v12 = vmax.f32 %v2320_v36, %v554_v59  ;;  %v2453_v39 = vmax.f32 %v557_v62, %v561_v11 }
 0x32b   :  { %v422_v37 = vsel %vm421_vm1, %v418_v20, %v420_v24 }
 0x32c   :  { %v2384_v43 = vld [vmem:[#allocation1] sm:$0xff]  ;;  %v646_v8 = vld [vmem:[#allocation1 + $0x9] sm:$0xff]  ;;  %v443_v41 = vsel %vm366_vm5, %v422_v37, %v441_v52  ;;  %v442_v0 = vsel %vm364_vm7, %v422_v37, %v441_v52 }
 0x32d   :  { %651 = vst [vmem:[#allocation1] ss:$9 sm:$0xff] %v2370_v2  ;;  %v2451_v14 = vmax.f32 %v438_v42, %v442_v0 }
 0x32e   :  { %653 = vst [vmem:[#allocation1 + $0x1] ss:$9 sm:$0xff] %v2372_v3 }
 0x32f   :  { %v689_v26 = vmul.f32 %v688_v15, %v2451_v14  ;;  %v789_v56 = vmul.f32 %v788_v29, %v2451_v14 }
 0x335   :  { %v655_v9 = vld [vmem:[#allocation1 + $0x9] sm:$0xff]  ;;  %v654_v10 = vld [vmem:[#allocation1] sm:$0xff] }
 0x336   :  { %658 = vrot.lane.b32.xlu1 %v655_v9, %s2120_s11  ;;  %656 = vrot.lane.b32.xlu0 %v654_v10, %s2120_s11  ;;  %662 = vst [vmem:[#allocation1] ss:$9 sm:$0xff] %v2370_v2  ;;  %v562_v9 = vsel %vm366_vm5, %v541_v7, %v560_v17  ;;  %v2121_v10 = vmov 0.0   ;;  %v798_v17 = vstv %s1970_s19  ;;  %s1982_s11 = sld [smem:[#allocation2 + $0x42]] }
 0x337   :  { %664 = vst [vmem:[#allocation1 + $0x1] ss:$9 sm:$0xff] %v2372_v3  ;;  %v1943_v5 = vsel %vm43_vm6, 1.0, %v2121_v10  ;;  %v563_v22 = vrot.slane %v562_v9, 1  ;;  %v1942_v24 = vsel %vm42_vm10, 1.0, %v2121_v10  ;;  %s2000_s19 = sld [smem:[#allocation2 + $0x22]] }
 0x338   :  { %v705_v40 = vrot.slane %v1943_v5, 7 }
 0x339   :  { %v2461_v25 = vmax.f32 %v558_v12, %v563_v22 }
 0x33a   :  { %v707_v47 = vsel %vm366_vm5, %v1942_v24, %v705_v40  ;;  %v2480_v4 = vsel %vm364_vm7, %v1942_v24, %v705_v40 }
 0x33b   :  { %v694_v46 = vmul.f32 %v692_v19, %v2461_v25  ;;  %v2482_v53 = vrot.slane %v707_v47, 1  ;;  %v794_v62 = vmul.f32 %v792_v38, %v2461_v25 }
 0x33e   :  { %v665_v20 = vld [vmem:[#allocation1 + $0x9] sm:$0xff] }
 0x396   :  { %v637_v28 = vpop.permute.xlu0 %636  ;;  %v635_v30 = vpop.permute.xlu1 %634 }
 0x397   :  { %v638_v49 = vsel %vm398_vm14, %v635_v30, %v637_v28  ;;  %v641_v57 = vsel %vm398_vm14, %v2376_v6, %v635_v30  ;;  %v444_v6 = vrot.slane %v443_v41, 1  ;;  %v693_v30 = vmul.f32 %v692_v19, %v2453_v39 }
 0x398   :  { %v650_v55 = vsel %vm2392_vm15, %v646_v8, %v638_v49  ;;  %v649_v8 = vsel %vm2406_vm2, %v2384_v43, %v641_v57  ;;  %v793_v57 = vmul.f32 %v792_v38, %v2453_v39 }
 0x399   :  { %v670_v58 = vrot.slane %v650_v55, 7  ;;  %v2458_v23 = vmax.f32 %v439_v13, %v444_v6  ;;  %v695_v49 = vadd.f32 %v693_v30, %v689_v26 }
 0x39a   :  { %v795_v6 = vadd.f32 %v793_v57, %v789_v56 }
 0x39b   :  { %v672_v35 = vsel %vm366_vm5, %v649_v8, %v670_v58  ;;  %v671_v43 = vsel %vm364_vm7, %v649_v8, %v670_v58  ;;  %v690_v1 = vmul.f32 %v688_v15, %v2458_v23  ;;  %v790_v44 = vmul.f32 %v788_v29, %v2458_v23 }
 0x39c   :  { %v673_v50 = vrot.slane %v672_v35, 1  ;;  %v676_v28 = vmax.f32 %v2370_v2, %v671_v43 }
 0x39d   :  { %v696_v48 = vadd.f32 %v694_v46, %v690_v1  ;;  %v796_v9 = vadd.f32 %v794_v62, %v790_v44 }
 0x39e   :  { %v677_v33 = vmax.f32 %v2372_v3, %v673_v50 }
 0x3a8   :  { %v659_v16 = vpop.permute.xlu1 %658  ;;  %v657_v21 = vpop.permute.xlu0 %656 }
 0x3a9   :  { %v667_v36 = vsel %vm421_vm1, %v659_v16, %v665_v20  ;;  %v660_v27 = vsel %vm421_vm1, %v657_v21, %v659_v16  ;;  %v880_v16 = vstv %s1973_s0  ;;  %v884_v20 = vstv %s1974_s20  ;;  %s2004_s0 = sld [smem:[#allocation2 + $0x20]] }
 0x3aa   :  { %v679_v51 = vrot.slane %v667_v36, 7  ;;  %v890_v21 = vstv %s1975_s21  ;;  %v881_v22 = vmul.f32 %v880_v16, %v2451_v14  ;;  %v882_v50 = vmul.f32 %v880_v16, %v2458_v23  ;;  %s2003_s20 = sld [smem:[#allocation2 + $0x1d]] }
 0x3ab   :  { %v885_v24 = vmul.f32 %v884_v20, %v2453_v39  ;;  %s2005_s21 = sld [smem:[#allocation2 + $0x23]] }
 0x3ac   :  { %v680_v32 = vsel %vm364_vm7, %v660_v27, %v679_v51  ;;  %v681_v63 = vsel %vm366_vm5, %v660_v27, %v679_v51 }
 0x3ad   :  { %v682_v34 = vrot.slane %v681_v63, 1  ;;  %v2472_v18 = vmax.f32 %v676_v28, %v680_v32  ;;  %v886_v28 = vmul.f32 %v884_v20, %v2461_v25  ;;  %v887_v63 = vadd.f32 %v885_v24, %v881_v22 }
 0x3af   :  { %v2476_v2 = vmax.f32 %v677_v33, %v682_v34  ;;  %v699_v52 = vmul.f32 %v698_v31, %v2472_v18  ;;  %v799_v60 = vmul.f32 %v798_v17, %v2472_v18  ;;  %v891_v51 = vmul.f32 %v890_v21, %v2472_v18 }
 0x3b0   :  { %v888_v33 = vadd.f32 %v886_v28, %v882_v50 }
 0x3b1   :  { %v700_v3 = vmul.f32 %v698_v31, %v2476_v2  ;;  %v2485_v54 = vadd.f32 %v699_v52, %v695_v49  ;;  %v800_v0 = vmul.f32 %v798_v17, %v2476_v2  ;;  %v2501_v10 = vadd.f32 %v799_v60, %v795_v6 }
 0x3b2   :  { %v892_v30 = vmul.f32 %v890_v21, %v2476_v2  ;;  %v2519_v34 = vadd.f32 %v891_v51, %v887_v63 }
 0x3b3   :  { %v2487_v45 = vadd.f32 %v700_v3, %v696_v48  ;;  %v711_v37 = vmul.f32 %v2480_v4, %v2485_v54  ;;  %v2503_v5 = vadd.f32 %v800_v0, %v796_v9  ;;  %v803_v35 = vmul.f32 %v2501_v10, %v2480_v4 }
 0x3b4   :  { %v2521_v47 = vadd.f32 %v892_v30, %v888_v33  ;;  %v895_v46 = vmul.f32 %v2519_v34, %v2480_v4 }
 0x3b5   :  { %v712_v55 = vmul.f32 %v2482_v53, %v2487_v45  ;;  %715 = vst [vmem:[#allocation1] ss:$9 sm:$0xff] %v711_v37  ;;  %v734_v41 = vmul.f32 %v711_v37, %v711_v37  ;;  %v804_v11 = vmul.f32 %v2503_v5, %v2482_v53  ;;  %v826_v36 = vmul.f32 %v803_v35, %v803_v35 }
 0x3b6   :  { %v896_v49 = vmul.f32 %v2521_v47, %v2482_v53  ;;  %v918_v29 = vmul.f32 %v895_v46, %v895_v46 }
 0x3b7   :  { %717 = vst [vmem:[#allocation1 + $0x1] ss:$9 sm:$0xff] %v712_v55  ;;  %v735_v58 = vmul.f32 %v712_v55, %v712_v55  ;;  %v827_v40 = vmul.f32 %v804_v11, %v804_v11 }
 0x3b8   :  { %v919_v38 = vmul.f32 %v896_v49, %v896_v49 }
 0x3be   :  { %v718_v59 = vld [vmem:[#allocation1] sm:$0xff]  ;;  %v719_v61 = vld [vmem:[#allocation1 + $0x9] sm:$0xff] }
 0x3bf   :  { %v722_v7 = vsel %vm84_vm0, %v718_v59, 0.0  ;;  %v723_v42 = vsel %vm84_vm0, %v719_v61, 0.0  ;;  %738 = vst [vmem:[#allocation1] ss:$9 sm:$0xff] %v734_v41 }
 0x3c0   :  { %v724_v8 = vadd.f32 %v723_v42, %v722_v7  ;;  %740 = vst [vmem:[#allocation1 + $0x1] ss:$9 sm:$0xff] %v735_v58 }
 0x3c2   :  { %725 = vadd.xlane.f32.xlu2 %v724_v8 }
 0x3c7   :  { %v741_v12 = vld [vmem:[#allocation1] sm:$0xff]  ;;  %v742_v13 = vld [vmem:[#allocation1 + $0x9] sm:$0xff] }
 0x3c8   :  { %v745_v15 = vsel %vm84_vm0, %v741_v12, 0.0  ;;  %v746_v19 = vsel %vm84_vm0, %v742_v13, 0.0  ;;  %807 = vst [vmem:[#allocation1] ss:$9 sm:$0xff] %v803_v35 }
 0x3c9   :  { %v747_v43 = vadd.f32 %v746_v19, %v745_v15  ;;  %809 = vst [vmem:[#allocation1 + $0x1] ss:$9 sm:$0xff] %v804_v11 }
 0x3cb   :  { %748 = vadd.xlane.f32.xlu0 %v747_v43 }
 0x3d0   :  { %v810_v26 = vld [vmem:[#allocation1] sm:$0xff]  ;;  %v811_v27 = vld [vmem:[#allocation1 + $0x9] sm:$0xff] }
 0x3d1   :  { %v814_v31 = vsel %vm84_vm0, %v810_v26, 0.0  ;;  %v815_v32 = vsel %vm84_vm0, %v811_v27, 0.0  ;;  %830 = vst [vmem:[#allocation1] ss:$9 sm:$0xff] %v826_v36 }
 0x3d2   :  { %v816_v1 = vadd.f32 %v815_v32, %v814_v31  ;;  %832 = vst [vmem:[#allocation1 + $0x1] ss:$9 sm:$0xff] %v827_v40 }
 0x3d4   :  { %817 = vadd.xlane.f32.xlu1 %v816_v1 }
 0x3d9   :  { %v833_v52 = vld [vmem:[#allocation1] sm:$0xff]  ;;  %v834_v48 = vld [vmem:[#allocation1 + $0x9] sm:$0xff] }
 0x3da   :  { %v837_v3 = vsel %vm84_vm0, %v833_v52, 0.0  ;;  %v838_v37 = vsel %vm84_vm0, %v834_v48, 0.0  ;;  %899 = vst [vmem:[#allocation1] ss:$9 sm:$0xff] %v895_v46 }
 0x3db   :  { %v839_v55 = vadd.f32 %v838_v37, %v837_v3  ;;  %901 = vst [vmem:[#allocation1 + $0x1] ss:$9 sm:$0xff] %v896_v49 }
 0x3dd   :  { %840 = vadd.xlane.f32.xlu2 %v839_v55 }
 0x3e2   :  { %v902_v17 = vld [vmem:[#allocation1] sm:$0xff]  ;;  %v903_v56 = vld [vmem:[#allocation1 + $0x9] sm:$0xff] }
 0x3e3   :  { %v906_v44 = vsel %vm84_vm0, %v902_v17, 0.0  ;;  %v907_v41 = vsel %vm84_vm0, %v903_v56, 0.0  ;;  %922 = vst [vmem:[#allocation1] ss:$9 sm:$0xff] %v918_v29 }
 0x3e4   :  { %v908_v57 = vadd.f32 %v907_v41, %v906_v44  ;;  %924 = vst [vmem:[#allocation1 + $0x1] ss:$9 sm:$0xff] %v919_v38 }
 0x3e6   :  { %909 = vadd.xlane.f32.xlu1 %v908_v57 }
 0x3eb   :  { %v925_v58 = vld [vmem:[#allocation1] sm:$0xff]  ;;  %v926_v60 = vld [vmem:[#allocation1 + $0x9] sm:$0xff] }
 0x3ec   :  { %v929_v59 = vsel %vm84_vm0, %v925_v58, 0.0  ;;  %v930_v61 = vsel %vm84_vm0, %v926_v60, 0.0 }
 0x3ed   :  { %v931_v62 = vadd.f32 %v930_v61, %v929_v59 }
 0x3ef   :  { %932 = vadd.xlane.f32.xlu0 %v931_v62 }
 0x435   :  { %v726_v0 = vpop.xlane.xlu2 %725 }
 0x436   :  { %v727_v7 = vsel %vm84_vm0, %v726_v0, 0.0 }
 0x437   :  { %v728_v42 = vrot.slane %v727_v7, 4 }
 0x439   :  { %v729_v6 = vadd.f32 %v728_v42, %v727_v7 }
 0x43b   :  { %v730_v11 = vrot.slane %v729_v6, 2 }
 0x43d   :  { %v731_v15 = vadd.f32 %v730_v11, %v729_v6 }
 0x43e   :  { %v749_v8 = vpop.xlane.xlu0 %748 }
 0x43f   :  { %v750_v9 = vsel %vm84_vm0, %v749_v8, 0.0  ;;  %v732_v21 = vrot.slane %v731_v15, 1 }
 0x440   :  { %v751_v35 = vrot.slane %v750_v9, 4 }
 0x441   :  { %v733_v24 = vadd.f32 %v732_v21, %v731_v15 }
 0x442   :  { %v752_v12 = vadd.f32 %v751_v35, %v750_v9 }
 0x443   :  { %v2537_v28 = vmul.f32 0.0078125, %v733_v24 }
 0x444   :  { %v753_v13 = vrot.slane %v752_v12, 2 }
 0x445   :  { %v759_v1 = vmul.f32 %v2537_v28, %v2537_v28 }
 0x446   :  { %v754_v43 = vadd.f32 %v753_v13, %v752_v12 }
 0x447   :  { %v818_v19 = vpop.xlane.xlu1 %817 }
 0x448   :  { %v819_v16 = vsel %vm84_vm0, %v818_v19, 0.0  ;;  %v755_v50 = vrot.slane %v754_v43, 1 }
 0x449   :  { %v820_v20 = vrot.slane %v819_v16, 4 }
 0x44a   :  { %v756_v51 = vadd.f32 %v755_v50, %v754_v43 }
 0x44b   :  { %v821_v22 = vadd.f32 %v820_v20, %v819_v16 }
 0x44c   :  { %v758_v32 = vmul.f32 0.0078125, %v756_v51 }
 0x44d   :  { %v822_v36 = vrot.slane %v821_v22, 2 }
 0x44e   :  { %v760_v49 = vsub.f32 %v758_v32, %v759_v1 }
 0x44f   :  { %v823_v40 = vadd.f32 %v822_v36, %v821_v22 }
 0x450   :  { %v841_v26 = vpop.xlane.xlu2 %840  ;;  %v762_v38 = vadd.f32 1e-05, %v760_v49 }
 0x451   :  { %v842_v27 = vsel %vm84_vm0, %v841_v26, 0.0  ;;  %v824_v30 = vrot.slane %v823_v40, 1 }
 0x452   :  { %v843_v31 = vrot.slane %v842_v27, 4  ;;  %2052 = vrsqrt.f32 %v762_v38  ;;  %vm769_vm13 = vweird.f32 %v762_v38 }
 0x453   :  { %v825_v33 = vadd.f32 %v824_v30, %v823_v40 }
 0x454   :  { %v844_v63 = vadd.f32 %v843_v31, %v842_v27  ;;  %v865_v31 = vstv %s1971_s22  ;;  %s2001_s22 = sld [smem:[#allocation2 + $0x37]] }
 0x455   :  { %v2541_v3 = vmul.f32 0.0078125, %v825_v33 }
 0x456   :  { %v845_v46 = vrot.slane %v844_v63, 2 }
 0x457   :  { %v851_v44 = vmul.f32 %v2541_v3, %v2541_v3 }
 0x458   :  { %v846_v52 = vadd.f32 %v845_v46, %v844_v63  ;;  %v2053_v0 = vpop.eup %2052  ;;  %v773_v63 = vstv %s1966_s23  ;;  %s1996_s23 = sld [smem:[#allocation2 + $0x36]] }
 0x459   :  { %v910_v48 = vpop.xlane.xlu1 %909  ;;  %v764_v8 = vmul.f32 %v2053_v0, %v762_v38  ;;  %vm770_vm7 = vweird.f32 %v2053_v0 }
 0x45a   :  { %v847_v37 = vrot.slane %v846_v52, 1  ;;  %v911_v55 = vsel %vm84_vm0, %v910_v48, 0.0  ;;  %vm771_vm15 = vmor %vm769_vm13, %vm770_vm7  ;;  %v868_v48 = vsub.f32 %v2503_v5, %v2541_v3 }
 0x45b   :  { %v912_v29 = vrot.slane %v911_v55, 4  ;;  %v765_v15 = vmul.f32 %v2053_v0, %v764_v8 }
 0x45c   :  { %v848_v17 = vadd.f32 %v847_v37, %v846_v52  ;;  %v867_v52 = vsub.f32 %v2501_v10, %v2541_v3  ;;  %v780_v10 = vstv %s1967_s25  ;;  %s1997_s25 = sld [smem:[#allocation2 + $0x45]] }
 0x45d   :  { %v913_v56 = vadd.f32 %v912_v29, %v911_v55  ;;  %v766_v21 = vmul.f32 0.5, %v765_v15  ;;  %v775_v55 = vsub.f32 %v2485_v54, %v2537_v28  ;;  %v776_v29 = vsub.f32 %v2487_v45, %v2537_v28 }
 0x45e   :  { %v850_v41 = vmul.f32 0.0078125, %v848_v17  ;;  %v957_v28 = vstv %s2555_s26  ;;  %s2761_s26 = sld [smem:[#allocation2 + $0x38]] }
 0x45f   :  { %v914_v57 = vrot.slane %v913_v56, 2  ;;  %v767_v40 = vsub.f32 1.5, %v766_v21 }
 0x460   :  { %v852_v58 = vsub.f32 %v850_v41, %v851_v44 }
 0x461   :  { %v915_v61 = vadd.f32 %v914_v57, %v913_v56  ;;  %v768_v30 = vmul.f32 %v2053_v0, %v767_v40  ;;  %v872_v56 = vstv %s1972_s24  ;;  %s2002_s24 = sld [smem:[#allocation2 + $0x46]] }
 0x462   :  { %v854_v60 = vadd.f32 1e-05, %v852_v58  ;;  %v933_v59 = vpop.xlane.xlu0 %932 }
 0x463   :  { %v934_v62 = vsel %vm84_vm0, %v933_v59, 0.0  ;;  %v916_v42 = vrot.slane %v915_v61, 1  ;;  %v772_v1 = vsel %vm771_vm15, %v2053_v0, %v768_v30 }
 0x464   :  { %2054 = vrsqrt.f32 %v854_v60  ;;  %v935_v7 = vrot.slane %v934_v62, 4  ;;  %vm861_vm11 = vweird.f32 %v854_v60  ;;  %v774_v49 = vmul.f32 %v773_v63, %v772_v1 }
 0x465   :  { %v917_v12 = vadd.f32 %v916_v42, %v915_v61 }
 0x466   :  { %v936_v6 = vadd.f32 %v935_v7, %v934_v62  ;;  %v777_v41 = vmul.f32 %v775_v55, %v774_v49  ;;  %v778_v57 = vmul.f32 %v776_v29, %v774_v49 }
 0x467   :  { %v2547_v16 = vmul.f32 0.0078125, %v917_v12 }
 0x468   :  { %v937_v35 = vrot.slane %v936_v6, 2  ;;  %v781_v54 = vadd.f32 %v780_v10, %v777_v41  ;;  %v782_v45 = vadd.f32 %v780_v10, %v778_v57 }
 0x469   :  { %v943_v36 = vmul.f32 %v2547_v16, %v2547_v16  ;;  %v959_v0 = vsub.f32 %v2519_v34, %v2547_v16  ;;  %v960_v8 = vsub.f32 %v2521_v47, %v2547_v16 }
 0x46a   :  { %v2055_v9 = vpop.eup %2054  ;;  %v938_v13 = vadd.f32 %v937_v35, %v936_v6  ;;  %v783_v42 = vmax.f32 %v781_v54, 0.0  ;;  %v784_v6 = vmax.f32 %v782_v45, 0.0  ;;  %v964_v35 = vstv %s2561_s1  ;;  %s2767_s1 = sld [smem:[#allocation2 + $0x47]] }
 0x46b   :  { %v856_v11 = vmul.f32 %v2055_v9, %v854_v60  ;;  %vm862_vm5 = vweird.f32 %v2055_v9 }
 0x46c   :  { %v939_v20 = vrot.slane %v938_v13, 1  ;;  %vm863_vm12 = vmor %vm861_vm11, %vm862_vm5  ;;  %v2580_v34 = vmin.f32 %v784_v6, 6.0 }
 0x46d   :  { %v857_v19 = vmul.f32 %v2055_v9, %v856_v11 }
 0x46e   :  { %v940_v22 = vadd.f32 %v939_v20, %v938_v13 }
 0x46f   :  { %v858_v43 = vmul.f32 0.5, %v857_v19  ;;  %v976_v19 = vstv %s2563_s27  ;;  %s2769_s27 = sld [smem:[#allocation2 + $0x27]] }
 0x470   :  { %v942_v24 = vmul.f32 0.0078125, %v940_v22  ;;  %v972_v22 = vstv %s2565_s28  ;;  %s2771_s28 = sld [smem:[#allocation2 + $0x24]] }
 0x471   :  { %v859_v50 = vsub.f32 1.5, %v858_v43  ;;  %v2578_v43 = vmin.f32 %v783_v42, 6.0 }
 0x472   :  { %v944_v51 = vsub.f32 %v942_v24, %v943_v36  ;;  %v982_v24 = vstv %s1980_s29  ;;  %s2010_s29 = sld [smem:[#allocation2 + $0x2a]] }
 0x473   :  { %v860_v26 = vmul.f32 %v2055_v9, %v859_v50  ;;  %v973_v40 = vmul.f32 %v972_v22, %v2578_v43 }
 0x474   :  { %v946_v27 = vadd.f32 1e-05, %v944_v51  ;;  %v974_v51 = vmul.f32 %v972_v22, %v2580_v34 }
 0x475   :  { %v864_v32 = vsel %vm863_vm12, %v2055_v9, %v860_v26 }
 0x476   :  { %2056 = vrsqrt.f32 %v946_v27  ;;  %v866_v33 = vmul.f32 %v865_v31, %v864_v32  ;;  %vm953_vm2 = vweird.f32 %v946_v27 }
 0x478   :  { %v869_v38 = vmul.f32 %v867_v52, %v866_v33  ;;  %v870_v17 = vmul.f32 %v868_v48, %v866_v33  ;;  %v1064_v52 = vstv %s1984_s30  ;;  %v1060_v48 = vstv %s1983_s3  ;;  %s2014_s30 = sld [smem:[#allocation2 + $0x28]] }
 0x479   :  { %v1062_v10 = vmul.f32 %v1060_v48, %v2580_v34  ;;  %s2013_s3 = sld [smem:[#allocation2 + $0x25]] }
 0x47a   :  { %v873_v3 = vadd.f32 %v872_v56, %v869_v38  ;;  %v874_v58 = vadd.f32 %v872_v56, %v870_v17  ;;  %v1061_v17 = vmul.f32 %v1060_v48, %v2578_v43 }
 0x47c   :  { %v2057_v46 = vpop.eup %2056  ;;  %v875_v61 = vmax.f32 %v873_v3, 0.0  ;;  %v876_v62 = vmax.f32 %v874_v58, 0.0 }
 0x47d   :  { %v948_v37 = vmul.f32 %v2057_v46, %v946_v27  ;;  %vm954_vm1 = vweird.f32 %v2057_v46 }
 0x47e   :  { %vm955_vm3 = vmor %vm953_vm2, %vm954_vm1  ;;  %v2573_v11 = vmin.f32 %v875_v61, 6.0  ;;  %v2575_v12 = vmin.f32 %v876_v62, 6.0 }
 0x47f   :  { %v949_v44 = vmul.f32 %v2057_v46, %v948_v37  ;;  %v1070_v37 = vstv %s1985_s4  ;;  %s2015_s4 = sld [smem:[#allocation2 + $0x2b]] }
 0x480   :  { %v977_v50 = vmul.f32 %v976_v19, %v2573_v11  ;;  %v978_v47 = vmul.f32 %v976_v19, %v2575_v12  ;;  %v1065_v55 = vmul.f32 %v1064_v52, %v2573_v11  ;;  %v1066_v29 = vmul.f32 %v1064_v52, %v2575_v12 }
 0x481   :  { %v950_v5 = vmul.f32 0.5, %v949_v44 }
 0x482   :  { %v979_v30 = vadd.f32 %v977_v50, %v973_v40  ;;  %v980_v31 = vadd.f32 %v978_v47, %v974_v51  ;;  %v1068_v45 = vadd.f32 %v1066_v29, %v1062_v10 }
 0x483   :  { %v951_v60 = vsub.f32 1.5, %v950_v5 }
 0x485   :  { %v952_v59 = vmul.f32 %v2057_v46, %v951_v60  ;;  %v1067_v60 = vadd.f32 %v1065_v55, %v1061_v17 }
 0x487   :  { %v956_v7 = vsel %vm955_vm3, %v2057_v46, %v952_v59 }
 0x488   :  { %v958_v9 = vmul.f32 %v957_v28, %v956_v7 }
 0x48a   :  { %v961_v13 = vmul.f32 %v959_v0, %v958_v9  ;;  %v962_v15 = vmul.f32 %v960_v8, %v958_v9  ;;  %v1152_v9 = vstv %s1989_s5  ;;  %s2019_s5 = sld [smem:[#allocation2 + $0x29]] }
 0x48b   :  { %v1154_v19 = vmul.f32 %v1152_v9, %v2575_v12 }
 0x48c   :  { %v965_v20 = vadd.f32 %v964_v35, %v961_v13  ;;  %v966_v21 = vadd.f32 %v964_v35, %v962_v15  ;;  %v1148_v35 = vstv %s1988_s6  ;;  %v1158_v13 = vstv %s1990_s7  ;;  %s2018_s6 = sld [smem:[#allocation2 + $0x26]] }
 0x48d   :  { %v1153_v15 = vmul.f32 %v1152_v9, %v2573_v11  ;;  %s2020_s7 = sld [smem:[#allocation2 + $0x2c]] }
 0x48e   :  { %v967_v16 = vmax.f32 %v965_v20, 0.0  ;;  %v968_v36 = vmax.f32 %v966_v21, 0.0  ;;  %v1149_v21 = vmul.f32 %v1148_v35, %v2578_v43 }
 0x490   :  { %v969_v26 = vmin.f32 %v967_v16, 6.0  ;;  %v970_v27 = vmin.f32 %v968_v36, 6.0  ;;  %v1150_v36 = vmul.f32 %v1148_v35, %v2580_v34 }
 0x492   :  { %v983_v32 = vmul.f32 %v982_v24, %v969_v26  ;;  %v984_v63 = vmul.f32 %v982_v24, %v970_v27  ;;  %v1071_v44 = vmul.f32 %v1070_v37, %v969_v26  ;;  %v1072_v5 = vmul.f32 %v1070_v37, %v970_v27 }
 0x493   :  { %v1159_v50 = vmul.f32 %v1158_v13, %v969_v26  ;;  %v1160_v24 = vmul.f32 %v1158_v13, %v970_v27  ;;  %v1156_v11 = vadd.f32 %v1154_v19, %v1150_v36 }
 0x494   :  { %v2587_v1 = vadd.f32 %v983_v32, %v979_v30  ;;  %v2589_v33 = vadd.f32 %v984_v63, %v980_v31  ;;  %v2601_v28 = vadd.f32 %v1071_v44, %v1067_v60  ;;  %v2603_v59 = vadd.f32 %v1072_v5, %v1068_v45 }
 0x495   :  { %v1155_v30 = vadd.f32 %v1153_v15, %v1149_v21  ;;  %v2619_v43 = vadd.f32 %v1160_v24, %v1156_v11 }
 0x496   :  { %v987_v46 = vmul.f32 %v2587_v1, %v2480_v4  ;;  %v988_v49 = vmul.f32 %v2589_v33, %v2482_v53  ;;  %v1075_v61 = vmul.f32 %v2601_v28, %v2480_v4  ;;  %v1076_v62 = vmul.f32 %v2603_v59, %v2482_v53 }
 0x497   :  { %v2617_v12 = vadd.f32 %v1159_v50, %v1155_v30  ;;  %v1164_v34 = vmul.f32 %v2619_v43, %v2482_v53 }
 0x498   :  { %991 = vst [vmem:[#allocation1] ss:$9 sm:$0xff] %v987_v46  ;;  %v1010_v38 = vmul.f32 %v987_v46, %v987_v46  ;;  %v1011_v56 = vmul.f32 %v988_v49, %v988_v49  ;;  %v1098_v20 = vmul.f32 %v1075_v61, %v1075_v61  ;;  %v1099_v22 = vmul.f32 %v1076_v62, %v1076_v62 }
 0x499   :  { %993 = vst [vmem:[#allocation1 + $0x1] ss:$9 sm:$0xff] %v988_v49  ;;  %v1163_v26 = vmul.f32 %v2617_v12, %v2480_v4  ;;  %v1187_v48 = vmul.f32 %v1164_v34, %v1164_v34 }
 0x49b   :  { %v1186_v52 = vmul.f32 %v1163_v26, %v1163_v26 }
 0x4a0   :  { %v994_v41 = vld [vmem:[#allocation1] sm:$0xff]  ;;  %v995_v57 = vld [vmem:[#allocation1 + $0x9] sm:$0xff] }
 0x4a1   :  { %v998_v3 = vsel %vm84_vm0, %v994_v41, 0.0  ;;  %v999_v58 = vsel %vm84_vm0, %v995_v57, 0.0  ;;  %1014 = vst [vmem:[#allocation1] ss:$9 sm:$0xff] %v1010_v38 }
 0x4a2   :  { %v1000_v54 = vadd.f32 %v999_v58, %v998_v3  ;;  %1016 = vst [vmem:[#allocation1 + $0x1] ss:$9 sm:$0xff] %v1011_v56 }
 0x4a4   :  { %1001 = vadd.xlane.f32.xlu2 %v1000_v54 }
 0x4a9   :  { %v1017_v0 = vld [vmem:[#allocation1] sm:$0xff]  ;;  %v1018_v7 = vld [vmem:[#allocation1 + $0x9] sm:$0xff] }
 0x4aa   :  { %v1021_v42 = vsel %vm84_vm0, %v1017_v0, 0.0  ;;  %v1022_v6 = vsel %vm84_vm0, %v1018_v7, 0.0  ;;  %1079 = vst [vmem:[#allocation1] ss:$9 sm:$0xff] %v1075_v61 }
 0x4ab   :  { %v1023_v8 = vadd.f32 %v1022_v6, %v1021_v42  ;;  %1081 = vst [vmem:[#allocation1 + $0x1] ss:$9 sm:$0xff] %v1076_v62 }
 0x4ad   :  { %1024 = vadd.xlane.f32.xlu0 %v1023_v8 }
 0x4b2   :  { %v1082_v47 = vld [vmem:[#allocation1] sm:$0xff]  ;;  %v1083_v16 = vld [vmem:[#allocation1 + $0x9] sm:$0xff] }
 0x4b3   :  { %v1086_v40 = vsel %vm84_vm0, %v1082_v47, 0.0  ;;  %v1087_v51 = vsel %vm84_vm0, %v1083_v16, 0.0  ;;  %1102 = vst [vmem:[#allocation1] ss:$9 sm:$0xff] %v1098_v20 }
 0x4b4   :  { %v1088_v31 = vadd.f32 %v1087_v51, %v1086_v40  ;;  %1104 = vst [vmem:[#allocation1 + $0x1] ss:$9 sm:$0xff] %v1099_v22 }
 0x4b6   :  { %1089 = vadd.xlane.f32.xlu1 %v1088_v31 }
 0x4bb   :  { %v1105_v27 = vld [vmem:[#allocation1] sm:$0xff]  ;;  %v1106_v32 = vld [vmem:[#allocation1 + $0x9] sm:$0xff] }
 0x4bc   :  { %v1109_v63 = vsel %vm84_vm0, %v1105_v27, 0.0  ;;  %v1110_v46 = vsel %vm84_vm0, %v1106_v32, 0.0  ;;  %1167 = vst [vmem:[#allocation1] ss:$9 sm:$0xff] %v1163_v26 }
 0x4bd   :  { %v1111_v49 = vadd.f32 %v1110_v46, %v1109_v63  ;;  %1169 = vst [vmem:[#allocation1 + $0x1] ss:$9 sm:$0xff] %v1164_v34 }
 0x4bf   :  { %1112 = vadd.xlane.f32.xlu2 %v1111_v49 }
 0x4c4   :  { %v1170_v37 = vld [vmem:[#allocation1] sm:$0xff]  ;;  %v1171_v55 = vld [vmem:[#allocation1 + $0x9] sm:$0xff] }
 0x4c5   :  { %v1174_v29 = vsel %vm84_vm0, %v1170_v37, 0.0  ;;  %v1175_v38 = vsel %vm84_vm0, %v1171_v55, 0.0  ;;  %1190 = vst [vmem:[#allocation1] ss:$9 sm:$0xff] %v1186_v52 }
 0x4c6   :  { %v1176_v17 = vadd.f32 %v1175_v38, %v1174_v29  ;;  %1192 = vst [vmem:[#allocation1 + $0x1] ss:$9 sm:$0xff] %v1187_v48 }
 0x4c8   :  { %1177 = vadd.xlane.f32.xlu1 %v1176_v17 }
 0x4cd   :  { %v1193_v56 = vld [vmem:[#allocation1] sm:$0xff]  ;;  %v1194_v44 = vld [vmem:[#allocation1 + $0x9] sm:$0xff] }
 0x4ce   :  { %v1197_v41 = vsel %vm84_vm0, %v1193_v56, 0.0  ;;  %v1198_v57 = vsel %vm84_vm0, %v1194_v44, 0.0 }
 0x4cf   :  { %v1199_v10 = vadd.f32 %v1198_v57, %v1197_v41 }
 0x4d1   :  { %1200 = vadd.xlane.f32.xlu0 %v1199_v10 }
 0x517   :  { %v1002_v5 = vpop.xlane.xlu2 %1001 }
 0x518   :  { %v1003_v3 = vsel %vm84_vm0, %v1002_v5, 0.0 }
 0x519   :  { %v1004_v58 = vrot.slane %v1003_v3, 4 }
 0x51b   :  { %v1005_v60 = vadd.f32 %v1004_v58, %v1003_v3 }
 0x51d   :  { %v1006_v61 = vrot.slane %v1005_v60, 2 }
 0x51f   :  { %v1007_v7 = vadd.f32 %v1006_v61, %v1005_v60 }
 0x520   :  { %v1025_v54 = vpop.xlane.xlu0 %1024 }
 0x521   :  { %v1026_v45 = vsel %vm84_vm0, %v1025_v54, 0.0  ;;  %v1008_v9 = vrot.slane %v1007_v7, 1 }
 0x522   :  { %v1027_v62 = vrot.slane %v1026_v45, 4 }
 0x523   :  { %v1009_v20 = vadd.f32 %v1008_v9, %v1007_v7 }
 0x524   :  { %v1028_v0 = vadd.f32 %v1027_v62, %v1026_v45 }
 0x525   :  { %v2634_v50 = vmul.f32 0.0078125, %v1009_v20 }
 0x526   :  { %v1029_v42 = vrot.slane %v1028_v0, 2 }
 0x527   :  { %v1035_v40 = vmul.f32 %v2634_v50, %v2634_v50 }
 0x528   :  { %v1030_v6 = vadd.f32 %v1029_v42, %v1028_v0 }
 0x529   :  { %v1090_v8 = vpop.xlane.xlu1 %1089 }
 0x52a   :  { %v1091_v35 = vsel %vm84_vm0, %v1090_v8, 0.0  ;;  %v1031_v15 = vrot.slane %v1030_v6, 1 }
 0x52b   :  { %v1092_v13 = vrot.slane %v1091_v35, 4 }
 0x52c   :  { %v1032_v22 = vadd.f32 %v1031_v15, %v1030_v6 }
 0x52d   :  { %v1093_v19 = vadd.f32 %v1092_v13, %v1091_v35 }
 0x52e   :  { %v1034_v36 = vmul.f32 0.0078125, %v1032_v22 }
 0x52f   :  { %v1094_v21 = vrot.slane %v1093_v19, 2 }
 0x530   :  { %v1036_v31 = vsub.f32 %v1034_v36, %v1035_v40  ;;  %v1137_v40 = vstv %s1986_s8  ;;  %s2011_s8 = sld [smem:[#allocation2 + $0x39]] }
 0x531   :  { %v1095_v47 = vadd.f32 %v1094_v21, %v1093_v19 }
 0x532   :  { %v1113_v16 = vpop.xlane.xlu2 %1112  ;;  %v1038_v32 = vadd.f32 1e-05, %v1036_v31 }
 0x533   :  { %v1114_v24 = vsel %vm84_vm0, %v1113_v16, 0.0  ;;  %v1096_v51 = vrot.slane %v1095_v47, 1 }
 0x534   :  { %v1115_v30 = vrot.slane %v1114_v24, 4  ;;  %2058 = vrsqrt.f32 %v1038_v32  ;;  %vm1045_vm10 = vweird.f32 %v1038_v32 }
 0x535   :  { %v1097_v26 = vadd.f32 %v1096_v51, %v1095_v47 }
 0x536   :  { %v1116_v11 = vadd.f32 %v1115_v30, %v1114_v24  ;;  %v1049_v30 = vstv %s1981_s9  ;;  %s2012_s9 = sld [smem:[#allocation2 + $0x48]] }
 0x537   :  { %v2640_v52 = vmul.f32 0.0078125, %v1097_v26 }
 0x538   :  { %v1117_v34 = vrot.slane %v1116_v11, 2 }
 0x539   :  { %v1123_v38 = vmul.f32 %v2640_v52, %v2640_v52 }
 0x53a   :  { %v1118_v63 = vadd.f32 %v1117_v34, %v1116_v11  ;;  %v2059_v10 = vpop.eup %2058  ;;  %v1139_v34 = vsub.f32 %v2601_v28, %v2640_v52 }
 0x53b   :  { %v1178_v27 = vpop.xlane.xlu1 %1177  ;;  %v1040_v58 = vmul.f32 %v2059_v10, %v1038_v32  ;;  %vm1046_vm6 = vweird.f32 %v2059_v10  ;;  %v1051_v32 = vsub.f32 %v2587_v1, %v2634_v50 }
 0x53c   :  { %v1179_v46 = vsel %vm84_vm0, %v1178_v27, 0.0  ;;  %v1119_v48 = vrot.slane %v1118_v63, 1  ;;  %vm1047_vm5 = vmor %vm1045_vm10, %vm1046_vm6  ;;  %v1140_v27 = vsub.f32 %v2603_v59, %v2640_v52 }
 0x53d   :  { %v1180_v49 = vrot.slane %v1179_v46, 4  ;;  %v1041_v45 = vmul.f32 %v2059_v10, %v1040_v58 }
 0x53e   :  { %v1120_v55 = vadd.f32 %v1119_v48, %v1118_v63 }
 0x53f   :  { %v1181_v37 = vadd.f32 %v1180_v49, %v1179_v46  ;;  %v1042_v6 = vmul.f32 0.5, %v1041_v45  ;;  %v1052_v46 = vsub.f32 %v2589_v33, %v2634_v50 }
 0x540   :  { %v1122_v17 = vmul.f32 0.0078125, %v1120_v55  ;;  %v1144_v55 = vstv %s1987_s10  ;;  %s2016_s10 = sld [smem:[#allocation2 + $0x3a]] }
 0x541   :  { %v1182_v29 = vrot.slane %v1181_v37, 2  ;;  %v1043_v19 = vsub.f32 1.5, %v1042_v6 }
 0x542   :  { %v1124_v56 = vsub.f32 %v1122_v17, %v1123_v38 }
 0x543   :  { %v1183_v41 = vadd.f32 %v1182_v29, %v1181_v37  ;;  %v1044_v36 = vmul.f32 %v2059_v10, %v1043_v19 }
 0x544   :  { %v1201_v44 = vpop.xlane.xlu0 %1200  ;;  %v1126_v5 = vadd.f32 1e-05, %v1124_v56  ;;  %v1056_v56 = vstv %s1982_s11  ;;  %s2017_s11 = sld [smem:[#allocation2 + $0x49]] }
 0x545   :  { %v1202_v57 = vsel %vm84_vm0, %v1201_v44, 0.0  ;;  %v1184_v60 = vrot.slane %v1183_v41, 1  ;;  %v1048_v31 = vsel %vm1047_vm5, %v2059_v10, %v1044_v36 }
 0x546   :  { %v1203_v3 = vrot.slane %v1202_v57, 4  ;;  %2060 = vrsqrt.f32 %v1126_v5  ;;  %vm1133_vm8 = vweird.f32 %v1126_v5  ;;  %v1050_v26 = vmul.f32 %v1049_v30, %v1048_v31 }
 0x547   :  { %v1185_v61 = vadd.f32 %v1184_v60, %v1183_v41 }
 0x548   :  { %v1204_v54 = vadd.f32 %v1203_v3, %v1202_v57  ;;  %v1053_v29 = vmul.f32 %v1051_v32, %v1050_v26  ;;  %v1054_v38 = vmul.f32 %v1052_v46, %v1050_v26  ;;  %v1225_v57 = vstv %s1991_s12  ;;  %s2021_s12 = sld [smem:[#allocation2 + $0x3b]] }
 0x549   :  { %v2645_v9 = vmul.f32 0.0078125, %v1185_v61  ;;  %v1232_v61 = vstv %s2657_s13  ;;  %v1356_v32 = vstv %s2000_s19  ;;  %s2022_s13 = sld [smem:[#allocation2 + $0x4a]] }
 0x54a   :  { %v1205_v62 = vrot.slane %v1204_v54, 2  ;;  %v1057_v52 = vadd.f32 %v1056_v56, %v1053_v29  ;;  %v1058_v41 = vadd.f32 %v1056_v56, %v1054_v38  ;;  %s2032_s19 = sld [smem:[#allocation2 + $0x4d]] }
 0x54b   :  { %v1211_v21 = vmul.f32 %v2645_v9, %v2645_v9  ;;  %v1227_v58 = vsub.f32 %v2617_v12, %v2645_v9 }
 0x54c   :  { %v2061_v0 = vpop.eup %2060  ;;  %v1206_v42 = vadd.f32 %v1205_v62, %v1204_v54  ;;  %v1236_v3 = vadd.f32 %v1058_v41, %v2458_v23 }
 0x54d   :  { %v1128_v7 = vmul.f32 %v2061_v0, %v1126_v5  ;;  %vm1134_vm4 = vweird.f32 %v2061_v0  ;;  %v1235_v5 = vadd.f32 %v1057_v52, %v2451_v14 }
 0x54e   :  { %v1207_v35 = vrot.slane %v1206_v42, 1  ;;  %vm1135_vm9 = vmor %vm1133_vm8, %vm1134_vm4 }
 0x54f   :  { %v1129_v8 = vmul.f32 %v2061_v0, %v1128_v7  ;;  %v1237_v62 = vmax.f32 %v1235_v5, 0.0 }
 0x550   :  { %v1208_v15 = vadd.f32 %v1207_v35, %v1206_v42 }
 0x551   :  { %v1130_v13 = vmul.f32 0.5, %v1129_v8  ;;  %v1258_v8 = vstv %s2661_s14  ;;  %v2675_v35 = vmin.f32 %v1237_v62, 6.0  ;;  %s2879_s14 = sld [smem:[#allocation2 + $0x57]] }
 0x552   :  { %v1210_v22 = vmul.f32 0.0078125, %v1208_v15  ;;  %v1254_v15 = vstv %s1993_s15  ;;  %s2024_s15 = sld [smem:[#allocation2 + $0x4b]] }
 0x553   :  { %v1131_v20 = vsub.f32 1.5, %v1130_v13 }
 0x554   :  { %v1212_v16 = vsub.f32 %v1210_v22, %v1211_v21 }
 0x555   :  { %v1132_v47 = vmul.f32 %v2061_v0, %v1131_v20 }
 0x556   :  { %v1214_v24 = vadd.f32 1e-05, %v1212_v16  ;;  %v1255_v16 = vmul.f32 %v1254_v15, %v2675_v35 }
 0x557   :  { %v1136_v51 = vsel %vm1135_vm9, %v2061_v0, %v1132_v47  ;;  %v1238_v0 = vmax.f32 %v1236_v3, 0.0  ;;  %v1264_v47 = vstv %s1995_s16  ;;  %s2881_s16 = sld [smem:[#allocation2 + $0x58]] }
 0x558   :  { %2062 = vrsqrt.f32 %v1214_v24  ;;  %v1138_v11 = vmul.f32 %v1137_v40, %v1136_v51  ;;  %vm1221_vm11 = vweird.f32 %v1214_v24 }
 0x559   :  { %v2677_v13 = vmin.f32 %v1238_v0, 6.0 }
 0x55a   :  { %v1141_v49 = vmul.f32 %v1139_v34, %v1138_v11  ;;  %v1142_v48 = vmul.f32 %v1140_v27, %v1138_v11  ;;  %v1350_v27 = vstv %s1999_s17  ;;  %s2028_s17 = sld [smem:[#allocation2 + $0x4c]] }
 0x55b   :  { %v1256_v36 = vmul.f32 %v1254_v15, %v2677_v13 }
 0x55c   :  { %v1145_v28 = vadd.f32 %v1144_v55, %v1141_v49  ;;  %v1146_v44 = vadd.f32 %v1144_v55, %v1142_v48 }
 0x55e   :  { %v2063_v63 = vpop.eup %2062  ;;  %v1241_v33 = vadd.f32 %v1145_v28, %v2453_v39  ;;  %v1242_v50 = vadd.f32 %v1146_v44, %v2461_v25  ;;  %v1228_v25 = vsub.f32 %v2619_v43, %v2645_v9 }
 0x55f   :  { %v1216_v37 = vmul.f32 %v2063_v63, %v1214_v24  ;;  %vm1222_vm7 = vweird.f32 %v2063_v63 }
 0x560   :  { %vm1223_vm12 = vmor %vm1221_vm11, %vm1222_vm7  ;;  %v1243_v39 = vmax.f32 %v1241_v33, 0.0  ;;  %v1244_v54 = vmax.f32 %v1242_v50, 0.0 }
 0x561   :  { %v1217_v17 = vmul.f32 %v2063_v63, %v1216_v37 }
 0x562   :  { %v2670_v23 = vmin.f32 %v1243_v39, 6.0  ;;  %v2672_v42 = vmin.f32 %v1244_v54, 6.0  ;;  %v1442_v54 = vstv %s2004_s0  ;;  %s2885_s0 = sld [smem:[#allocation2 + $0x5a]] }
 0x563   :  { %v1218_v59 = vmul.f32 0.5, %v1217_v17 }
 0x564   :  { %v1259_v19 = vmul.f32 %v1258_v8, %v2670_v23  ;;  %v1260_v20 = vmul.f32 %v1258_v8, %v2672_v42  ;;  %v1351_v46 = vmul.f32 %v1350_v27, %v2670_v23  ;;  %v1352_v49 = vmul.f32 %v1350_v27, %v2672_v42 }
 0x565   :  { %v1219_v1 = vsub.f32 1.5, %v1218_v59  ;;  %v1444_v62 = vmul.f32 %v1442_v54, %v2672_v42 }
 0x566   :  { %v1261_v51 = vadd.f32 %v1259_v19, %v1255_v16 }
 0x567   :  { %v1220_v10 = vmul.f32 %v2063_v63, %v1219_v1 }
 0x569   :  { %v1224_v60 = vsel %vm1223_vm12, %v2063_v63, %v1220_v10  ;;  %v1346_v63 = vstv %s1998_s18  ;;  %s2883_s18 = sld [smem:[#allocation2 + $0x59]] }
 0x56a   :  { %v1226_v45 = vmul.f32 %v1225_v57, %v1224_v60  ;;  %v1347_v37 = vmul.f32 %v1346_v63, %v2675_v35  ;;  %v1348_v56 = vmul.f32 %v1346_v63, %v2677_v13 }
 0x56c   :  { %v1229_v14 = vmul.f32 %v1227_v58, %v1226_v45  ;;  %v1230_v7 = vmul.f32 %v1228_v25, %v1226_v45  ;;  %v1353_v52 = vadd.f32 %v1351_v46, %v1347_v37  ;;  %v1354_v1 = vadd.f32 %v1352_v49, %v1348_v56 }
 0x56d   :  { %v1438_v25 = vstv %s2003_s20  ;;  %v1448_v45 = vstv %s2005_s21  ;;  %s2036_s20 = sld [smem:[#allocation2 + $0x4e]] }
 0x56e   :  { %v1233_v6 = vadd.f32 %v1232_v61, %v1229_v14  ;;  %v1234_v12 = vadd.f32 %v1232_v61, %v1230_v7  ;;  %v1443_v61 = vmul.f32 %v1442_v54, %v2670_v23  ;;  %v1439_v14 = vmul.f32 %v1438_v25, %v2675_v35  ;;  %s2025_s21 = sld [smem:[#allocation2 + $0x4f]] }
 0x570   :  { %v1247_v43 = vadd.f32 %v1233_v6, %v2472_v18  ;;  %v1248_v9 = vadd.f32 %v1234_v12, %v2476_v2  ;;  %v1262_v18 = vadd.f32 %v1260_v20, %v1256_v36  ;;  %v1445_v20 = vadd.f32 %v1443_v61, %v1439_v14 }
 0x572   :  { %v1249_v21 = vmax.f32 %v1247_v43, 0.0  ;;  %v1250_v22 = vmax.f32 %v1248_v9, 0.0  ;;  %v1440_v43 = vmul.f32 %v1438_v25, %v2677_v13 }
 0x574   :  { %v2685_v24 = vmin.f32 %v1249_v21, 6.0  ;;  %v2687_v40 = vmin.f32 %v1250_v22, 6.0  ;;  %v1446_v22 = vadd.f32 %v1444_v62, %v1440_v43 }
 0x576   :  { %v1265_v2 = vmul.f32 %v1264_v47, %v2685_v24  ;;  %v1266_v30 = vmul.f32 %v1264_v47, %v2687_v40  ;;  %v1357_v29 = vmul.f32 %v1356_v32, %v2685_v24  ;;  %v1358_v28 = vmul.f32 %v1356_v32, %v2687_v40 }
 0x577   :  { %v1449_v6 = vmul.f32 %v1448_v45, %v2685_v24  ;;  %v1450_v9 = vmul.f32 %v1448_v45, %v2687_v40 }
 0x578   :  { %v2691_v31 = vadd.f32 %v1265_v2, %v1261_v51  ;;  %v2693_v11 = vadd.f32 %v1266_v30, %v1262_v18  ;;  %v2707_v33 = vadd.f32 %v1357_v29, %v1353_v52  ;;  %v2709_v50 = vadd.f32 %v1358_v28, %v1354_v1 }
 0x579   :  { %v2725_v47 = vadd.f32 %v1449_v6, %v1445_v20  ;;  %v2727_v16 = vadd.f32 %v1450_v9, %v1446_v22 }
 0x57a   :  { %v1269_v26 = vmul.f32 %v2691_v31, %v2480_v4  ;;  %v1270_v34 = vmul.f32 %v2693_v11, %v2482_v53  ;;  %v1361_v57 = vmul.f32 %v2707_v33, %v2480_v4  ;;  %v1362_v10 = vmul.f32 %v2709_v50, %v2482_v53 }
 0x57b   :  { %v1453_v36 = vmul.f32 %v2725_v47, %v2480_v4  ;;  %v1454_v51 = vmul.f32 %v2727_v16, %v2482_v53 }
 0x57c   :  { %1273 = vst [vmem:[#allocation1] ss:$9 sm:$0xff] %v1269_v26  ;;  %v1292_v48 = vmul.f32 %v1269_v26, %v1269_v26  ;;  %v1293_v55 = vmul.f32 %v1270_v34, %v1270_v34  ;;  %v1384_v0 = vmul.f32 %v1361_v57, %v1361_v57  ;;  %v1385_v7 = vmul.f32 %v1362_v10, %v1362_v10 }
 0x57d   :  { %1275 = vst [vmem:[#allocation1 + $0x1] ss:$9 sm:$0xff] %v1270_v34  ;;  %v1476_v27 = vmul.f32 %v1453_v36, %v1453_v36  ;;  %v1477_v63 = vmul.f32 %v1454_v51, %v1454_v51 }
 0x584   :  { %v1276_v38 = vld [vmem:[#allocation1] sm:$0xff]  ;;  %v1277_v17 = vld [vmem:[#allocation1 + $0x9] sm:$0xff] }
 0x585   :  { %v1280_v44 = vsel %vm84_vm0, %v1276_v38, 0.0  ;;  %v1281_v59 = vsel %vm84_vm0, %v1277_v17, 0.0  ;;  %1296 = vst [vmem:[#allocation1] ss:$9 sm:$0xff] %v1292_v48 }
 0x586   :  { %v1282_v41 = vadd.f32 %v1281_v59, %v1280_v44  ;;  %1298 = vst [vmem:[#allocation1 + $0x1] ss:$9 sm:$0xff] %v1293_v55 }
 0x588   :  { %1283 = vadd.xlane.f32.xlu2 %v1282_v41 }
 0x58d   :  { %v1299_v5 = vld [vmem:[#allocation1] sm:$0xff]  ;;  %v1300_v3 = vld [vmem:[#allocation1 + $0x9] sm:$0xff] }
 0x58e   :  { %v1303_v58 = vsel %vm84_vm0, %v1299_v5, 0.0  ;;  %v1304_v60 = vsel %vm84_vm0, %v1300_v3, 0.0  ;;  %1365 = vst [vmem:[#allocation1] ss:$9 sm:$0xff] %v1361_v57 }
 0x58f   :  { %v1305_v39 = vadd.f32 %v1304_v60, %v1303_v58  ;;  %1367 = vst [vmem:[#allocation1 + $0x1] ss:$9 sm:$0xff] %v1362_v10 }
 0x591   :  { %1306 = vadd.xlane.f32.xlu0 %v1305_v39 }
 0x596   :  { %v1368_v12 = vld [vmem:[#allocation1] sm:$0xff]  ;;  %v1369_v8 = vld [vmem:[#allocation1 + $0x9] sm:$0xff] }
 0x597   :  { %v1372_v15 = vsel %vm84_vm0, %v1368_v12, 0.0  ;;  %v1373_v19 = vsel %vm84_vm0, %v1369_v8, 0.0  ;;  %1388 = vst [vmem:[#allocation1] ss:$9 sm:$0xff] %v1384_v0 }
 0x598   :  { %v1374_v21 = vadd.f32 %v1373_v19, %v1372_v15  ;;  %1390 = vst [vmem:[#allocation1 + $0x1] ss:$9 sm:$0xff] %v1385_v7 }
 0x59a   :  { %1375 = vadd.xlane.f32.xlu1 %v1374_v21 }
 0x59f   :  { %v1391_v18 = vld [vmem:[#allocation1] sm:$0xff]  ;;  %v1392_v2 = vld [vmem:[#allocation1 + $0x9] sm:$0xff] }
 0x5a0   :  { %v1395_v30 = vsel %vm84_vm0, %v1391_v18, 0.0  ;;  %v1396_v26 = vsel %vm84_vm0, %v1392_v2, 0.0  ;;  %1457 = vst [vmem:[#allocation1] ss:$9 sm:$0xff] %v1453_v36 }
 0x5a1   :  { %v1397_v34 = vadd.f32 %v1396_v26, %v1395_v30  ;;  %1459 = vst [vmem:[#allocation1 + $0x1] ss:$9 sm:$0xff] %v1454_v51 }
 0x5a3   :  { %1398 = vadd.xlane.f32.xlu2 %v1397_v34 }
 0x5a8   :  { %v1460_v32 = vld [vmem:[#allocation1] sm:$0xff]  ;;  %v1461_v46 = vld [vmem:[#allocation1 + $0x9] sm:$0xff] }
 0x5a9   :  { %v1464_v49 = vsel %vm84_vm0, %v1460_v32, 0.0  ;;  %v1465_v48 = vsel %vm84_vm0, %v1461_v46, 0.0  ;;  %1480 = vst [vmem:[#allocation1] ss:$9 sm:$0xff] %v1476_v27 }
 0x5aa   :  { %v1466_v37 = vadd.f32 %v1465_v48, %v1464_v49  ;;  %1482 = vst [vmem:[#allocation1 + $0x1] ss:$9 sm:$0xff] %v1477_v63 }
 0x5ac   :  { %1467 = vadd.xlane.f32.xlu1 %v1466_v37 }
 0x5b1   :  { %v1483_v55 = vld [vmem:[#allocation1] sm:$0xff]  ;;  %v1484_v29 = vld [vmem:[#allocation1 + $0x9] sm:$0xff] }
 0x5b2   :  { %v1487_v38 = vsel %vm84_vm0, %v1483_v55, 0.0  ;;  %v1488_v17 = vsel %vm84_vm0, %v1484_v29, 0.0 }
 0x5b3   :  { %v1489_v56 = vadd.f32 %v1488_v17, %v1487_v38 }
 0x5b5   :  { %1490 = vadd.xlane.f32.xlu0 %v1489_v56 }
 0x5fb   :  { %v1284_v28 = vpop.xlane.xlu2 %1283 }
 0x5fc   :  { %v1285_v44 = vsel %vm84_vm0, %v1284_v28, 0.0 }
 0x5fd   :  { %v1286_v59 = vrot.slane %v1285_v44, 4 }
 0x5ff   :  { %v1287_v52 = vadd.f32 %v1286_v59, %v1285_v44 }
 0x601   :  { %v1288_v10 = vrot.slane %v1287_v52, 2 }
 0x603   :  { %v1289_v58 = vadd.f32 %v1288_v10, %v1287_v52 }
 0x604   :  { %v1307_v41 = vpop.xlane.xlu0 %1306 }
 0x605   :  { %v1308_v1 = vsel %vm84_vm0, %v1307_v41, 0.0  ;;  %v1290_v45 = vrot.slane %v1289_v58, 1 }
 0x606   :  { %v1309_v57 = vrot.slane %v1308_v1, 4 }
 0x607   :  { %v1291_v14 = vadd.f32 %v1290_v45, %v1289_v58 }
 0x608   :  { %v1310_v5 = vadd.f32 %v1309_v57, %v1308_v1 }
 0x609   :  { %v2743_v43 = vmul.f32 0.0078125, %v1291_v14 }
 0x60a   :  { %v1311_v3 = vrot.slane %v1310_v5, 2 }
 0x60b   :  { %v1317_v21 = vmul.f32 %v2743_v43, %v2743_v43 }
 0x60c   :  { %v1312_v39 = vadd.f32 %v1311_v3, %v1310_v5 }
 0x60d   :  { %v1376_v60 = vpop.xlane.xlu1 %1375 }
 0x60e   :  { %v1377_v54 = vsel %vm84_vm0, %v1376_v60, 0.0  ;;  %v1313_v62 = vrot.slane %v1312_v39, 1 }
 0x60f   :  { %v1378_v25 = vrot.slane %v1377_v54, 4 }
 0x610   :  { %v1314_v6 = vadd.f32 %v1313_v62, %v1312_v39 }
 0x611   :  { %v1379_v61 = vadd.f32 %v1378_v25, %v1377_v54 }
 0x612   :  { %v1316_v19 = vmul.f32 0.0078125, %v1314_v6 }
 0x613   :  { %v1380_v0 = vrot.slane %v1379_v61, 2 }
 0x614   :  { %v1318_v51 = vsub.f32 %v1316_v19, %v1317_v21 }
 0x615   :  { %v1381_v7 = vadd.f32 %v1380_v0, %v1379_v61 }
 0x616   :  { %v1399_v12 = vpop.xlane.xlu2 %1398  ;;  %v1320_v63 = vadd.f32 1e-05, %v1318_v51 }
 0x617   :  { %v1400_v8 = vsel %vm84_vm0, %v1399_v12, 0.0  ;;  %v1382_v9 = vrot.slane %v1381_v7, 1 }
 0x618   :  { %v1401_v15 = vrot.slane %v1400_v8, 4  ;;  %2064 = vrsqrt.f32 %v1320_v63  ;;  %vm1327_vm3 = vweird.f32 %v1320_v63 }
 0x619   :  { %v1383_v22 = vadd.f32 %v1382_v9, %v1381_v7 }
 0x61a   :  { %v1402_v20 = vadd.f32 %v1401_v15, %v1400_v8  ;;  %v1423_v15 = vstv %s2001_s22  ;;  %s2029_s22 = sld [smem:[#allocation2 + $0x50]] }
 0x61b   :  { %v2747_v30 = vmul.f32 0.0078125, %v1383_v22 }
 0x61c   :  { %v1403_v36 = vrot.slane %v1402_v20, 2 }
 0x61d   :  { %v1409_v49 = vmul.f32 %v2747_v30, %v2747_v30 }
 0x61e   :  { %v1404_v18 = vadd.f32 %v1403_v36, %v1402_v20  ;;  %v2065_v28 = vpop.eup %2064  ;;  %v1331_v20 = vstv %s1996_s23  ;;  %s2033_s23 = sld [smem:[#allocation2 + $0x51]] }
 0x61f   :  { %v1468_v2 = vpop.xlane.xlu1 %1467  ;;  %v1322_v41 = vmul.f32 %v2065_v28, %v1320_v63  ;;  %vm1328_vm15 = vweird.f32 %v2065_v28 }
 0x620   :  { %v1405_v26 = vrot.slane %v1404_v18, 1  ;;  %v1469_v34 = vsel %vm84_vm0, %v1468_v2, 0.0  ;;  %vm1329_vm4 = vmor %vm1327_vm3, %vm1328_vm15  ;;  %v1426_v2 = vsub.f32 %v2709_v50, %v2747_v30  ;;  %vm1921_vm3 = vcmask 23552  }
 0x621   :  { %v1470_v27 = vrot.slane %v1469_v34, 4  ;;  %v1323_v58 = vmul.f32 %v2065_v28, %v1322_v41 }
 0x622   :  { %v1406_v32 = vadd.f32 %v1405_v26, %v1404_v18  ;;  %v1425_v18 = vsub.f32 %v2707_v33, %v2747_v30  ;;  %v1338_v33 = vstv %s1997_s25  ;;  %s2889_s25 = sld [smem:[#allocation2 + $0x53]] }
 0x623   :  { %v1471_v46 = vadd.f32 %v1470_v27, %v1469_v34  ;;  %v1324_v45 = vmul.f32 0.5, %v1323_v58  ;;  %v1333_v34 = vsub.f32 %v2691_v31, %v2743_v43  ;;  %v1334_v27 = vsub.f32 %v2693_v11, %v2743_v43 }
 0x624   :  { %v1408_v48 = vmul.f32 0.0078125, %v1406_v32  ;;  %v1515_v43 = vstv %s2761_s26  ;;  %s2891_s26 = sld [smem:[#allocation2 + $0x54]] }
 0x625   :  { %v1472_v37 = vrot.slane %v1471_v46, 2  ;;  %v1325_v7 = vsub.f32 1.5, %v1324_v45 }
 0x626   :  { %v1410_v55 = vsub.f32 %v1408_v48, %v1409_v49 }
 0x627   :  { %v1473_v17 = vadd.f32 %v1472_v37, %v1471_v46  ;;  %v1326_v9 = vmul.f32 %v2065_v28, %v1325_v7  ;;  %v1430_v46 = vstv %s2002_s24  ;;  %s2887_s24 = sld [smem:[#allocation2 + $0x52]] }
 0x628   :  { %v1412_v29 = vadd.f32 1e-05, %v1410_v55  ;;  %v1491_v38 = vpop.xlane.xlu0 %1490 }
 0x629   :  { %v1492_v56 = vsel %vm84_vm0, %v1491_v38, 0.0  ;;  %v1474_v59 = vrot.slane %v1473_v17, 1  ;;  %v1330_v21 = vsel %vm1329_vm4, %v2065_v28, %v1326_v9  ;;  %vm1923_vm4 = vcmask 25600  }
 0x62a   :  { %2066 = vrsqrt.f32 %v1412_v29  ;;  %v1493_v44 = vrot.slane %v1492_v56, 4  ;;  %vm1419_vm1 = vweird.f32 %v1412_v29  ;;  %v1332_v51 = vmul.f32 %v1331_v20, %v1330_v21 }
 0x62b   :  { %v1475_v5 = vadd.f32 %v1474_v59, %v1473_v17 }
 0x62c   :  { %v1494_v52 = vadd.f32 %v1493_v44, %v1492_v56  ;;  %v1335_v48 = vmul.f32 %v1333_v34, %v1332_v51  ;;  %v1336_v37 = vmul.f32 %v1334_v27, %v1332_v51 }
 0x62d   :  { %v2753_v54 = vmul.f32 0.0078125, %v1475_v5 }
 0x62e   :  { %v1495_v57 = vrot.slane %v1494_v52, 2  ;;  %v1339_v31 = vadd.f32 %v1338_v33, %v1335_v48  ;;  %v1340_v11 = vadd.f32 %v1338_v33, %v1336_v37 }
 0x62f   :  { %v1501_v0 = vmul.f32 %v2753_v54, %v2753_v54  ;;  %v1517_v28 = vsub.f32 %v2725_v47, %v2753_v54  ;;  %v1518_v41 = vsub.f32 %v2727_v16, %v2753_v54 }
 0x630   :  { %v2067_v1 = vpop.eup %2066  ;;  %v1496_v3 = vadd.f32 %v1495_v57, %v1494_v52  ;;  %v1341_v59 = vmax.f32 %v1339_v31, 0.0  ;;  %v1342_v52 = vmax.f32 %v1340_v11, 0.0  ;;  %v1522_v57 = vstv %s2767_s1  ;;  %s2893_s1 = sld [smem:[#allocation2 + $0x55]] }
 0x631   :  { %v1414_v10 = vmul.f32 %v2067_v1, %v1412_v29  ;;  %vm1420_vm13 = vweird.f32 %v2067_v1 }
 0x632   :  { %v1497_v25 = vrot.slane %v1496_v3, 1  ;;  %vm1421_vm2 = vmor %vm1419_vm1, %vm1420_vm13  ;;  %v2786_v47 = vmin.f32 %v1342_v52, 6.0 }
 0x633   :  { %v1415_v60 = vmul.f32 %v2067_v1, %v1414_v10 }
 0x634   :  { %v1498_v61 = vadd.f32 %v1497_v25, %v1496_v3 }
 0x635   :  { %v1416_v39 = vmul.f32 0.5, %v1415_v60  ;;  %v1534_v60 = vstv %s2769_s27  ;;  %s2895_s27 = sld [smem:[#allocation2 + $0x56]] }
 0x636   :  { %v1500_v14 = vmul.f32 0.0078125, %v1498_v61  ;;  %v1530_v61 = vstv %s2771_s28  ;;  %s2122_s28 = smov [#allocation5]  }
 0x637   :  { %v1417_v62 = vsub.f32 1.5, %v1416_v39  ;;  %v2784_v39 = vmin.f32 %v1341_v59, 6.0 }
 0x638   :  { %v1502_v6 = vsub.f32 %v1500_v14, %v1501_v0  ;;  %v1540_v14 = vstv %s2010_s29  ;;  %s1930_s29 = sshll.u32 %s2122_s28, 4  ;;  %s1931_s29 = int_to_ptr.vmem [resolvable:$true] %s1930_s29 }
 0x639   :  { %v1418_v12 = vmul.f32 %v2067_v1, %v1417_v62  ;;  %v1531_v7 = vmul.f32 %v1530_v61, %v2784_v39 }
 0x63a   :  { %v1504_v8 = vadd.f32 1e-05, %v1502_v6  ;;  %v1532_v6 = vmul.f32 %v1530_v61, %v2786_v47 }
 0x63b   :  { %v1422_v19 = vsel %vm1421_vm2, %v2067_v1, %v1418_v12 }
 0x63c   :  { %2068 = vrsqrt.f32 %v1504_v8  ;;  %v1424_v22 = vmul.f32 %v1423_v15, %v1422_v19  ;;  %vm1511_vm8 = vweird.f32 %v1504_v8 }
 0x63e   :  { %v1427_v63 = vmul.f32 %v1425_v18, %v1424_v22  ;;  %v1428_v32 = vmul.f32 %v1426_v2, %v1424_v22  ;;  %v1622_v18 = vstv %s2014_s30  ;;  %v1618_v2 = vstv %s2013_s3 }
 0x63f   :  { %v1620_v33 = vmul.f32 %v1618_v2, %v2786_v47 }
 0x640   :  { %v1431_v30 = vadd.f32 %v1430_v46, %v1427_v63  ;;  %v1432_v55 = vadd.f32 %v1430_v46, %v1428_v32  ;;  %v1619_v32 = vmul.f32 %v1618_v2, %v2784_v39 }
 0x642   :  { %v2069_v36 = vpop.eup %2068  ;;  %v1433_v17 = vmax.f32 %v1431_v30, 0.0  ;;  %v1434_v56 = vmax.f32 %v1432_v55, 0.0 }
 0x643   :  { %v1506_v26 = vmul.f32 %v2069_v36, %v1504_v8  ;;  %vm1512_vm6 = vweird.f32 %v2069_v36 }
 0x644   :  { %vm1513_vm9 = vmor %vm1511_vm8, %vm1512_vm6  ;;  %v2779_v10 = vmin.f32 %v1433_v17, 6.0  ;;  %v2781_v5 = vmin.f32 %v1434_v56, 6.0 }
 0x645   :  { %v1507_v49 = vmul.f32 %v2069_v36, %v1506_v26  ;;  %v1628_v26 = vstv %s2015_s4  ;;  %s1932_s4 = sshll.u32 %s2912_s2, 4  ;;  %s1933_s4 = int_to_ptr.hbm [resolvable:$true] %s1932_s4 }
 0x646   :  { %v1535_v62 = vmul.f32 %v1534_v60, %v2779_v10  ;;  %v1536_v16 = vmul.f32 %v1534_v60, %v2781_v5  ;;  %v1623_v34 = vmul.f32 %v1622_v18, %v2779_v10  ;;  %v1624_v27 = vmul.f32 %v1622_v18, %v2781_v5 }
 0x647   :  { %v1508_v50 = vmul.f32 0.5, %v1507_v49 }
 0x648   :  { %v1537_v9 = vadd.f32 %v1535_v62, %v1531_v7  ;;  %v1538_v15 = vadd.f32 %v1536_v16, %v1532_v6  ;;  %v1626_v11 = vadd.f32 %v1624_v27, %v1620_v33 }
 0x649   :  { %v1509_v29 = vsub.f32 1.5, %v1508_v50 }
 0x64b   :  { %v1510_v38 = vmul.f32 %v2069_v36, %v1509_v29  ;;  %v1625_v29 = vadd.f32 %v1623_v34, %v1619_v32 }
 0x64d   :  { %v1514_v44 = vsel %vm1513_vm9, %v2069_v36, %v1510_v38 }
 0x64e   :  { %v1516_v1 = vmul.f32 %v1515_v43, %v1514_v44 }
 0x650   :  { %v1519_v3 = vmul.f32 %v1517_v28, %v1516_v1  ;;  %v1520_v58 = vmul.f32 %v1518_v41, %v1516_v1  ;;  %v1710_v1 = vstv %s2019_s5 }
 0x651   :  { %v1712_v60 = vmul.f32 %v1710_v1, %v2781_v5 }
 0x652   :  { %v1523_v25 = vadd.f32 %v1522_v57, %v1519_v3  ;;  %v1524_v45 = vadd.f32 %v1522_v57, %v1520_v58  ;;  %v1706_v57 = vstv %s2018_s6  ;;  %v1716_v3 = vstv %s2020_s7 }
 0x653   :  { %v1711_v58 = vmul.f32 %v1710_v1, %v2779_v10 }
 0x654   :  { %v1525_v54 = vmax.f32 %v1523_v25, 0.0  ;;  %v1526_v0 = vmax.f32 %v1524_v45, 0.0  ;;  %v1707_v45 = vmul.f32 %v1706_v57, %v2784_v39 }
 0x656   :  { %v1527_v12 = vmin.f32 %v1525_v54, 6.0  ;;  %v1528_v8 = vmin.f32 %v1526_v0, 6.0  ;;  %v1708_v0 = vmul.f32 %v1706_v57, %v2786_v47 }
 0x658   :  { %v1541_v19 = vmul.f32 %v1540_v14, %v1527_v12  ;;  %v1542_v20 = vmul.f32 %v1540_v14, %v1528_v8  ;;  %v1629_v49 = vmul.f32 %v1628_v26, %v1527_v12  ;;  %v1630_v50 = vmul.f32 %v1628_v26, %v1528_v8 }
 0x659   :  { %v1717_v62 = vmul.f32 %v1716_v3, %v1527_v12  ;;  %v1718_v14 = vmul.f32 %v1716_v3, %v1528_v8  ;;  %v1714_v10 = vadd.f32 %v1712_v60, %v1708_v0 }
 0x65a   :  { %v2793_v21 = vadd.f32 %v1541_v19, %v1537_v9  ;;  %v2795_v22 = vadd.f32 %v1542_v20, %v1538_v15  ;;  %v2807_v43 = vadd.f32 %v1629_v49, %v1625_v29  ;;  %v2809_v38 = vadd.f32 %v1630_v50, %v1626_v11 }
 0x65b   :  { %v1713_v9 = vadd.f32 %v1711_v58, %v1707_v45  ;;  %v2825_v39 = vadd.f32 %v1718_v14, %v1714_v10 }
 0x65c   :  { %v1545_v36 = vmul.f32 %v2793_v21, %v2480_v4  ;;  %v1546_v51 = vmul.f32 %v2795_v22, %v2482_v53  ;;  %v1633_v17 = vmul.f32 %v2807_v43, %v2480_v4  ;;  %v1634_v56 = vmul.f32 %v2809_v38, %v2482_v53 }
 0x65d   :  { %v2823_v5 = vadd.f32 %v1717_v62, %v1713_v9  ;;  %v1722_v47 = vmul.f32 %v2825_v39, %v2482_v53 }
 0x65e   :  { %1549 = vst [vmem:[#allocation1] ss:$9 sm:$0xff] %v1545_v36  ;;  %v1568_v63 = vmul.f32 %v1545_v36, %v1545_v36  ;;  %v1569_v46 = vmul.f32 %v1546_v51, %v1546_v51  ;;  %v1656_v25 = vmul.f32 %v1633_v17, %v1633_v17  ;;  %v1657_v61 = vmul.f32 %v1634_v56, %v1634_v56 }
 0x65f   :  { %1551 = vst [vmem:[#allocation1 + $0x1] ss:$9 sm:$0xff] %v1546_v51  ;;  %v1721_v12 = vmul.f32 %v2823_v5, %v2480_v4  ;;  %v1745_v2 = vmul.f32 %v1722_v47, %v1722_v47 }
 0x661   :  { %v1744_v18 = vmul.f32 %v1721_v12, %v1721_v12 }
 0x666   :  { %v1552_v48 = vld [vmem:[#allocation1] sm:$0xff]  ;;  %v1553_v37 = vld [vmem:[#allocation1 + $0x9] sm:$0xff] }
 0x667   :  { %v1556_v30 = vsel %vm84_vm0, %v1552_v48, 0.0  ;;  %v1557_v55 = vsel %vm84_vm0, %v1553_v37, 0.0  ;;  %1572 = vst [vmem:[#allocation1] ss:$9 sm:$0xff] %v1568_v63 }
 0x668   :  { %v1558_v31 = vadd.f32 %v1557_v55, %v1556_v30  ;;  %1574 = vst [vmem:[#allocation1 + $0x1] ss:$9 sm:$0xff] %v1569_v46 }
 0x66a   :  { %1559 = vadd.xlane.f32.xlu2 %v1558_v31 }
 0x66f   :  { %v1575_v28 = vld [vmem:[#allocation1] sm:$0xff]  ;;  %v1576_v44 = vld [vmem:[#allocation1 + $0x9] sm:$0xff] }
 0x670   :  { %v1579_v59 = vsel %vm84_vm0, %v1575_v28, 0.0  ;;  %v1580_v52 = vsel %vm84_vm0, %v1576_v44, 0.0  ;;  %1637 = vst [vmem:[#allocation1] ss:$9 sm:$0xff] %v1633_v17 }
 0x671   :  { %v1581_v41 = vadd.f32 %v1580_v52, %v1579_v59  ;;  %1639 = vst [vmem:[#allocation1 + $0x1] ss:$9 sm:$0xff] %v1634_v56 }
 0x673   :  { %1582 = vadd.xlane.f32.xlu1 %v1581_v41 }
 0x678   :  { %v1640_v16 = vld [vmem:[#allocation1] sm:$0xff]  ;;  %v1641_v54 = vld [vmem:[#allocation1 + $0x9] sm:$0xff] }
 0x679   :  { %v1644_v7 = vsel %vm84_vm0, %v1640_v16, 0.0  ;;  %v1645_v6 = vsel %vm84_vm0, %v1641_v54, 0.0  ;;  %1660 = vst [vmem:[#allocation1] ss:$9 sm:$0xff] %v1656_v25 }
 0x67a   :  { %v1646_v15 = vadd.f32 %v1645_v6, %v1644_v7  ;;  %1662 = vst [vmem:[#allocation1 + $0x1] ss:$9 sm:$0xff] %v1657_v61 }
 0x67c   :  { %1647 = vadd.xlane.f32.xlu0 %v1646_v15 }
 0x681   :  { %v1663_v8 = vld [vmem:[#allocation1] sm:$0xff]  ;;  %v1664_v19 = vld [vmem:[#allocation1 + $0x9] sm:$0xff] }
 0x682   :  { %v1667_v20 = vsel %vm84_vm0, %v1663_v8, 0.0  ;;  %v1668_v36 = vsel %vm84_vm0, %v1664_v19, 0.0  ;;  %1725 = vst [vmem:[#allocation1] ss:$9 sm:$0xff] %v1721_v12 }
 0x683   :  { %v1669_v51 = vadd.f32 %v1668_v36, %v1667_v20  ;;  %1727 = vst [vmem:[#allocation1 + $0x1] ss:$9 sm:$0xff] %v1722_v47 }
 0x685   :  { %1670 = vadd.xlane.f32.xlu2 %v1669_v51 }
 0x68a   :  { %v1728_v26 = vld [vmem:[#allocation1] sm:$0xff]  ;;  %v1729_v34 = vld [vmem:[#allocation1 + $0x9] sm:$0xff] }
 0x68b   :  { %v1732_v27 = vsel %vm84_vm0, %v1728_v26, 0.0  ;;  %v1733_v63 = vsel %vm84_vm0, %v1729_v34, 0.0  ;;  %1748 = vst [vmem:[#allocation1] ss:$9 sm:$0xff] %v1744_v18 }
 0x68c   :  { %v1734_v32 = vadd.f32 %v1733_v63, %v1732_v27  ;;  %1750 = vst [vmem:[#allocation1 + $0x1] ss:$9 sm:$0xff] %v1745_v2 }
 0x68e   :  { %1735 = vadd.xlane.f32.xlu1 %v1734_v32 }
 0x693   :  { %v1751_v46 = vld [vmem:[#allocation1] sm:$0xff]  ;;  %v1752_v49 = vld [vmem:[#allocation1 + $0x9] sm:$0xff] }
 0x694   :  { %v1755_v48 = vsel %vm84_vm0, %v1751_v46, 0.0  ;;  %v1756_v37 = vsel %vm84_vm0, %v1752_v49, 0.0 }
 0x695   :  { %v1757_v33 = vadd.f32 %v1756_v37, %v1755_v48 }
 0x697   :  { %1758 = vadd.xlane.f32.xlu0 %v1757_v33 }
 0x6dd   :  { %v1560_v50 = vpop.xlane.xlu2 %1559 }
 0x6de   :  { %v1561_v30 = vsel %vm84_vm0, %v1560_v50, 0.0 }
 0x6df   :  { %v1562_v55 = vrot.slane %v1561_v30, 4 }
 0x6e1   :  { %v1563_v29 = vadd.f32 %v1562_v55, %v1561_v30  ;;  %v1607_v30 = vstv %s2011_s8 }
 0x6e3   :  { %v1564_v31 = vrot.slane %v1563_v29, 2 }
 0x6e5   :  { %v1565_v11 = vadd.f32 %v1564_v31, %v1563_v29 }
 0x6e6   :  { %v1583_v17 = vpop.xlane.xlu1 %1582 }
 0x6e7   :  { %v1584_v56 = vsel %vm84_vm0, %v1583_v17, 0.0  ;;  %v1566_v28 = vrot.slane %v1565_v11, 1 }
 0x6e8   :  { %v1585_v44 = vrot.slane %v1584_v56, 4 }
 0x6e9   :  { %v1567_v52 = vadd.f32 %v1566_v28, %v1565_v11 }
 0x6ea   :  { %v1586_v59 = vadd.f32 %v1585_v44, %v1584_v56 }
 0x6eb   :  { %v1591_v3 = vmul.f32 0.0078125, %v1567_v52 }
 0x6ec   :  { %v1587_v41 = vrot.slane %v1586_v59, 2 }
 0x6ed   :  { %v1593_v16 = vmul.f32 %v1591_v3, %v1591_v3  ;;  %v1609_v17 = vsub.f32 %v2793_v21, %v1591_v3  ;;  %v1610_v56 = vsub.f32 %v2795_v22, %v1591_v3 }
 0x6ee   :  { %v1588_v1 = vadd.f32 %v1587_v41, %v1586_v59 }
 0x6ef   :  { %v1648_v57 = vpop.xlane.xlu0 %1647 }
 0x6f0   :  { %v1589_v58 = vrot.slane %v1588_v1, 1  ;;  %v1649_v60 = vsel %vm84_vm0, %v1648_v57, 0.0 }
 0x6f1   :  { %v1650_v25 = vrot.slane %v1649_v60, 4 }
 0x6f2   :  { %v1590_v45 = vadd.f32 %v1589_v58, %v1588_v1  ;;  %v1614_v1 = vstv %s2012_s9 }
 0x6f3   :  { %v1651_v61 = vadd.f32 %v1650_v25, %v1649_v60 }
 0x6f4   :  { %v1592_v62 = vmul.f32 0.0078125, %v1590_v45 }
 0x6f5   :  { %v1652_v54 = vrot.slane %v1651_v61, 2 }
 0x6f6   :  { %v1594_v0 = vsub.f32 %v1592_v62, %v1593_v16 }
 0x6f7   :  { %v1653_v14 = vadd.f32 %v1652_v54, %v1651_v61 }
 0x6f8   :  { %v1596_v7 = vadd.f32 1e-05, %v1594_v0  ;;  %v1671_v6 = vpop.xlane.xlu2 %1670 }
 0x6f9   :  { %v1672_v9 = vsel %vm84_vm0, %v1671_v6, 0.0  ;;  %v1654_v15 = vrot.slane %v1653_v14, 1 }
 0x6fa   :  { %2070 = vrsqrt.f32 %v1596_v7  ;;  %v1673_v10 = vrot.slane %v1672_v9, 4  ;;  %vm1603_vm5 = vweird.f32 %v1596_v7 }
 0x6fb   :  { %v1655_v47 = vadd.f32 %v1654_v15, %v1653_v14 }
 0x6fc   :  { %v1674_v12 = vadd.f32 %v1673_v10, %v1672_v9 }
 0x6fd   :  { %v2841_v18 = vmul.f32 0.0078125, %v1655_v47 }
 0x6fe   :  { %v1675_v8 = vrot.slane %v1674_v12, 2 }
 0x6ff   :  { %v1681_v49 = vmul.f32 %v2841_v18, %v2841_v18 }
 0x700   :  { %v2071_v19 = vpop.eup %2070  ;;  %v1676_v20 = vadd.f32 %v1675_v8, %v1674_v12 }
 0x701   :  { %v1598_v36 = vmul.f32 %v2071_v19, %v1596_v7  ;;  %v1736_v51 = vpop.xlane.xlu1 %1735  ;;  %vm1604_vm10 = vweird.f32 %v2071_v19 }
 0x702   :  { %v1677_v2 = vrot.slane %v1676_v20, 1  ;;  %v1737_v26 = vsel %vm84_vm0, %v1736_v51, 0.0  ;;  %vm1605_vm7 = vmor %vm1603_vm5, %vm1604_vm10  ;;  %v1695_v51 = vstv %s2016_s10 }
 0x703   :  { %v1599_v34 = vmul.f32 %v2071_v19, %v1598_v36  ;;  %v1738_v27 = vrot.slane %v1737_v26, 4 }
 0x704   :  { %v1678_v63 = vadd.f32 %v1677_v2, %v1676_v20 }
 0x705   :  { %v1600_v32 = vmul.f32 0.5, %v1599_v34  ;;  %v1739_v46 = vadd.f32 %v1738_v27, %v1737_v26  ;;  %v1697_v27 = vsub.f32 %v2807_v43, %v2841_v18 }
 0x706   :  { %v1680_v48 = vmul.f32 0.0078125, %v1678_v63  ;;  %v1698_v63 = vsub.f32 %v2809_v38, %v2841_v18 }
 0x707   :  { %v1601_v37 = vsub.f32 1.5, %v1600_v32  ;;  %v1740_v33 = vrot.slane %v1739_v46, 2 }
 0x708   :  { %v1682_v50 = vsub.f32 %v1680_v48, %v1681_v49 }
 0x709   :  { %v1602_v55 = vmul.f32 %v2071_v19, %v1601_v37  ;;  %v1741_v29 = vadd.f32 %v1740_v33, %v1739_v46  ;;  %v1702_v46 = vstv %s2017_s11 }
 0x70a   :  { %v1684_v31 = vadd.f32 1e-05, %v1682_v50  ;;  %v1759_v11 = vpop.xlane.xlu0 %1758 }
 0x70b   :  { %v1606_v28 = vsel %vm1605_vm7, %v2071_v19, %v1602_v55  ;;  %v1760_v44 = vsel %vm84_vm0, %v1759_v11, 0.0  ;;  %v1742_v52 = vrot.slane %v1741_v29, 1 }
 0x70c   :  { %v1608_v59 = vmul.f32 %v1607_v30, %v1606_v28  ;;  %2072 = vrsqrt.f32 %v1684_v31  ;;  %v1761_v41 = vrot.slane %v1760_v44, 4  ;;  %vm1691_vm12 = vweird.f32 %v1684_v31 }
 0x70d   :  { %v1743_v61 = vadd.f32 %v1742_v52, %v1741_v29 }
 0x70e   :  { %v1611_v57 = vmul.f32 %v1609_v17, %v1608_v59  ;;  %v1612_v58 = vmul.f32 %v1610_v56, %v1608_v59  ;;  %v1762_v60 = vadd.f32 %v1761_v41, %v1760_v44 }
 0x70f   :  { %v2851_v7 = vmul.f32 0.0078125, %v1743_v61  ;;  %v1790_v61 = vstv %s2022_s13 }
 0x710   :  { %v1615_v25 = vadd.f32 %v1614_v1, %v1611_v57  ;;  %v1616_v45 = vadd.f32 %v1614_v1, %v1612_v58  ;;  %v1763_v62 = vrot.slane %v1762_v60, 2 }
 0x712   :  { %v2073_v16 = vpop.eup %2072  ;;  %v1793_v21 = vadd.f32 %v1615_v25, %v2675_v35  ;;  %v1794_v22 = vadd.f32 %v1616_v45, %v2677_v13  ;;  %v1764_v3 = vadd.f32 %v1763_v62, %v1762_v60  ;;  %v1769_v13 = vmul.f32 %v2851_v7, %v2851_v7 }
 0x713   :  { %v1686_v54 = vmul.f32 %v2073_v16, %v1684_v31  ;;  %vm1692_vm11 = vweird.f32 %v2073_v16  ;;  %v1785_v60 = vsub.f32 %v2823_v5, %v2851_v7  ;;  %v1786_v25 = vsub.f32 %v2825_v39, %v2851_v7 }
 0x714   :  { %v1795_v0 = vmax.f32 %v1793_v21, 0.0  ;;  %v1796_v14 = vmax.f32 %v1794_v22, 0.0  ;;  %v1765_v6 = vrot.slane %v1764_v3, 1  ;;  %vm1693_vm13 = vmor %vm1691_vm12, %vm1692_vm11 }
 0x715   :  { %v1687_v9 = vmul.f32 %v2073_v16, %v1686_v54 }
 0x716   :  { %v1797_v15 = vmin.f32 %v1795_v0, 6.0  ;;  %v1798_v10 = vmin.f32 %v1796_v14, 6.0  ;;  %v1766_v12 = vadd.f32 %v1765_v6, %v1764_v3 }
 0x717   :  { %v1688_v47 = vmul.f32 0.5, %v1687_v9 }
 0x718   :  { %v1811_v8 = vmul.f32 %v1797_v15, %v2480_v4  ;;  %v1812_v35 = vmul.f32 %v1798_v10, %v2482_v53  ;;  %v1768_v19 = vmul.f32 0.0078125, %v1766_v12 }
 0x719   :  { %v1689_v20 = vsub.f32 1.5, %v1688_v47 }
 0x71a   :  { %1815 = vst [vmem:[#allocation1] ss:$9 sm:$0xff] %v1811_v8  ;;  %v1770_v36 = vsub.f32 %v1768_v19, %v1769_v13 }
 0x71b   :  { %1817 = vst [vmem:[#allocation1 + $0x1] ss:$9 sm:$0xff] %v1812_v35  ;;  %v1690_v2 = vmul.f32 %v2073_v16, %v1689_v20  ;;  %v1864_v20 = vstv %s2024_s15 }
 0x71c   :  { %v1772_v26 = vadd.f32 1e-05, %v1770_v36  ;;  %v1878_v36 = vstv %s2028_s17 }
 0x71d   :  { %v1694_v34 = vsel %vm1693_vm13, %v2073_v16, %v1690_v2 }
 0x71e   :  { %v1696_v32 = vmul.f32 %v1695_v51, %v1694_v34  ;;  %2074 = vrsqrt.f32 %v1772_v26  ;;  %vm1779_vm1 = vweird.f32 %v1772_v26  ;;  %v1892_v51 = vstv %s2032_s19 }
 0x71f   :  { %v1869_v34 = vstv %s2025_s21 }
 0x720   :  { %v1699_v49 = vmul.f32 %v1697_v27, %v1696_v32  ;;  %v1700_v48 = vmul.f32 %v1698_v63, %v1696_v32  ;;  %v1883_v27 = vstv %s2029_s22  ;;  %v1897_v63 = vstv %s2033_s23 }
 0x722   :  { %v1703_v37 = vadd.f32 %v1702_v46, %v1699_v49  ;;  %v1704_v33 = vadd.f32 %v1702_v46, %v1700_v48  ;;  %v1818_v50 = vld [vmem:[#allocation1] sm:$0xff]  ;;  %v1819_v30 = vld [vmem:[#allocation1 + $0x9] sm:$0xff]  ;;  %v1866_v48 = vstv %s2879_s14 }
 0x723   :  { %v1822_v55 = vsel %vm84_vm0, %v1818_v50, 0.0  ;;  %v1823_v29 = vsel %vm84_vm0, %v1819_v30, 0.0  ;;  %v1911_v50 = vstv %s2887_s24 }
 0x724   :  { %v2075_v31 = vpop.eup %2074  ;;  %v1799_v11 = vadd.f32 %v1703_v37, %v2670_v23  ;;  %v1800_v43 = vadd.f32 %v1704_v33, %v2672_v42  ;;  %v1824_v17 = vadd.f32 %v1823_v29, %v1822_v55  ;;  %v1783_v23 = vstv %s2021_s12 }
 0x725   :  { %v1774_v38 = vmul.f32 %v2075_v31, %v1772_v26  ;;  %vm1780_vm15 = vweird.f32 %v2075_v31  ;;  %v1906_v26 = vstv %s2036_s20  ;;  %v1880_v37 = vstv %s2881_s16 }
 0x726   :  { %v1801_v18 = vmax.f32 %v1799_v11, 0.0  ;;  %v1802_v56 = vmax.f32 %v1800_v43, 0.0  ;;  %1825 = vadd.xlane.f32.xlu2 %v1824_v17  ;;  %vm1781_vm2 = vmor %vm1779_vm1, %vm1780_vm15  ;;  %v1894_v33 = vstv %s2883_s18  ;;  %v1908_v11 = vstv %s2885_s0 }
 0x727   :  { %v1775_v28 = vmul.f32 %v2075_v31, %v1774_v38  ;;  %v1873_v43 = vstv %s2889_s25  ;;  %v1887_v17 = vstv %s2891_s26  ;;  %v1901_v38 = vstv %s2893_s1 }
 0x728   :  { %v1803_v44 = vmin.f32 %v1801_v18, 6.0  ;;  %v1804_v59 = vmin.f32 %v1802_v56, 6.0 }
 0x729   :  { %v1776_v52 = vmul.f32 0.5, %v1775_v28 }
 0x72a   :  { %v1828_v41 = vmul.f32 %v1803_v44, %v2480_v4  ;;  %v1829_v1 = vmul.f32 %v1804_v59, %v2482_v53  ;;  %v1915_v44 = vstv %s2895_s27 }
 0x72b   :  { %v1777_v57 = vsub.f32 1.5, %v1776_v52 }
 0x72c   :  { %1832 = vst [vmem:[#allocation1] ss:$9 sm:$0xff] %v1828_v41 }
 0x72d   :  { %v1778_v42 = vmul.f32 %v2075_v31, %v1777_v57  ;;  %1834 = vst [vmem:[#allocation1 + $0x1] ss:$9 sm:$0xff] %v1829_v1 }
 0x72f   :  { %v1782_v58 = vsel %vm1781_vm2, %v2075_v31, %v1778_v42 }
 0x730   :  { %v1784_v45 = vmul.f32 %v1783_v23, %v1782_v58 }
 0x732   :  { %v1787_v62 = vmul.f32 %v1785_v60, %v1784_v45  ;;  %v1788_v16 = vmul.f32 %v1786_v25, %v1784_v45 }
 0x734   :  { %v1791_v21 = vadd.f32 %v1790_v61, %v1787_v62  ;;  %v1792_v22 = vadd.f32 %v1790_v61, %v1788_v16  ;;  %v1835_v3 = vld [vmem:[#allocation1] sm:$0xff]  ;;  %v1836_v54 = vld [vmem:[#allocation1 + $0x9] sm:$0xff] }
 0x735   :  { %v1839_v0 = vsel %vm84_vm0, %v1835_v3, 0.0  ;;  %v1840_v14 = vsel %vm84_vm0, %v1836_v54, 0.0 }
 0x736   :  { %v1805_v6 = vadd.f32 %v1791_v21, %v2685_v24  ;;  %v1806_v9 = vadd.f32 %v1792_v22, %v2687_v40  ;;  %v1841_v5 = vadd.f32 %v1840_v14, %v1839_v0 }
 0x738   :  { %v1807_v15 = vmax.f32 %v1805_v6, 0.0  ;;  %v1808_v10 = vmax.f32 %v1806_v9, 0.0  ;;  %1842 = vadd.xlane.f32.xlu1 %v1841_v5 }
 0x73a   :  { %v1809_v39 = vmin.f32 %v1807_v15, 6.0  ;;  %v1810_v7 = vmin.f32 %v1808_v10, 6.0 }
 0x73c   :  { %v1845_v12 = vmul.f32 %v1809_v39, %v2480_v4  ;;  %v1846_v47 = vmul.f32 %v1810_v7, %v2482_v53 }
 0x73e   :  { %1849 = vst [vmem:[#allocation1] ss:$9 sm:$0xff] %v1845_v12 }
 0x73f   :  { %1851 = vst [vmem:[#allocation1 + $0x1] ss:$9 sm:$0xff] %v1846_v47 }
 0x746   :  { %v1852_v8 = vld [vmem:[#allocation1] sm:$0xff]  ;;  %v1853_v35 = vld [vmem:[#allocation1 + $0x9] sm:$0xff] }
 0x747   :  { %v1856_v19 = vsel %vm84_vm0, %v1852_v8, 0.0  ;;  %v1857_v24 = vsel %vm84_vm0, %v1853_v35, 0.0  ;;  %vm1919_vm0 = vcmask 15360  }
 0x748   :  { %v1858_v13 = vadd.f32 %v1857_v24, %v1856_v19 }
 0x74a   :  { %1859 = vadd.xlane.f32.xlu0 %v1858_v13 }
 0x799   :  { %v1826_v4 = vpop.xlane.xlu2 %1825 }
 0x79a   :  { %v1827_v40 = vmul.f32 0.015625, %v1826_v4 }
 0x79c   :  { %v1865_v32 = vmul.f32 %v1864_v20, %v1827_v40  ;;  %v1879_v46 = vmul.f32 %v1878_v36, %v1827_v40  ;;  %v1893_v49 = vmul.f32 %v1892_v51, %v1827_v40  ;;  %v1907_v30 = vmul.f32 %v1906_v26, %v1827_v40 }
 0x79e   :  { %v1867_v18 = vadd.f32 %v1866_v48, %v1865_v32  ;;  %v1881_v56 = vadd.f32 %v1880_v37, %v1879_v46  ;;  %v1895_v28 = vadd.f32 %v1894_v33, %v1893_v49  ;;  %v1909_v1 = vadd.f32 %v1908_v11, %v1907_v30 }
 0x7ab   :  { %v1843_v53 = vpop.xlane.xlu1 %1842 }
 0x7ac   :  { %v1844_v2 = vmul.f32 0.015625, %v1843_v53 }
 0x7ae   :  { %v1870_v55 = vmul.f32 %v1869_v34, %v1844_v2  ;;  %v1884_v29 = vmul.f32 %v1883_v27, %v1844_v2  ;;  %v1898_v31 = vmul.f32 %v1897_v63, %v1844_v2  ;;  %v1912_v52 = vmul.f32 %v1911_v50, %v1844_v2 }
 0x7b0   :  { %v1871_v57 = vadd.f32 %v1870_v55, %v1867_v18  ;;  %v1885_v23 = vadd.f32 %v1884_v29, %v1881_v56  ;;  %v1899_v42 = vadd.f32 %v1898_v31, %v1895_v28  ;;  %v1913_v21 = vadd.f32 %v1912_v52, %v1909_v1 }
 0x7bd   :  { %v1860_v59 = vpop.xlane.xlu0 %1859 }
 0x7be   :  { %v1861_v41 = vmul.f32 0.015625, %v1860_v59 }
 0x7c0   :  { %v1874_v58 = vmul.f32 %v1873_v43, %v1861_v41  ;;  %v1888_v60 = vmul.f32 %v1887_v17, %v1861_v41  ;;  %v1902_v25 = vmul.f32 %v1901_v38, %v1861_v41  ;;  %v1916_v45 = vmul.f32 %v1915_v44, %v1861_v41 }
 0x7c2   :  { %v1875_v61 = vadd.f32 %v1874_v58, %v1871_v57  ;;  %v1889_v62 = vadd.f32 %v1888_v60, %v1885_v23  ;;  %v1903_v16 = vadd.f32 %v1902_v25, %v1899_v42  ;;  %v1917_v22 = vadd.f32 %v1916_v45, %v1913_v21 }
 0x7c4   :  { %v1918_v3 = vsel %vm398_vm14, %v1875_v61, %v1889_v62 }
 0x7c5   :  { %v1920_v54 = vsel %vm1919_vm0, %v1918_v3, %v1903_v16 }
 0x7c6   :  { %v1922_v0 = vsel %vm1921_vm3, %v1920_v54, %v1917_v22 }
 0x7c7   :  { %1924 = vst.msk [vmem:[#allocation5] sm:$0x3] %vm1923_vm4, %v1922_v0 }
 0x7c8   :  { %1935 = dma.vmem_to_hbm [thread:$0]  %s1931_s29, 32, %s1933_s4, [#allocation3]  }
 0x7c9   :  { %2114 = dma.done.wait [#allocation3], 32  }
 0x7ca   :  { %2115 = vsyncadd [#allocation3], 4294967264 }
 0x7cb   :  { %1940 = vsyncpa [#allocation3], 1 }
 0x7cc   :  { %1941 = vsyncpa [#allocation4], 1 }

</bundles_post_ra>
